<compile_context>
chip_gen: v7x
topology: tpu7x:2x2x1
jax: 0.10.0
libtpu: 0.0.40
codegen_flags: <defaults>
</compile_context>

<pallas_src>
import numpy as np
import jax
import jax.numpy as jnp
from jax.experimental import pallas as pl
from jax.experimental.pallas import tpu as pltpu

# ----------------------------- module constants -----------------------------
N_FEATURES = 2
RES_3D = (16, 22, 31, 42, 57, 78, 106, 146, 199, 273, 374, 512)
LOG2_HASH_3D = 19
RES_2D = (64, 128, 256, 512, 1024)
LOG2_HASH_2D = 17
N_NEURONS = 64
GEO_FEAT_DIM = min(127, max(15, N_FEATURES * 10 - 1))   # = 19
MULTIRES = 10
SH_DIM = 16
SINE_DIM = 3 + 3 * 2 * MULTIRES                         # 63
FEAT_DIM = (len(RES_3D) * N_FEATURES                    # 24
            + 3 * len(RES_2D) * N_FEATURES              # 30
            + SINE_DIM)                                 # 63  -> 117
FEAT_PAD = 128                                          # zero-padded lanes
HEAD_IN = SH_DIM + GEO_FEAT_DIM                         # 35
TILE_N = 512                                            # rows per grid step

PRIMES = (1, 2654435761, 805459861)


def make_offsets(res_list, num_dim, log2_hashmap_size):
    max_params = 2 ** log2_hashmap_size
    offsets = [0]
    offset = 0
    for r in res_list:
        p = min(max_params, r ** num_dim)
        p = int(np.ceil(p / 8) * 8)
        offset += p
        offsets.append(offset)
    return offsets


OFF_3D = make_offsets(RES_3D, 3, LOG2_HASH_3D)
OFF_2D = make_offsets(RES_2D, 2, LOG2_HASH_2D)


# ------------------------- grid encoding (JAX glue) --------------------------
def grid_encode(x, table, offsets, res_list, num_dim, binarize=True):
    """x: (N, num_dim) in [0,1].  table: (T, F) raw params.  Returns (N, L*F).

    Binarization (STE_binary forward: >=0 -> +1, <0 -> -1, so 0 maps to +1,
    matching the reference's (p>=0)*1 + (p<0)*-1) is applied to the GATHERED
    values, so only O(N*corners*F) work instead of O(table).
    """
    # TODO(synk): hashing/interpolation approximates the torch-ngp CUDA
    # gridencoder (align-corners, xor-prime hash); exact parity not guaranteed.
    N = x.shape[0]
    F = table.shape[1]
    n_corners = 2 ** num_dim
    x = jnp.clip(x, 0.0, 1.0)

    idx_cols = []
    wt_cols = []
    for l, R in enumerate(res_list):
        hashmap_size = offsets[l + 1] - offsets[l]
        pos = x * float(R - 1)
        pos0f = jnp.floor(pos)
        w = pos - pos0f
        pos0 = pos0f.astype(jnp.int32)
        dense = (R ** num_dim) <= hashmap_size
        for corner in range(n_corners):
            wt = jnp.ones((N,), x.dtype)
            coords = []
            for d in range(num_dim):
                if (corner >> d) & 1:
                    coords.append(jnp.minimum(pos0[:, d] + 1, R - 1))
                    wt = wt * w[:, d]
                else:
                    coords.append(pos0[:, d])
                    wt = wt * (1.0 - w[:, d])
            if dense:
                idx = jnp.zeros((N,), jnp.uint32)
                stride = 1
                for d in range(num_dim):
                    idx = idx + coords[d].astype(jnp.uint32) * jnp.uint32(stride)
                    stride *= R
            else:
                idx = jnp.zeros((N,), jnp.uint32)
                for d in range(num_dim):
                    idx = idx ^ (coords[d].astype(jnp.uint32) * jnp.uint32(PRIMES[d]))
            idx = (idx % jnp.uint32(hashmap_size)).astype(jnp.int32) + int(offsets[l])
            idx_cols.append(idx)
            wt_cols.append(wt)

    idx = jnp.stack(idx_cols, axis=1)          # (N, L*C)
    wts = jnp.stack(wt_cols, axis=1)           # (N, L*C)
    g = jnp.take(table, idx, axis=0)           # (N, L*C, F) -- ONE gather per table
    if binarize:
        g = jnp.where(g >= 0, 1.0, -1.0).astype(x.dtype)
    out = wts[:, :, None] * g                  # (N, L*C, F)
    out = out.reshape(N, len(res_list), n_corners, F).sum(axis=2)
    return out.reshape(N, len(res_list) * F)


def sine_embed(x):
    outs = [x]
    freqs = 2.0 ** np.linspace(0.0, MULTIRES - 1, MULTIRES)
    for f in freqs:
        outs.append(jnp.sin(x * f))
        outs.append(jnp.cos(x * f))
    return jnp.concatenate(outs, axis=-1)


def sh_encode_deg4(d01):
    """tcnn SphericalHarmonics degree 4; input in [0,1] (mapped to [-1,1])."""
    x = 2.0 * d01[:, 0] - 1.0
    y = 2.0 * d01[:, 1] - 1.0
    z = 2.0 * d01[:, 2] - 1.0
    xy, xz, yz = x * y, x * z, y * z
    x2, y2, z2 = x * x, y * y, z * z
    out = [
        jnp.full_like(x, 0.28209479177387814),
        -0.48860251190291987 * y,
        0.48860251190291987 * z,
        -0.48860251190291987 * x,
        1.0925484305920792 * xy,
        -1.0925484305920792 * yz,
        0.94617469575755997 * z2 - 0.31539156525251999,
        -1.0925484305920792 * xz,
        0.54627421529603959 * x2 - 0.54627421529603959 * y2,
        0.59004358992664352 * y * (-3.0 * x2 + y2),
        2.8906114426405538 * xy * z,
        0.45704579946446572 * y * (1.0 - 5.0 * z2),
        0.3731763325901154 * z * (5.0 * z2 - 3.0),
        0.45704579946446572 * x * (1.0 - 5.0 * z2),
        1.4453057213202769 * z * (x2 - y2),
        0.59004358992664352 * x * (-x2 + 3.0 * y2),
    ]
    return jnp.stack(out, axis=-1)


# ------------------------------ Pallas kernel --------------------------------
def fused_ngp_kernel(feat_ref, sh_ref,
                     bw1_ref, bb1_ref, bw2g_ref, bb2g_ref, bw2d_ref, bb2d_ref,
                     hw1s_ref, hw1g_ref, hb1_ref, hw2_ref, hb2_ref,
                     hw3_ref, hb3_ref,
                     out_ref):
    """Fused base MLP + density act + head MLP + sigmoid.

    Output layout (TILE_N, 4): lanes 0..2 = rgb, lane 3 = density (pre-selector).
    No in-kernel lane slicing; weights arrive pre-split / zero-padded.
    """
    # ---- base MLP (feat padded to 128 lanes; bf16 inputs, f32 accumulate) ----
    h1 = jnp.dot(feat_ref[...], bw1_ref[...],
                 preferred_element_type=jnp.float32) + bb1_ref[...]
    h1 = jnp.maximum(h1, 0.0).astype(jnp.bfloat16)                    # (T, 64)

    geo = jnp.dot(h1, bw2g_ref[...],
                  preferred_element_type=jnp.float32) + bb2g_ref[...]  # (T, 19) f32
    # density column lives in lane 3 of a width-4 slab (lanes 0..2 are zero)
    dpre = jnp.dot(h1, bw2d_ref[...],
                   preferred_element_type=jnp.float32) + bb2d_ref[...]  # (T, 4)

    # ---- head MLP: concat([sh, geo]) realized as two dots summed ------------
    z1 = (jnp.dot(sh_ref[...], hw1s_ref[...], preferred_element_type=jnp.float32)
          + jnp.dot(geo.astype(jnp.bfloat16), hw1g_ref[...],
                    preferred_element_type=jnp.float32)
          + hb1_ref[...])
    z1 = jnp.maximum(z1, 0.0).astype(jnp.bfloat16)                    # (T, 64)
    z2 = jnp.dot(z1, hw2_ref[...],
                 preferred_element_type=jnp.float32) + hb2_ref[...]
    z2 = jnp.maximum(z2, 0.0).astype(jnp.bfloat16)                    # (T, 64)
    z3 = jnp.dot(z2, hw3_ref[...],
                 preferred_element_type=jnp.float32) + hb3_ref[...]    # (T, 4)

    # density_activation = trunc_exp(x - 1); trunc_exp forward is plain exp.
    lane = jax.lax.broadcasted_iota(jnp.int32, z3.shape, 1)
    out_ref[...] = jnp.where(lane == 3, jnp.exp(dpre - 1.0),
                             jax.nn.sigmoid(z3))


def run_fused_mlp(feat_pad, sh_pad, wp):
    n_rows = feat_pad.shape[0]
    n_blocks = n_rows // TILE_N

    def full(a):
        return pl.BlockSpec(a.shape, lambda i: (0, 0))

    return pl.pallas_call(
        fused_ngp_kernel,
        out_shape=jax.ShapeDtypeStruct((n_rows, 4), jnp.float32),
        grid=(n_blocks,),
        in_specs=[pl.BlockSpec((TILE_N, FEAT_PAD), lambda i: (i, 0)),
                  pl.BlockSpec((TILE_N, SH_DIM), lambda i: (i, 0)),
                  full(wp["bw1"]), full(wp["bb1"]),
                  full(wp["bw2g"]), full(wp["bb2g"]),
                  full(wp["bw2d"]), full(wp["bb2d"]),
                  full(wp["hw1s"]), full(wp["hw1g"]), full(wp["hb1"]),
                  full(wp["hw2"]), full(wp["hb2"]),
                  full(wp["hw3"]), full(wp["hb3"])],
        out_specs=pl.BlockSpec((TILE_N, 4), lambda i: (i, 0)),
        compiler_params=pltpu.CompilerParams(
            dimension_semantics=("parallel",)),
    )(feat_pad, sh_pad,
      wp["bw1"], wp["bb1"], wp["bw2g"], wp["bb2g"], wp["bw2d"], wp["bb2d"],
      wp["hw1s"], wp["hw1g"], wp["hb1"], wp["hw2"], wp["hb2"],
      wp["hw3"], wp["hb3"])


# ------------------------------ parameter init -------------------------------
def linear_init(key, fan_in, fan_out):
    k1, k2 = jax.random.split(key)
    bound = 1.0 / np.sqrt(fan_in)
    w = jax.random.uniform(k1, (fan_in, fan_out), jnp.float32, -bound, bound)
    b = jax.random.uniform(k2, (1, fan_out), jnp.float32, -bound, bound)
    return w, b


def init_params(key):
    keys = jax.random.split(key, 16)
    std = 1e-4
    params = {
        "aabb": jnp.array([-1.0, -1.0, -1.0, 1.0, 1.0, 1.0], jnp.float32),
        "grid_xyz": jax.random.uniform(keys[0], (OFF_3D[-1], N_FEATURES),
                                       jnp.float32, -std, std),
        "grid_xy": jax.random.uniform(keys[1], (OFF_2D[-1], N_FEATURES),
                                      jnp.float32, -std, std),
        "grid_xz": jax.random.uniform(keys[2], (OFF_2D[-1], N_FEATURES),
                                      jnp.float32, -std, std),
        "grid_yz": jax.random.uniform(keys[3], (OFF_2D[-1], N_FEATURES),
                                      jnp.float32, -std, std),
    }
    params["base_w1"], params["base_b1"] = linear_init(keys[4], FEAT_DIM, N_NEURONS)
    params["base_w2"], params["base_b2"] = linear_init(keys[5], N_NEURONS, 1 + GEO_FEAT_DIM)
    params["head_w1"], params["head_b1"] = linear_init(keys[6], HEAD_IN, N_NEURONS)
    params["head_w2"], params["head_b2"] = linear_init(keys[7], N_NEURONS, N_NEURONS)
    params["head_w3"], params["head_b3"] = linear_init(keys[8], N_NEURONS, 3)
    return params


def prep_mlp_weights(params):
    """Pad/split/cast MLP weights for the fused kernel (done at trace time)."""
    bf16 = jnp.bfloat16
    # base layer 1: pad K 117 -> 128 with zero rows
    bw1 = jnp.zeros((FEAT_PAD, N_NEURONS), jnp.float32)
    bw1 = bw1.at[:FEAT_DIM].set(params["base_w1"]).astype(bf16)
    bb1 = params["base_b1"]                                  # (1, 64) f32
    # base layer 2: split density col (-> lane 3 of a width-4 slab) and geo cols
    w2, b2 = params["base_w2"], params["base_b2"]            # (64, 20), (1, 20)
    bw2g = w2[:, 1:].astype(bf16)                            # (64, 19)
    bb2g = b2[:, 1:]                                         # (1, 19) f32
    bw2d = jnp.zeros((N_NEURONS, 4), jnp.float32).at[:, 3].set(w2[:, 0]).astype(bf16)
    bb2d = jnp.zeros((1, 4), jnp.float32).at[:, 3].set(b2[0, 0])
    # head layer 1: split into SH part and geo part (concat -> two dots)
    hw1 = params["head_w1"]                                  # (35, 64)
    hw1s = hw1[:SH_DIM].astype(bf16)                         # (16, 64)
    hw1g = hw1[SH_DIM:].astype(bf16)                         # (19, 64)
    hb1 = params["head_b1"]                                  # (1, 64) f32
    hw2 = params["head_w2"].astype(bf16)                     # (64, 64)
    hb2 = params["head_b2"]                                  # (1, 64) f32
    # head layer 3: pad N 3 -> 4 (lane 3 unused, overwritten with density)
    hw3 = jnp.zeros((N_NEURONS, 4), jnp.float32).at[:, :3].set(params["head_w3"]).astype(bf16)
    hb3 = jnp.zeros((1, 4), jnp.float32).at[:, :3].set(params["head_b3"][0])
    return dict(bw1=bw1, bb1=bb1, bw2g=bw2g, bb2g=bb2g, bw2d=bw2d, bb2d=bb2d,
                hw1s=hw1s, hw1g=hw1g, hb1=hb1, hw2=hw2, hb2=hb2, hw3=hw3, hb3=hb3)


# --------------------------------- forward -----------------------------------
def ngp_forward(params, positions, directions):
    aabb = params["aabb"]
    aabb_min, aabb_max = aabb[:3], aabb[3:]
    x = (positions - aabb_min) / (aabb_max - aabb_min)
    selector = jnp.all((x > 0.0) & (x < 1.0), axis=-1).astype(jnp.float32)[:, None]

    # grid encodings (STE_binary sign applied post-gather inside grid_encode)
    out_xyz = grid_encode(x, params["grid_xyz"], OFF_3D, RES_3D, 3)
    out_xy = grid_encode(x[:, (0, 1)], params["grid_xy"], OFF_2D, RES_2D, 2)
    out_xz = grid_encode(x[:, (0, 2)], params["grid_xz"], OFF_2D, RES_2D, 2)
    out_yz = grid_encode(x[:, (1, 2)], params["grid_yz"], OFF_2D, RES_2D, 2)
    out_sine = sine_embed(x)
    feat = jnp.concatenate([out_xyz, out_xy, out_xz, out_yz, out_sine], axis=-1)

    dirs01 = (directions + 1.0) / 2.0
    sh = sh_encode_deg4(dirs01)

    # pad rows to a TILE_N multiple and feat lanes 117 -> 128; cast to bf16
    N = feat.shape[0]
    n_pad = (-N) % TILE_N
    feat_pad = jnp.pad(feat, ((0, n_pad), (0, FEAT_PAD - FEAT_DIM))).astype(jnp.bfloat16)
    sh_pad = jnp.pad(sh, ((0, n_pad), (0, 0))).astype(jnp.bfloat16)

    wp = prep_mlp_weights(params)
    out = run_fused_mlp(feat_pad, sh_pad, wp)[:N]             # (N, 4) f32
    rgb = out[:, :3]
    density = out[:, 3:4] * selector
    return rgb, density


# ----------------------------------- main -------------------------------------
if __name__ == "__main__":
    key = jax.random.PRNGKey(0)
    k_param, k_pos, k_dir = jax.random.split(key, 3)

    params = init_params(k_param)

    N = 2048  # rays (multiple of TILE_N -> 4 grid blocks)
    positions = jax.random.uniform(k_pos, (N, 3), jnp.float32, -0.9, 0.9)
    directions = jax.random.normal(k_dir, (N, 3), jnp.float32)
    directions = directions / jnp.linalg.norm(directions, axis=-1, keepdims=True)

    rgb, density = jax.jit(ngp_forward)(params, positions, directions)
    jax.block_until_ready((rgb, density))

    assert rgb.shape == (N, 3) and density.shape == (N, 1)
    assert bool(jnp.all(jnp.isfinite(rgb))) and bool(jnp.all(jnp.isfinite(density)))
    assert bool(jnp.all((rgb >= 0.0) & (rgb <= 1.0))) and bool(jnp.all(density >= 0.0))
    print("KERNEL_OK")
</pallas_src>

<mosaic_0001>
module attributes {stable_mosaic.version = 11 : i64} {
  func.func private @main(%arg0: i32) attributes {dimension_semantics = [#tpu.dimension_semantics<core_parallel>], iteration_bounds = array<i64: 2>, tpu.core_type = #tpu.core_type<sc_scalar_subcore>, window_params = []} {
    return
  }
}

module attributes {stable_mosaic.version = 11 : i64} {
  func.func private @main(%arg0: i32) attributes {dimension_semantics = [#tpu.dimension_semantics<core_parallel>], iteration_bounds = array<i64: 2>, tpu.core_type = #tpu.core_type<sc_scalar_subcore>, window_params = []} {
    return
  }
}

module attributes {stable_mosaic.version = 11 : i64} {
  func.func @fused_ngp_kernel(%arg0: i32, %arg1: memref<512x128xbf16, #tpu.memory_space<vmem>>, %arg2: memref<512x16xbf16, #tpu.memory_space<vmem>>, %arg3: memref<128x64xbf16, #tpu.memory_space<vmem>>, %arg4: memref<1x64xf32, #tpu.memory_space<vmem>>, %arg5: memref<64x19xbf16, #tpu.memory_space<vmem>>, %arg6: memref<1x19xf32, #tpu.memory_space<vmem>>, %arg7: memref<64x4xbf16, #tpu.memory_space<vmem>>, %arg8: memref<1x4xf32, #tpu.memory_space<vmem>>, %arg9: memref<16x64xbf16, #tpu.memory_space<vmem>>, %arg10: memref<19x64xbf16, #tpu.memory_space<vmem>>, %arg11: memref<1x64xf32, #tpu.memory_space<vmem>>, %arg12: memref<64x64xbf16, #tpu.memory_space<vmem>>, %arg13: memref<1x64xf32, #tpu.memory_space<vmem>>, %arg14: memref<64x4xbf16, #tpu.memory_space<vmem>>, %arg15: memref<1x4xf32, #tpu.memory_space<vmem>>, %arg16: memref<512x4xf32, #tpu.memory_space<vmem>>) attributes {dimension_semantics = [#tpu.dimension_semantics<parallel>], iteration_bounds = array<i64: 4>, scalar_prefetch = 0 : i64, scratch_operands = 0 : i64, tpu.core_type = #tpu.core_type<tc>, window_params = [{transform_indices = @transform_0, window_bounds = array<i64: 512, 128>}, {transform_indices = @transform_1, window_bounds = array<i64: 512, 16>}, {pipeline_mode = #tpu.pipeline_mode<synchronous>, transform_indices = @transform_2, window_bounds = array<i64: 128, 64>}, {pipeline_mode = #tpu.pipeline_mode<synchronous>, transform_indices = @transform_3, window_bounds = array<i64: 1, 64>}, {pipeline_mode = #tpu.pipeline_mode<synchronous>, transform_indices = @transform_4, window_bounds = array<i64: 64, 19>}, {pipeline_mode = #tpu.pipeline_mode<synchronous>, transform_indices = @transform_5, window_bounds = array<i64: 1, 19>}, {pipeline_mode = #tpu.pipeline_mode<synchronous>, transform_indices = @transform_6, window_bounds = array<i64: 64, 4>}, {pipeline_mode = #tpu.pipeline_mode<synchronous>, transform_indices = @transform_7, window_bounds = array<i64: 1, 4>}, {pipeline_mode = #tpu.pipeline_mode<synchronous>, transform_indices = @transform_8, window_bounds = array<i64: 16, 64>}, {pipeline_mode = #tpu.pipeline_mode<synchronous>, transform_indices = @transform_9, window_bounds = array<i64: 19, 64>}, {pipeline_mode = #tpu.pipeline_mode<synchronous>, transform_indices = @transform_10, window_bounds = array<i64: 1, 64>}, {pipeline_mode = #tpu.pipeline_mode<synchronous>, transform_indices = @transform_11, window_bounds = array<i64: 64, 64>}, {pipeline_mode = #tpu.pipeline_mode<synchronous>, transform_indices = @transform_12, window_bounds = array<i64: 1, 64>}, {pipeline_mode = #tpu.pipeline_mode<synchronous>, transform_indices = @transform_13, window_bounds = array<i64: 64, 4>}, {pipeline_mode = #tpu.pipeline_mode<synchronous>, transform_indices = @transform_14, window_bounds = array<i64: 1, 4>}, {transform_indices = @transform_15, window_bounds = array<i64: 512, 4>}]} {
    %c0 = arith.constant 0 : index
    %c0_0 = arith.constant 0 : index
    %0 = vector.load %arg1[%c0, %c0_0] : memref<512x128xbf16, #tpu.memory_space<vmem>>, vector<512x128xbf16>
    %c0_1 = arith.constant 0 : index
    %c0_2 = arith.constant 0 : index
    %1 = vector.load %arg3[%c0_1, %c0_2] : memref<128x64xbf16, #tpu.memory_space<vmem>>, vector<128x64xbf16>
    %cst = arith.constant dense<0.000000e+00> : vector<512x64xf32>
    %2 = tpu.matmul %0, %1, %cst {dimension_numbers = #tpu.dot_dimension_numbers<[1], [0], [0], [1], [0, 0, 1, 1], [], []>} : vector<512x128xbf16>, vector<128x64xbf16>, vector<512x64xf32> -> vector<512x64xf32>
    %c0_3 = arith.constant 0 : index
    %c0_4 = arith.constant 0 : index
    %3 = vector.load %arg4[%c0_3, %c0_4] : memref<1x64xf32, #tpu.memory_space<vmem>>, vector<1x64xf32>
    %4 = vector.broadcast %3 : vector<1x64xf32> to vector<512x64xf32>
    %5 = arith.addf %2, %4 : vector<512x64xf32>
    %cst_5 = arith.constant 0.000000e+00 : f32
    %6 = vector.broadcast %cst_5 : f32 to vector<512x64xf32>
    %7 = arith.maximumf %5, %6 : vector<512x64xf32>
    %8 = arith.truncf %7 : vector<512x64xf32> to vector<512x64xbf16>
    %c0_6 = arith.constant 0 : index
    %c0_7 = arith.constant 0 : index
    %9 = vector.load %arg5[%c0_6, %c0_7] : memref<64x19xbf16, #tpu.memory_space<vmem>>, vector<64x19xbf16>
    %cst_8 = arith.constant dense<0.000000e+00> : vector<512x19xf32>
    %10 = tpu.matmul %8, %9, %cst_8 {dimension_numbers = #tpu.dot_dimension_numbers<[1], [0], [0], [1], [0, 0, 1, 1], [], []>} : vector<512x64xbf16>, vector<64x19xbf16>, vector<512x19xf32> -> vector<512x19xf32>
    %c0_9 = arith.constant 0 : index
    %c0_10 = arith.constant 0 : index
    %11 = vector.load %arg6[%c0_9, %c0_10] : memref<1x19xf32, #tpu.memory_space<vmem>>, vector<1x19xf32>
    %12 = vector.broadcast %11 : vector<1x19xf32> to vector<512x19xf32>
    %13 = arith.addf %10, %12 : vector<512x19xf32>
    %c0_11 = arith.constant 0 : index
    %c0_12 = arith.constant 0 : index
    %14 = vector.load %arg7[%c0_11, %c0_12] : memref<64x4xbf16, #tpu.memory_space<vmem>>, vector<64x4xbf16>
    %cst_13 = arith.constant dense<0.000000e+00> : vector<512x4xf32>
    %15 = tpu.matmul %8, %14, %cst_13 {dimension_numbers = #tpu.dot_dimension_numbers<[1], [0], [0], [1], [0, 0, 1, 1], [], []>} : vector<512x64xbf16>, vector<64x4xbf16>, vector<512x4xf32> -> vector<512x4xf32>
    %c0_14 = arith.constant 0 : index
    %c0_15 = arith.constant 0 : index
    %16 = vector.load %arg8[%c0_14, %c0_15] : memref<1x4xf32, #tpu.memory_space<vmem>>, vector<1x4xf32>
    %17 = vector.broadcast %16 : vector<1x4xf32> to vector<512x4xf32>
    %18 = arith.addf %15, %17 : vector<512x4xf32>
    %c0_16 = arith.constant 0 : index
    %c0_17 = arith.constant 0 : index
    %19 = vector.load %arg2[%c0_16, %c0_17] : memref<512x16xbf16, #tpu.memory_space<vmem>>, vector<512x16xbf16>
    %c0_18 = arith.constant 0 : index
    %c0_19 = arith.constant 0 : index
    %20 = vector.load %arg9[%c0_18, %c0_19] : memref<16x64xbf16, #tpu.memory_space<vmem>>, vector<16x64xbf16>
    %cst_20 = arith.constant dense<0.000000e+00> : vector<512x64xf32>
    %21 = tpu.matmul %19, %20, %cst_20 {dimension_numbers = #tpu.dot_dimension_numbers<[1], [0], [0], [1], [0, 0, 1, 1], [], []>} : vector<512x16xbf16>, vector<16x64xbf16>, vector<512x64xf32> -> vector<512x64xf32>
    %22 = arith.truncf %13 : vector<512x19xf32> to vector<512x19xbf16>
    %c0_21 = arith.constant 0 : index
    %c0_22 = arith.constant 0 : index
    %23 = vector.load %arg10[%c0_21, %c0_22] : memref<19x64xbf16, #tpu.memory_space<vmem>>, vector<19x64xbf16>
    %cst_23 = arith.constant dense<0.000000e+00> : vector<512x64xf32>
    %24 = tpu.matmul %22, %23, %cst_23 {dimension_numbers = #tpu.dot_dimension_numbers<[1], [0], [0], [1], [0, 0, 1, 1], [], []>} : vector<512x19xbf16>, vector<19x64xbf16>, vector<512x64xf32> -> vector<512x64xf32>
    %25 = arith.addf %21, %24 : vector<512x64xf32>
    %c0_24 = arith.constant 0 : index
    %c0_25 = arith.constant 0 : index
    %26 = vector.load %arg11[%c0_24, %c0_25] : memref<1x64xf32, #tpu.memory_space<vmem>>, vector<1x64xf32>
    %27 = vector.broadcast %26 : vector<1x64xf32> to vector<512x64xf32>
    %28 = arith.addf %25, %27 : vector<512x64xf32>
    %cst_26 = arith.constant 0.000000e+00 : f32
    %29 = vector.broadcast %cst_26 : f32 to vector<512x64xf32>
    %30 = arith.maximumf %28, %29 : vector<512x64xf32>
    %31 = arith.truncf %30 : vector<512x64xf32> to vector<512x64xbf16>
    %c0_27 = arith.constant 0 : index
    %c0_28 = arith.constant 0 : index
    %32 = vector.load %arg12[%c0_27, %c0_28] : memref<64x64xbf16, #tpu.memory_space<vmem>>, vector<64x64xbf16>
    %cst_29 = arith.constant dense<0.000000e+00> : vector<512x64xf32>
    %33 = tpu.matmul %31, %32, %cst_29 {dimension_numbers = #tpu.dot_dimension_numbers<[1], [0], [0], [1], [0, 0, 1, 1], [], []>} : vector<512x64xbf16>, vector<64x64xbf16>, vector<512x64xf32> -> vector<512x64xf32>
    %c0_30 = arith.constant 0 : index
    %c0_31 = arith.constant 0 : index
    %34 = vector.load %arg13[%c0_30, %c0_31] : memref<1x64xf32, #tpu.memory_space<vmem>>, vector<1x64xf32>
    %35 = vector.broadcast %34 : vector<1x64xf32> to vector<512x64xf32>
    %36 = arith.addf %33, %35 : vector<512x64xf32>
    %cst_32 = arith.constant 0.000000e+00 : f32
    %37 = vector.broadcast %cst_32 : f32 to vector<512x64xf32>
    %38 = arith.maximumf %36, %37 : vector<512x64xf32>
    %39 = arith.truncf %38 : vector<512x64xf32> to vector<512x64xbf16>
    %c0_33 = arith.constant 0 : index
    %c0_34 = arith.constant 0 : index
    %40 = vector.load %arg14[%c0_33, %c0_34] : memref<64x4xbf16, #tpu.memory_space<vmem>>, vector<64x4xbf16>
    %cst_35 = arith.constant dense<0.000000e+00> : vector<512x4xf32>
    %41 = tpu.matmul %39, %40, %cst_35 {dimension_numbers = #tpu.dot_dimension_numbers<[1], [0], [0], [1], [0, 0, 1, 1], [], []>} : vector<512x64xbf16>, vector<64x4xbf16>, vector<512x4xf32> -> vector<512x4xf32>
    %c0_36 = arith.constant 0 : index
    %c0_37 = arith.constant 0 : index
    %42 = vector.load %arg15[%c0_36, %c0_37] : memref<1x4xf32, #tpu.memory_space<vmem>>, vector<1x4xf32>
    %43 = vector.broadcast %42 : vector<1x4xf32> to vector<512x4xf32>
    %44 = arith.addf %41, %43 : vector<512x4xf32>
    %45 = tpu.iota {dimensions = array<i32: 1>} : vector<512x4xi32>
    %c3_i32 = arith.constant 3 : i32
    %46 = vector.broadcast %c3_i32 : i32 to vector<512x4xi32>
    %47 = arith.cmpi eq, %45, %46 : vector<512x4xi32>
    %cst_38 = arith.constant 1.000000e+00 : f32
    %48 = vector.broadcast %cst_38 : f32 to vector<512x4xf32>
    %49 = arith.subf %18, %48 : vector<512x4xf32>
    %50 = math.exp %49 : vector<512x4xf32>
    %51 = arith.negf %44 : vector<512x4xf32>
    %52 = math.exp %51 : vector<512x4xf32>
    %cst_39 = arith.constant 1.000000e+00 : f32
    %53 = vector.broadcast %cst_39 : f32 to vector<512x4xf32>
    %54 = arith.addf %53, %52 : vector<512x4xf32>
    %55 = arith.divf %53, %54 : vector<512x4xf32>
    %56 = arith.select %47, %50, %55 : vector<512x4xi1>, vector<512x4xf32>
    %c0_40 = arith.constant 0 : index
    %c0_41 = arith.constant 0 : index
    %57 = vector.load %arg16[%c0_40, %c0_41] : memref<512x4xf32, #tpu.memory_space<vmem>>, vector<512x4xf32>
    tpu.vector_store %arg16[%c0_40, %c0_41], %56 {strides = array<i32>} : memref<512x4xf32, #tpu.memory_space<vmem>>, vector<512x4xf32>,
    return
  }
  func.func @transform_0(%arg0: i32) -> (i32, i32) {
    %c0_i32 = arith.constant 0 : i32
    %c0_i32_0 = arith.constant 0 : i32
    return %arg0, %c0_i32 : i32, i32
  }
  func.func @transform_1(%arg0: i32) -> (i32, i32) {
    %c0_i32 = arith.constant 0 : i32
    %c0_i32_0 = arith.constant 0 : i32
    return %arg0, %c0_i32 : i32, i32
  }
  func.func @transform_2(%arg0: i32) -> (i32, i32) {
    %c0_i32 = arith.constant 0 : i32
    %c0_i32_0 = arith.constant 0 : i32
    %c0_i32_1 = arith.constant 0 : i32
    return %c0_i32, %c0_i32_0 : i32, i32
  }
  func.func @transform_3(%arg0: i32) -> (i32, i32) {
    %c0_i32 = arith.constant 0 : i32
    %c0_i32_0 = arith.constant 0 : i32
    %c0_i32_1 = arith.constant 0 : i32
    return %c0_i32, %c0_i32_0 : i32, i32
  }
  func.func @transform_4(%arg0: i32) -> (i32, i32) {
    %c0_i32 = arith.constant 0 : i32
    %c0_i32_0 = arith.constant 0 : i32
    %c0_i32_1 = arith.constant 0 : i32
    return %c0_i32, %c0_i32_0 : i32, i32
  }
  func.func @transform_5(%arg0: i32) -> (i32, i32) {
    %c0_i32 = arith.constant 0 : i32
    %c0_i32_0 = arith.constant 0 : i32
    %c0_i32_1 = arith.constant 0 : i32
    return %c0_i32, %c0_i32_0 : i32, i32
  }
  func.func @transform_6(%arg0: i32) -> (i32, i32) {
    %c0_i32 = arith.constant 0 : i32
    %c0_i32_0 = arith.constant 0 : i32
    %c0_i32_1 = arith.constant 0 : i32
    return %c0_i32, %c0_i32_0 : i32, i32
  }
  func.func @transform_7(%arg0: i32) -> (i32, i32) {
    %c0_i32 = arith.constant 0 : i32
    %c0_i32_0 = arith.constant 0 : i32
    %c0_i32_1 = arith.constant 0 : i32
    return %c0_i32, %c0_i32_0 : i32, i32
  }
  func.func @transform_8(%arg0: i32) -> (i32, i32) {
    %c0_i32 = arith.constant 0 : i32
    %c0_i32_0 = arith.constant 0 : i32
    %c0_i32_1 = arith.constant 0 : i32
    return %c0_i32, %c0_i32_0 : i32, i32
  }
  func.func @transform_9(%arg0: i32) -> (i32, i32) {
    %c0_i32 = arith.constant 0 : i32
    %c0_i32_0 = arith.constant 0 : i32
    %c0_i32_1 = arith.constant 0 : i32
    return %c0_i32, %c0_i32_0 : i32, i32
  }
  func.func @transform_10(%arg0: i32) -> (i32, i32) {
    %c0_i32 = arith.constant 0 : i32
    %c0_i32_0 = arith.constant 0 : i32
    %c0_i32_1 = arith.constant 0 : i32
    return %c0_i32, %c0_i32_0 : i32, i32
  }
  func.func @transform_11(%arg0: i32) -> (i32, i32) {
    %c0_i32 = arith.constant 0 : i32
    %c0_i32_0 = arith.constant 0 : i32
    %c0_i32_1 = arith.constant 0 : i32
    return %c0_i32, %c0_i32_0 : i32, i32
  }
  func.func @transform_12(%arg0: i32) -> (i32, i32) {
    %c0_i32 = arith.constant 0 : i32
    %c0_i32_0 = arith.constant 0 : i32
    %c0_i32_1 = arith.constant 0 : i32
    return %c0_i32, %c0_i32_0 : i32, i32
  }
  func.func @transform_13(%arg0: i32) -> (i32, i32) {
    %c0_i32 = arith.constant 0 : i32
    %c0_i32_0 = arith.constant 0 : i32
    %c0_i32_1 = arith.constant 0 : i32
    return %c0_i32, %c0_i32_0 : i32, i32
  }
  func.func @transform_14(%arg0: i32) -> (i32, i32) {
    %c0_i32 = arith.constant 0 : i32
    %c0_i32_0 = arith.constant 0 : i32
    %c0_i32_1 = arith.constant 0 : i32
    return %c0_i32, %c0_i32_0 : i32, i32
  }
  func.func @transform_15(%arg0: i32) -> (i32, i32) {
    %c0_i32 = arith.constant 0 : i32
    %c0_i32_0 = arith.constant 0 : i32
    return %arg0, %c0_i32 : i32, i32
  }
}

</mosaic_0001>

<bundles_post_ra>
// kernel: ngp_forward.1
= control target key start
LH: loop header
LB: loop body
LE: loop exit
PB: predicated region body
PF: predicated region fallthrough
CT: control target
= control target key end

     0   :  { %s6758_s18 = smov 0   ;;  %s8310_s0 = inlined_call_operand.vmem [shape: bf16[2048,128], index: 0, kind: input, shape index: {}]   ;;  %s8311_s1 = inlined_call_operand.vmem [shape: bf16[2048,16], index: 1, kind: input, shape index: {}]   ;;  %s8312_s2 = inlined_call_operand.vmem [shape: bf16[128,64], index: 2, kind: input, shape index: {}]   ;;  %s8313_s3 = inlined_call_operand.vmem [shape: f32[1,64], index: 3, kind: input, shape index: {}]   ;;  %s8314_s4 = inlined_call_operand.vmem [shape: bf16[64,19], index: 4, kind: input, shape index: {}]   ;;  %s8315_s5 = inlined_call_operand.vmem [shape: f32[1,19], index: 5, kind: input, shape index: {}]   ;;  %s8316_s6 = inlined_call_operand.vmem [shape: bf16[64,4], index: 6, kind: input, shape index: {}]   ;;  %s8317_s7 = inlined_call_operand.vmem [shape: f32[1,4], index: 7, kind: input, shape index: {}]   ;;  %s8318_s8 = inlined_call_operand.vmem [shape: bf16[16,64], index: 8, kind: input, shape index: {}]   ;;  %s8319_s9 = inlined_call_operand.vmem [shape: bf16[19,64], index: 9, kind: input, shape index: {}]   ;;  %s8320_s10 = inlined_call_operand.vmem [shape: f32[1,64], index: 10, kind: input, shape index: {}]   ;;  %s8321_s11 = inlined_call_operand.vmem [shape: bf16[64,64], index: 11, kind: input, shape index: {}]   ;;  %s8322_s12 = inlined_call_operand.vmem [shape: f32[1,64], index: 12, kind: input, shape index: {}]   ;;  %s8323_s13 = inlined_call_operand.vmem [shape: bf16[64,4], index: 13, kind: input, shape index: {}]   ;;  %s8324_s14 = inlined_call_operand.vmem [shape: f32[1,4], index: 14, kind: input, shape index: {}]   ;;  %s8325_s15 = inlined_call_operand.vmem [shape: f32[2048,4], index: 15, kind: output, shape index: {}]  }
   0x1 LB: > { %s4928_s19 = sadd.s32 4294967295, %s6675_s18   ;;  %p4932_p0 = scmp.ge.s32.totalorder %s6675_s18, 1  ;;  %s6675_s18 = sphi %s6758_s18, %s25_s18  }
   0x2   : > { %p449_p1 = scmp.lt.s32.totalorder %s6675_s18, 5 }
   0x4   : > { %p450_p2 = pnand %p4932_p0, %p449_p1 }
   0x6   : > { %453 = sbr.rel (%p450_p2) target bundleno = 1431 (0x597), region = 80 }
   0xd   : > { %v6192_v0 = vld [vmem:[%s8312_s2] sm:$0xff]   ;;  %s4933_s22 = sshll.u32 %s4928_s19, 6  ;;  %v6193_v1 = vld [vmem:[%s8312_s2 + $0x8] sm:$0xff]   ;;  %v6194_v2 = vld [vmem:[%s8312_s2 + $0x10] sm:$0xff]   ;;  %vm1272_vm0 = vcmask 523264   ;;  %vm2193_vm1 = vcmask 1040384  }
   0xe   : > { %p503_p3 = scmp.lt.s32.totalorder %s4933_s22, 255  ;;  %5609 = vmatprep.subr.bf16.mxu0 %v6192_v0  ;;  %v6195_v3 = vld [vmem:[%s8312_s2 + $0x18] sm:$0xff]   ;;  %v6196_v5 = vld [vmem:[%s8312_s2 + $0x20] sm:$0xff]   ;;  %v6197_v6 = vld [vmem:[%s8312_s2 + $0x28] sm:$0xff]   ;;  %vm2194_vm2 = vcmask 1041408   ;;  %vm2096_vm3 = vcmask 154624  }
   0xf   : > { %5610 = vmatpush3.bf16.msra.mxu0 %v6192_v0  ;;  %v6198_v7 = vld [vmem:[%s8312_s2 + $0x30] sm:$0xff]   ;;  %v6199_v8 = vld [vmem:[%s8312_s2 + $0x38] sm:$0xff]   ;;  %v6224_v11 = vld [vmem:[%s8314_s4] sm:$0xff]   ;;  %vm2655_vm4 = vcmask 130048   ;;  %vm4795_vm6 = vcmask 31744  }
  0x10   : > { %s8391_s22 = smov (!%p503_p3, %s4933_s22), 255  ;;  %5611 = vmatprep.subr.bf16.mxu0 %v6193_v1  ;;  %6111 = vmatprep.subr.bf16.mxu1 %v6224_v11  ;;  %v6233_v14 = vld [vmem:[%s8314_s4 + $0x8] sm:$0xff]   ;;  %v6234_v15 = vld [vmem:[%s8314_s4 + $0x10] sm:$0xff]   ;;  %v6235_v16 = vld [vmem:[%s8314_s4 + $0x18] sm:$0xff]  }
  0x11   : > { %s4934_s27 = sshll.u32 %s8391_s22, 2  ;;  %6115 = vmatpush3.bf16.msra.mxu1 %v6224_v11  ;;  %v6854_v44 = vld [vmem:[%s8316_s6] sm:$0xff]   ;;  %s4938_s19 = sshll.u32 %s8391_s22, 3 }
  0x12   : > { %s6783_s30 = scalar_lea.vmem %s8310_s0, %s4934_s27  ;;  %6112 = vmatprep.subr.bf16.mxu1 %v6233_v14  ;;  %s6824_s28 = scalar_lea.vmem %s8311_s1, %s4934_s27  ;;  %v6860_v45 = vld [vmem:[%s8313_s3] ss:$0 sm:$0xff] }
  0x13   : > { %5612 = vmatpush3.bf16.msra.mxu0 %v6193_v1  ;;  %v6200_v4 = vld [vmem:[%s6783_s30] sm:$0xff]   ;;  %v6201_v9 = vld [vmem:[%s6783_s30 + $0x8] sm:$0xff]   ;;  %v6202_v10 = vld [vmem:[%s6783_s30 + $0x10] sm:$0xff]   ;;  %s7917_s20 = scalar_lea.vmem %s8325_s15, %s4938_s19 }
  0x14   : > { %5613 = vmatprep.subr.bf16.mxu0 %v6194_v2  ;;  %5625 = vmatprep.mubr.bf16.mxu0 %v6200_v4  ;;  %v6203_v12 = vld [vmem:[%s6783_s30 + $0x18] sm:$0xff]   ;;  %v6204_v13 = vld [vmem:[%s6783_s30 + $0x20] sm:$0xff]   ;;  %v6205_v17 = vld [vmem:[%s6783_s30 + $0x28] sm:$0xff]  }
  0x15   : > { %v6206_v18 = vld [vmem:[%s6783_s30 + $0x30] sm:$0xff]   ;;  %6116 = vmatpush3.bf16.msra.mxu1 %v6233_v14  ;;  %v6207_v19 = vld [vmem:[%s6783_s30 + $0x38] sm:$0xff]   ;;  %v6208_v20 = vld [vmem:[%s6783_s30 + $0x40] sm:$0xff]  }
  0x16   : > { %6113 = vmatprep.subr.bf16.mxu1 %v6234_v15  ;;  %v6209_v21 = vld [vmem:[%s6783_s30 + $0x48] sm:$0xff]   ;;  %v6210_v22 = vld [vmem:[%s6783_s30 + $0x50] sm:$0xff]   ;;  %v6211_v23 = vld [vmem:[%s6783_s30 + $0x58] sm:$0xff]  }
  0x17   : > { %5614 = vmatpush3.bf16.msra.mxu0 %v6194_v2  ;;  %v6212_v24 = vld [vmem:[%s6783_s30 + $0x60] sm:$0xff]   ;;  %v6213_v25 = vld [vmem:[%s6783_s30 + $0x68] sm:$0xff]   ;;  %v6214_v26 = vld [vmem:[%s6783_s30 + $0x70] sm:$0xff]  }
  0x18   : > { %5615 = vmatprep.subr.bf16.mxu0 %v6195_v3  ;;  %v6215_v27 = vld [vmem:[%s6783_s30 + $0x78] sm:$0xff]   ;;  %v6216_v28 = vld [vmem:[%s6783_s30 + $0x80] sm:$0xff]   ;;  %v6217_v29 = vld [vmem:[%s6783_s30 + $0x88] sm:$0xff]  }
  0x19   : > { %6117 = vmatpush3.bf16.msra.mxu1 %v6234_v15  ;;  %v6218_v30 = vld [vmem:[%s6783_s30 + $0x90] sm:$0xff]   ;;  %v6219_v31 = vld [vmem:[%s6783_s30 + $0x98] sm:$0xff]   ;;  %v6220_v32 = vld [vmem:[%s6783_s30 + $0xa0] sm:$0xff]  }
  0x1a   : > { %6114 = vmatprep.subr.bf16.mxu1 %v6235_v16  ;;  %v6221_v33 = vld [vmem:[%s6783_s30 + $0xa8] sm:$0xff]   ;;  %v6222_v34 = vld [vmem:[%s6783_s30 + $0xb0] sm:$0xff]   ;;  %v6223_v35 = vld [vmem:[%s6783_s30 + $0xb8] sm:$0xff]  }
  0x1b   : > { %5616 = vmatpush3.bf16.msra.mxu0 %v6195_v3  ;;  %v6225_v36 = vld [vmem:[%s6783_s30 + $0xc0] sm:$0xff]   ;;  %v6226_v37 = vld [vmem:[%s6783_s30 + $0xc8] sm:$0xff]   ;;  %v6227_v38 = vld [vmem:[%s6783_s30 + $0xd0] sm:$0xff]  }
  0x1c   : > { %5617 = vmatprep.subr.bf16.mxu0 %v6196_v5  ;;  %v6228_v39 = vld [vmem:[%s6783_s30 + $0xd8] sm:$0xff]   ;;  %v6229_v40 = vld [vmem:[%s6783_s30 + $0xe0] sm:$0xff]   ;;  %v6230_v41 = vld [vmem:[%s6783_s30 + $0xe8] sm:$0xff]  }
  0x1d   : > { %6118 = vmatpush3.bf16.msra.mxu1 %v6235_v16  ;;  %v6231_v42 = vld [vmem:[%s6783_s30 + $0xf0] sm:$0xff]   ;;  %v6232_v43 = vld [vmem:[%s6783_s30 + $0xf8] sm:$0xff]  }
  0x1e   : > { %5761 = vmatprep.subr.bf16.mxu1 %v6854_v44 }
  0x1f   : > { %5618 = vmatpush3.bf16.msra.mxu0 %v6196_v5 }
  0x20   : > { %5619 = vmatprep.subr.bf16.mxu0 %v6197_v6 }
  0x23   : > { %5620 = vmatpush3.bf16.msra.mxu0 %v6197_v6 }
  0x24   : > { %5621 = vmatprep.subr.bf16.mxu0 %v6198_v7 }
  0x27   : > { %5622 = vmatpush3.bf16.msra.mxu0 %v6198_v7 }
  0x28   : > { %5623 = vmatprep.subr.bf16.mxu0 %v6199_v8 }
  0x2b   : > { %5624 = vmatpush3.bf16.msra.mxu0 %v6199_v8 }
  0x2c   : > { %5689 = vmatprep.subr.bf16.mxu0 %v6224_v11 }
  0x2e   : > { %5626 = vmatmul.mubr.bf16.vlgmr.msra.gmra.mrb[0].mxu0 %v6201_v9 }
  0x2f   : > { %5629 = vmatprep.mubr.bf16.mxu0 %v6202_v10  ;;  %5690 = vmatpush3.bf16.msra.mxu0 %v6224_v11 }
  0x30   : > { %5691 = vmatprep.subr.bf16.mxu0 %v6233_v14 }
  0x33   : > { %5692 = vmatpush3.bf16.msra.mxu0 %v6233_v14 }
  0x34   : > { %5693 = vmatprep.subr.bf16.mxu0 %v6234_v15 }
  0x36   : > { %5630 = vmatmul.mubr.bf16.gmra.mrb[4].mxu0 %v6203_v12 }
  0x37   : > { %5633 = vmatprep.mubr.bf16.mxu0 %v6204_v13  ;;  %5694 = vmatpush3.bf16.msra.mxu0 %v6234_v15 }
  0x38   : > { %5695 = vmatprep.subr.bf16.mxu0 %v6235_v16 }
  0x3b   : > { %5696 = vmatpush3.bf16.msra.mxu0 %v6235_v16 }
  0x3e   : > { %5634 = vmatmul.mubr.bf16.gmra.mrb[8].mxu0 %v6205_v17 }
  0x3f   : > { %5637 = vmatprep.mubr.bf16.mxu0 %v6206_v18 }
  0x46   : > { %5638 = vmatmul.mubr.bf16.gmra.mrb[12].mxu0 %v6207_v19 }
  0x47   : > { %5641 = vmatprep.mubr.bf16.mxu0 %v6208_v20 }
  0x4e   : > { %5642 = vmatmul.mubr.bf16.gmra.mrb[16].mxu0 %v6209_v21 }
  0x4f   : > { %5645 = vmatprep.mubr.bf16.mxu0 %v6210_v22 }
  0x56   : > { %5646 = vmatmul.mubr.bf16.gmra.mrb[20].mxu0 %v6211_v23 }
  0x57   : > { %5649 = vmatprep.mubr.bf16.mxu0 %v6212_v24 }
  0x5e   : > { %5650 = vmatmul.mubr.bf16.gmra.mrb[24].mxu0 %v6213_v25 }
  0x5f   : > { %5653 = vmatprep.mubr.bf16.mxu0 %v6214_v26 }
  0x66   : > { %5654 = vmatmul.mubr.bf16.gmra.mrb[28].mxu0 %v6215_v27 }
  0x67   : > { %5657 = vmatprep.mubr.bf16.mxu0 %v6216_v28 }
  0x6e   : > { %5658 = vmatmul.mubr.bf16.gmra.mrb[32].mxu0 %v6217_v29 }
  0x6f   : > { %5661 = vmatprep.mubr.bf16.mxu0 %v6218_v30 }
  0x76   : > { %5662 = vmatmul.mubr.bf16.gmra.mrb[36].mxu0 %v6219_v31 }
  0x77   : > { %5665 = vmatprep.mubr.bf16.mxu0 %v6220_v32 }
  0x7e   : > { %5666 = vmatmul.mubr.bf16.gmra.mrb[40].mxu0 %v6221_v33 }
  0x7f   : > { %5669 = vmatprep.mubr.bf16.mxu0 %v6222_v34 }
  0x86   : > { %5670 = vmatmul.mubr.bf16.gmra.mrb[44].mxu0 %v6223_v35 }
  0x87   : > { %5673 = vmatprep.mubr.bf16.mxu0 %v6225_v36 }
  0x8e   : > { %5674 = vmatmul.mubr.bf16.gmra.mrb[48].mxu0 %v6226_v37 }
  0x8f   : > { %5677 = vmatprep.mubr.bf16.mxu0 %v6227_v38 }
  0x96   : > { %5678 = vmatmul.mubr.bf16.gmra.mrb[52].mxu0 %v6228_v39 }
  0x97   : > { %5681 = vmatprep.mubr.bf16.mxu0 %v6229_v40 }
  0x9e   : > { %5682 = vmatmul.mubr.bf16.gmra.mrb[56].mxu0 %v6230_v41 }
  0x9f   : > { %5685 = vmatprep.mubr.bf16.mxu0 %v6231_v42 }
  0xa6   : > { %5686 = vmatmul.mubr.bf16.gmra.mrb[60].mxu0 %v6232_v43 }
 0x101   : > { %v5627_v46 = vpop.f32.mrb[0].mxu0 }
 0x102   : > { %v891_v47 = vadd.f32 %v5627_v46, %v6860_v45  ;;  %v882_v48 = vpop.f32.mrb[1].mxu0 }
 0x103   : > { %v883_v49 = vadd.f32 %v6860_v45, %v882_v48  ;;  %v5628_v50 = vpop.f32.mrb[2].mxu0 }
 0x104   : > { %v894_v51 = vadd.f32 %v5628_v50, %v6860_v45  ;;  %v885_v52 = vpop.f32.mrb[3].mxu0  ;;  %v1139_v54 = vmax.f32 %v891_v47, 0.0 }
 0x105   : > { %v886_v53 = vadd.f32 %v6860_v45, %v885_v52  ;;  %v1137_v56 = vmax.f32 %v883_v49, 0.0 }
 0x106   : > { %v1140_v55 = vmax.f32 %v894_v51, 0.0 }
 0x107   : > { %v1138_v57 = vmax.f32 %v886_v53, 0.0 }
 0x108   : > { %v6866_v58 = vpack.c.bf16 %v1140_v55, %v1139_v54 }
 0x109   : > { %v6868_v59 = vpack.c.bf16 %v1138_v57, %v1137_v56  ;;  %v5631_v60 = vpop.f32.mrb[4].mxu0 }
 0x10a   : > { %v907_v61 = vadd.f32 %v5631_v60, %v6860_v45  ;;  %v898_v62 = vpop.f32.mrb[5].mxu0 }
 0x10b   : > { %v899_v63 = vadd.f32 %v6860_v45, %v898_v62  ;;  %v5632_v0 = vpop.f32.mrb[6].mxu0  ;;  %5697 = vmatprep.mubr.msk.bf16.mxu0 %vm1272_vm0, %v6868_v59 }
 0x10c   : > { %v910_v1 = vadd.f32 %v5632_v0, %v6860_v45  ;;  %v901_v2 = vpop.f32.mrb[7].mxu0  ;;  %5698 = vmatmul.mubr.msk.bf16.vlgmr.msra.gmra.mrb[64].mxu0 %vm1272_vm0, %v6866_v58  ;;  %v1143_v4 = vmax.f32 %v907_v61, 0.0  ;;  %v6240_v0 = vld [vmem:[%s8319_s9] sm:$0xff]  }
 0x10d   : > { %v902_v3 = vadd.f32 %v6860_v45, %v901_v2  ;;  %v1141_v6 = vmax.f32 %v899_v63, 0.0  ;;  %5833 = vmatprep.subr.bf16.mxu0 %v6240_v0 }
 0x10e   : > { %v1144_v5 = vmax.f32 %v910_v1, 0.0  ;;  %5834 = vmatpush3.bf16.msra.mxu0 %v6240_v0 }
 0x10f   : > { %v1142_v7 = vmax.f32 %v902_v3, 0.0 }
 0x110   : > { %v6878_v8 = vpack.c.bf16 %v1144_v5, %v1143_v4 }
 0x111   : > { %v6880_v9 = vpack.c.bf16 %v1142_v7, %v1141_v6  ;;  %v5635_v10 = vpop.f32.mrb[8].mxu0 }
 0x112   : > { %v923_v11 = vadd.f32 %v5635_v10, %v6860_v45  ;;  %v914_v12 = vpop.f32.mrb[9].mxu0 }
 0x113   : > { %v915_v13 = vadd.f32 %v6860_v45, %v914_v12  ;;  %v5636_v14 = vpop.f32.mrb[10].mxu0  ;;  %5701 = vmatprep.mubr.msk.bf16.mxu0 %vm1272_vm0, %v6880_v9 }
 0x114   : > { %v926_v15 = vadd.f32 %v5636_v14, %v6860_v45  ;;  %v917_v16 = vpop.f32.mrb[11].mxu0  ;;  %5702 = vmatmul.mubr.msk.bf16.gmra.mrb[68].mxu0 %vm1272_vm0, %v6878_v8  ;;  %v1147_v18 = vmax.f32 %v923_v11, 0.0 }
 0x115   : > { %v918_v17 = vadd.f32 %v6860_v45, %v917_v16  ;;  %v1145_v20 = vmax.f32 %v915_v13, 0.0 }
 0x116   : > { %v1148_v19 = vmax.f32 %v926_v15, 0.0 }
 0x117   : > { %v1146_v21 = vmax.f32 %v918_v17, 0.0 }
 0x118   : > { %v6890_v22 = vpack.c.bf16 %v1148_v19, %v1147_v18 }
 0x119   : > { %v6892_v23 = vpack.c.bf16 %v1146_v21, %v1145_v20  ;;  %v5639_v24 = vpop.f32.mrb[12].mxu0 }
 0x11a   : > { %v939_v25 = vadd.f32 %v5639_v24, %v6860_v45  ;;  %v930_v26 = vpop.f32.mrb[13].mxu0 }
 0x11b   : > { %v931_v27 = vadd.f32 %v6860_v45, %v930_v26  ;;  %v5640_v28 = vpop.f32.mrb[14].mxu0  ;;  %5705 = vmatprep.mubr.msk.bf16.mxu0 %vm1272_vm0, %v6892_v23 }
 0x11c   : > { %v942_v29 = vadd.f32 %v5640_v28, %v6860_v45  ;;  %v933_v30 = vpop.f32.mrb[15].mxu0  ;;  %5706 = vmatmul.mubr.msk.bf16.gmra.mrb[72].mxu0 %vm1272_vm0, %v6890_v22  ;;  %v1151_v32 = vmax.f32 %v939_v25, 0.0 }
 0x11d   : > { %v934_v31 = vadd.f32 %v6860_v45, %v933_v30  ;;  %v1149_v34 = vmax.f32 %v931_v27, 0.0 }
 0x11e   : > { %v1152_v33 = vmax.f32 %v942_v29, 0.0 }
 0x11f   : > { %v1150_v35 = vmax.f32 %v934_v31, 0.0 }
 0x120   : > { %v6902_v36 = vpack.c.bf16 %v1152_v33, %v1151_v32 }
 0x121   : > { %v6904_v37 = vpack.c.bf16 %v1150_v35, %v1149_v34  ;;  %v5643_v38 = vpop.f32.mrb[16].mxu0 }
 0x122   : > { %v955_v39 = vadd.f32 %v5643_v38, %v6860_v45  ;;  %v946_v40 = vpop.f32.mrb[17].mxu0 }
 0x123   : > { %v947_v41 = vadd.f32 %v6860_v45, %v946_v40  ;;  %v5644_v42 = vpop.f32.mrb[18].mxu0  ;;  %5709 = vmatprep.mubr.msk.bf16.mxu0 %vm1272_vm0, %v6904_v37 }
 0x124   : > { %v958_v43 = vadd.f32 %v5644_v42, %v6860_v45  ;;  %v949_v46 = vpop.f32.mrb[19].mxu0  ;;  %5710 = vmatmul.mubr.msk.bf16.gmra.mrb[76].mxu0 %vm1272_vm0, %v6902_v36  ;;  %v1155_v48 = vmax.f32 %v955_v39, 0.0 }
 0x125   : > { %v950_v47 = vadd.f32 %v6860_v45, %v949_v46  ;;  %v1153_v50 = vmax.f32 %v947_v41, 0.0  ;;  %v6237_v46 = vld [vmem:[%s8316_s6 + $0x8] sm:$0xff]  }
 0x126   : > { %v1156_v49 = vmax.f32 %v958_v43, 0.0 }
 0x127   : > { %v1154_v51 = vmax.f32 %v950_v47, 0.0 }
 0x128   : > { %v6914_v52 = vpack.c.bf16 %v1156_v49, %v1155_v48 }
 0x129   : > { %v6916_v53 = vpack.c.bf16 %v1154_v51, %v1153_v50  ;;  %v5647_v54 = vpop.f32.mrb[20].mxu0 }
 0x12a   : > { %v971_v55 = vadd.f32 %v5647_v54, %v6860_v45  ;;  %v962_v56 = vpop.f32.mrb[21].mxu0  ;;  %v6241_v54 = vld [vmem:[%s8319_s9 + $0x8] ss:$0 sps:$4 sm:$0x33]  }
 0x12b   : > { %v963_v57 = vadd.f32 %v6860_v45, %v962_v56  ;;  %v5648_v60 = vpop.f32.mrb[22].mxu0  ;;  %5713 = vmatprep.mubr.msk.bf16.mxu0 %vm1272_vm0, %v6916_v53 }
 0x12c   : > { %v974_v61 = vadd.f32 %v5648_v60, %v6860_v45  ;;  %v965_v62 = vpop.f32.mrb[23].mxu0  ;;  %5714 = vmatmul.mubr.msk.bf16.gmra.mrb[80].mxu0 %vm1272_vm0, %v6914_v52  ;;  %v1159_v1 = vmax.f32 %v971_v55, 0.0 }
 0x12d   : > { %v966_v63 = vadd.f32 %v6860_v45, %v965_v62  ;;  %v1157_v3 = vmax.f32 %v963_v57, 0.0  ;;  %v6238_v57 = vld [vmem:[%s8316_s6 + $0x10] sm:$0xff]   ;;  %v6677_v62 = vmov 65535  }
 0x12e   : > { %v1160_v2 = vmax.f32 %v974_v61, 0.0 }
 0x12f   : > { %v1158_v4 = vmax.f32 %v966_v63, 0.0  ;;  %v2195_v63 = vsel %vm2193_vm1, 4294967295, %v6677_v62 }
 0x130   : > { %v6929_v5 = vpack.c.bf16 %v1160_v2, %v1159_v1 }
 0x131   : > { %v6931_v6 = vpack.c.bf16 %v1158_v4, %v1157_v3  ;;  %v5651_v7 = vpop.f32.mrb[24].mxu0 }
 0x132   : > { %v987_v10 = vadd.f32 %v5651_v7, %v6860_v45  ;;  %v978_v11 = vpop.f32.mrb[25].mxu0 }
 0x133   : > { %v979_v12 = vadd.f32 %v6860_v45, %v978_v11  ;;  %v5652_v13 = vpop.f32.mrb[26].mxu0  ;;  %5717 = vmatprep.mubr.msk.bf16.mxu0 %vm1272_vm0, %v6931_v6 }
 0x134   : > { %v990_v14 = vadd.f32 %v5652_v13, %v6860_v45  ;;  %v981_v15 = vpop.f32.mrb[27].mxu0  ;;  %5718 = vmatmul.mubr.msk.bf16.gmra.mrb[84].mxu0 %vm1272_vm0, %v6929_v5  ;;  %v1163_v17 = vmax.f32 %v987_v10, 0.0  ;;  %v6239_v10 = vld [vmem:[%s8316_s6 + $0x18] sm:$0xff]  }
 0x135   : > { %v982_v16 = vadd.f32 %v6860_v45, %v981_v15  ;;  %v1161_v19 = vmax.f32 %v979_v12, 0.0 }
 0x136   : > { %v1164_v18 = vmax.f32 %v990_v14, 0.0 }
 0x137   : > { %v1162_v20 = vmax.f32 %v982_v16, 0.0 }
 0x138   : > { %v6941_v21 = vpack.c.bf16 %v1164_v18, %v1163_v17 }
 0x139   : > { %v6943_v24 = vpack.c.bf16 %v1162_v20, %v1161_v19  ;;  %v5655_v25 = vpop.f32.mrb[28].mxu0 }
 0x13a   : > { %v1003_v26 = vadd.f32 %v5655_v25, %v6860_v45  ;;  %v994_v27 = vpop.f32.mrb[29].mxu0 }
 0x13b   : > { %v995_v28 = vadd.f32 %v6860_v45, %v994_v27  ;;  %v5656_v29 = vpop.f32.mrb[30].mxu0  ;;  %5721 = vmatprep.mubr.msk.bf16.mxu0 %vm1272_vm0, %v6943_v24 }
 0x13c   : > { %v1006_v30 = vadd.f32 %v5656_v29, %v6860_v45  ;;  %v997_v31 = vpop.f32.mrb[31].mxu0  ;;  %5722 = vmatmul.mubr.msk.bf16.gmra.mrb[88].mxu0 %vm1272_vm0, %v6941_v21  ;;  %v1167_v33 = vmax.f32 %v1003_v26, 0.0 }
 0x13d   : > { %v998_v32 = vadd.f32 %v6860_v45, %v997_v31  ;;  %v1165_v35 = vmax.f32 %v995_v28, 0.0 }
 0x13e   : > { %v1168_v34 = vmax.f32 %v1006_v30, 0.0 }
 0x13f   : > { %v1166_v38 = vmax.f32 %v998_v32, 0.0 }
 0x140   : > { %v6953_v39 = vpack.c.bf16 %v1168_v34, %v1167_v33 }
 0x141   : > { %v5659_v40 = vpop.f32.mrb[32].mxu0  ;;  %v6955_v41 = vpack.c.bf16 %v1166_v38, %v1165_v35 }
 0x142   : > { %v1019_v42 = vadd.f32 %v5659_v40, %v6860_v45  ;;  %v1010_v43 = vpop.f32.mrb[33].mxu0 }
 0x143   : > { %v1011_v47 = vadd.f32 %v6860_v45, %v1010_v43  ;;  %v5660_v48 = vpop.f32.mrb[34].mxu0  ;;  %5725 = vmatprep.mubr.msk.bf16.mxu1 %vm1272_vm0, %v6955_v41 }
 0x144   : > { %v1022_v49 = vadd.f32 %v5660_v48, %v6860_v45  ;;  %v1013_v50 = vpop.f32.mrb[35].mxu0  ;;  %5726 = vmatmul.mubr.msk.bf16.vlgmr.msra.gmra.mrb[0].mxu1 %vm1272_vm0, %v6953_v39  ;;  %v1171_v55 = vmax.f32 %v1019_v42, 0.0 }
 0x145   : > { %v1014_v51 = vadd.f32 %v6860_v45, %v1013_v50  ;;  %5762 = vmatpush3.bf16.msra.mxu1 %v6854_v44  ;;  %v1169_v60 = vmax.f32 %v1011_v47, 0.0  ;;  %v2196_v44 = vsel %vm2194_vm2, %v2195_v63, 0 }
 0x146   : > { %v1172_v56 = vmax.f32 %v1022_v49, 0.0  ;;  %5763 = vmatprep.subr.bf16.mxu1 %v6237_v46  ;;  %v2198_v3 = vand.u32 %v6241_v54, %v2196_v44 }
 0x147   : > { %v1170_v61 = vmax.f32 %v1014_v51, 0.0 }
 0x148   : > { %v6975_v0 = vpack.c.bf16 %v1172_v56, %v1171_v55  ;;  %5835 = vmatprep.subr.bf16.mxu0 %v2198_v3 }
 0x149   : > { %v6977_v1 = vpack.c.bf16 %v1170_v61, %v1169_v60  ;;  %v5663_v2 = vpop.f32.mrb[36].mxu0  ;;  %5764 = vmatpush3.bf16.msra.mxu1 %v6237_v46  ;;  %5836 = vmatpush3.bf16.msra.mxu0 %v2198_v3 }
 0x14a   : > { %v1035_v4 = vadd.f32 %v5663_v2, %v6860_v45  ;;  %v1026_v7 = vpop.f32.mrb[37].mxu0  ;;  %5765 = vmatprep.subr.bf16.mxu1 %v6238_v57 }
 0x14b   : > { %v1027_v11 = vadd.f32 %v6860_v45, %v1026_v7  ;;  %v5664_v12 = vpop.f32.mrb[38].mxu0  ;;  %5729 = vmatprep.mubr.msk.bf16.mxu1 %vm1272_vm0, %v6977_v1 }
 0x14c   : > { %v1038_v13 = vadd.f32 %v5664_v12, %v6860_v45  ;;  %v1029_v14 = vpop.f32.mrb[39].mxu0  ;;  %5730 = vmatmul.mubr.msk.bf16.gmra.mrb[4].mxu1 %vm1272_vm0, %v6975_v0  ;;  %v1175_v16 = vmax.f32 %v1035_v4, 0.0 }
 0x14d   : > { %v1030_v15 = vadd.f32 %v6860_v45, %v1029_v14  ;;  %5766 = vmatpush3.bf16.msra.mxu1 %v6238_v57  ;;  %v1173_v18 = vmax.f32 %v1027_v11, 0.0 }
 0x14e   : > { %v1176_v17 = vmax.f32 %v1038_v13, 0.0  ;;  %5767 = vmatprep.subr.bf16.mxu1 %v6239_v10 }
 0x14f   : > { %v1174_v19 = vmax.f32 %v1030_v15, 0.0 }
 0x150   : > { %v6990_v20 = vpack.c.bf16 %v1176_v17, %v1175_v16 }
 0x151   : > { %v6992_v25 = vpack.c.bf16 %v1174_v19, %v1173_v18  ;;  %v5667_v26 = vpop.f32.mrb[40].mxu0  ;;  %5768 = vmatpush3.bf16.msra.mxu1 %v6239_v10  ;;  %v7031_v18 = vld [vmem:[%s8318_s8] sm:$0xff]  }
 0x152   : > { %v1051_v27 = vadd.f32 %v5667_v26, %v6860_v45  ;;  %v1042_v28 = vpop.f32.mrb[41].mxu0  ;;  %5901 = vmatprep.subr.bf16.mxu0 %v7031_v18 }
 0x153   : > { %v1043_v29 = vadd.f32 %v6860_v45, %v1042_v28  ;;  %v5668_v30 = vpop.f32.mrb[42].mxu0  ;;  %5733 = vmatprep.mubr.msk.bf16.mxu1 %vm1272_vm0, %v6992_v25 }
 0x154   : > { %v1054_v31 = vadd.f32 %v5668_v30, %v6860_v45  ;;  %v1045_v32 = vpop.f32.mrb[43].mxu0  ;;  %5734 = vmatmul.mubr.msk.bf16.gmra.mrb[8].mxu1 %vm1272_vm0, %v6990_v20  ;;  %v1179_v34 = vmax.f32 %v1051_v27, 0.0 }
 0x155   : > { %v1046_v33 = vadd.f32 %v6860_v45, %v1045_v32  ;;  %v1177_v38 = vmax.f32 %v1043_v29, 0.0 }
 0x156   : > { %v1180_v35 = vmax.f32 %v1054_v31, 0.0 }
 0x157   : > { %v1178_v40 = vmax.f32 %v1046_v33, 0.0 }
 0x158   : > { %v7002_v42 = vpack.c.bf16 %v1180_v35, %v1179_v34 }
 0x159   : > { %v7004_v43 = vpack.c.bf16 %v1178_v40, %v1177_v38  ;;  %v5671_v46 = vpop.f32.mrb[44].mxu0 }
 0x15a   : > { %v1067_v47 = vadd.f32 %v5671_v46, %v6860_v45  ;;  %v1058_v48 = vpop.f32.mrb[45].mxu0 }
 0x15b   : > { %v1059_v49 = vadd.f32 %v6860_v45, %v1058_v48  ;;  %v5672_v50 = vpop.f32.mrb[46].mxu0  ;;  %5737 = vmatprep.mubr.msk.bf16.mxu1 %vm1272_vm0, %v7004_v43 }
 0x15c   : > { %v1070_v51 = vadd.f32 %v5672_v50, %v6860_v45  ;;  %v1061_v54 = vpop.f32.mrb[47].mxu0  ;;  %5738 = vmatmul.mubr.msk.bf16.gmra.mrb[12].mxu1 %vm1272_vm0, %v7002_v42  ;;  %v1183_v56 = vmax.f32 %v1067_v47, 0.0 }
 0x15d   : > { %v1062_v55 = vadd.f32 %v6860_v45, %v1061_v54  ;;  %v1181_v60 = vmax.f32 %v1059_v49, 0.0 }
 0x15e   : > { %v1184_v57 = vmax.f32 %v1070_v51, 0.0 }
 0x15f   : > { %v1182_v61 = vmax.f32 %v1062_v55, 0.0 }
 0x160   : > { %v7014_v62 = vpack.c.bf16 %v1184_v57, %v1183_v56 }
 0x161   : > { %v7016_v63 = vpack.c.bf16 %v1182_v61, %v1181_v60  ;;  %v5675_v44 = vpop.f32.mrb[48].mxu0 }
 0x162   : > { %v1083_v2 = vadd.f32 %v5675_v44, %v6860_v45  ;;  %v1074_v3 = vpop.f32.mrb[49].mxu0 }
 0x163   : > { %v1075_v4 = vadd.f32 %v6860_v45, %v1074_v3  ;;  %v5676_v7 = vpop.f32.mrb[50].mxu0  ;;  %5741 = vmatprep.mubr.msk.bf16.mxu1 %vm1272_vm0, %v7016_v63 }
 0x164   : > { %v1086_v10 = vadd.f32 %v5676_v7, %v6860_v45  ;;  %v1077_v11 = vpop.f32.mrb[51].mxu0  ;;  %5742 = vmatmul.mubr.msk.bf16.gmra.mrb[16].mxu1 %vm1272_vm0, %v7014_v62  ;;  %v1187_v13 = vmax.f32 %v1083_v2, 0.0 }
 0x165   : > { %v1078_v12 = vadd.f32 %v6860_v45, %v1077_v11  ;;  %v1185_v15 = vmax.f32 %v1075_v4, 0.0 }
 0x166   : > { %v1188_v14 = vmax.f32 %v1086_v10, 0.0 }
 0x167   : > { %v1186_v16 = vmax.f32 %v1078_v12, 0.0 }
 0x168   : > { %v7026_v17 = vpack.c.bf16 %v1188_v14, %v1187_v13 }
 0x169   : > { %v7033_v19 = vpack.c.bf16 %v1186_v16, %v1185_v15  ;;  %v5679_v26 = vpop.f32.mrb[52].mxu0 }
 0x16a   : > { %v1099_v27 = vadd.f32 %v5679_v26, %v6860_v45  ;;  %v1090_v28 = vpop.f32.mrb[53].mxu0 }
 0x16b   : > { %v1091_v29 = vadd.f32 %v6860_v45, %v1090_v28  ;;  %v5680_v30 = vpop.f32.mrb[54].mxu0  ;;  %5745 = vmatprep.mubr.msk.bf16.mxu1 %vm1272_vm0, %v7033_v19 }
 0x16c   : > { %v1102_v31 = vadd.f32 %v5680_v30, %v6860_v45  ;;  %v1093_v32 = vpop.f32.mrb[55].mxu0  ;;  %5746 = vmatmul.mubr.msk.bf16.gmra.mrb[20].mxu1 %vm1272_vm0, %v7026_v17  ;;  %v1191_v34 = vmax.f32 %v1099_v27, 0.0 }
 0x16d   : > { %v1094_v33 = vadd.f32 %v6860_v45, %v1093_v32  ;;  %v1189_v38 = vmax.f32 %v1091_v29, 0.0 }
 0x16e   : > { %v1192_v35 = vmax.f32 %v1102_v31, 0.0 }
 0x16f   : > { %v1190_v40 = vmax.f32 %v1094_v33, 0.0 }
 0x170   : > { %v7044_v46 = vpack.c.bf16 %v1192_v35, %v1191_v34 }
 0x171   : > { %v7046_v47 = vpack.c.bf16 %v1190_v40, %v1189_v38  ;;  %v5683_v48 = vpop.f32.mrb[56].mxu0 }
 0x172   : > { %v1115_v49 = vadd.f32 %v5683_v48, %v6860_v45  ;;  %v1106_v50 = vpop.f32.mrb[57].mxu0 }
 0x173   : > { %v1107_v51 = vadd.f32 %v6860_v45, %v1106_v50  ;;  %v5684_v54 = vpop.f32.mrb[58].mxu0  ;;  %5749 = vmatprep.mubr.msk.bf16.mxu1 %vm1272_vm0, %v7046_v47 }
 0x174   : > { %v1118_v55 = vadd.f32 %v5684_v54, %v6860_v45  ;;  %v1109_v56 = vpop.f32.mrb[59].mxu0  ;;  %5750 = vmatmul.mubr.msk.bf16.gmra.mrb[24].mxu1 %vm1272_vm0, %v7044_v46  ;;  %v1195_v60 = vmax.f32 %v1115_v49, 0.0 }
 0x175   : > { %v1110_v57 = vadd.f32 %v6860_v45, %v1109_v56  ;;  %v1193_v44 = vmax.f32 %v1107_v51, 0.0 }
 0x176   : > { %v1196_v61 = vmax.f32 %v1118_v55, 0.0 }
 0x177   : > { %v1194_v2 = vmax.f32 %v1110_v57, 0.0 }
 0x178   : > { %v7056_v3 = vpack.c.bf16 %v1196_v61, %v1195_v60 }
 0x179   : > { %v7058_v4 = vpack.c.bf16 %v1194_v2, %v1193_v44  ;;  %v5687_v7 = vpop.f32.mrb[60].mxu0 }
 0x17a   : > { %v1131_v10 = vadd.f32 %v5687_v7, %v6860_v45  ;;  %v1122_v11 = vpop.f32.mrb[61].mxu0 }
 0x17b   : > { %v1123_v12 = vadd.f32 %v6860_v45, %v1122_v11  ;;  %v5688_v13 = vpop.f32.mrb[62].mxu0  ;;  %5753 = vmatprep.mubr.msk.bf16.mxu1 %vm1272_vm0, %v7058_v4 }
 0x17c   : > { %v1134_v14 = vadd.f32 %v5688_v13, %v6860_v45  ;;  %v1125_v15 = vpop.f32.mrb[63].mxu0  ;;  %5754 = vmatmul.mubr.msk.bf16.gmra.mrb[28].mxu1 %vm1272_vm0, %v7056_v3  ;;  %v1199_v26 = vmax.f32 %v1131_v10, 0.0 }
 0x17d   : > { %v1126_v16 = vadd.f32 %v6860_v45, %v1125_v15  ;;  %v1197_v28 = vmax.f32 %v1123_v12, 0.0 }
 0x17e   : > { %v1200_v27 = vmax.f32 %v1134_v14, 0.0 }
 0x17f   : > { %v1198_v29 = vmax.f32 %v1126_v16, 0.0 }
 0x180   : > { %v7068_v30 = vpack.c.bf16 %v1200_v27, %v1199_v26 }
 0x181   : > { %v7070_v31 = vpack.c.bf16 %v1198_v29, %v1197_v28 }
 0x183   : > { %5757 = vmatprep.mubr.msk.bf16.mxu1 %vm1272_vm0, %v7070_v31 }
 0x184   : > { %5758 = vmatmul.mubr.msk.bf16.gmra.mrb[32].mxu1 %vm1272_vm0, %v7068_v30 }
 0x185   : > { %5769 = vmatprep.mubr.msk.bf16.mxu1 %vm1272_vm0, %v6868_v59 }
 0x18c   : > { %5770 = vmatmul.mubr.msk.bf16.vlgmr.msra.gmra.mrb[36].mxu1 %vm1272_vm0, %v6866_v58  ;;  %v7125_v58 = vld [vmem:[%s8315_s5] ss:$0 sm:$0xff] }
 0x18d   : > { %5773 = vmatprep.mubr.msk.bf16.mxu1 %vm1272_vm0, %v6880_v9 }
 0x194   : > { %5774 = vmatmul.mubr.msk.bf16.gmra.mrb[40].mxu1 %vm1272_vm0, %v6878_v8 }
 0x195   : > { %5777 = vmatprep.mubr.msk.bf16.mxu1 %vm1272_vm0, %v6892_v23 }
 0x19c   : > { %5778 = vmatmul.mubr.msk.bf16.gmra.mrb[44].mxu1 %vm1272_vm0, %v6890_v22 }
 0x19d   : > { %5781 = vmatprep.mubr.msk.bf16.mxu1 %vm1272_vm0, %v6904_v37 }
 0x1a4   : > { %5782 = vmatmul.mubr.msk.bf16.gmra.mrb[48].mxu1 %vm1272_vm0, %v6902_v36 }
 0x1a5   : > { %5785 = vmatprep.mubr.msk.bf16.mxu1 %vm1272_vm0, %v6916_v53 }
 0x1ac   : > { %5786 = vmatmul.mubr.msk.bf16.gmra.mrb[52].mxu1 %vm1272_vm0, %v6914_v52 }
 0x1ad   : > { %5789 = vmatprep.mubr.msk.bf16.mxu1 %vm1272_vm0, %v6931_v6 }
 0x1b4   : > { %5790 = vmatmul.mubr.msk.bf16.gmra.mrb[56].mxu1 %vm1272_vm0, %v6929_v5 }
 0x1b5   : > { %5793 = vmatprep.mubr.msk.bf16.mxu1 %vm1272_vm0, %v6943_v24 }
 0x1bc   : > { %5794 = vmatmul.mubr.msk.bf16.gmra.mrb[60].mxu1 %vm1272_vm0, %v6941_v21 }
 0x1bd   : > { %5797 = vmatprep.mubr.msk.bf16.mxu1 %vm1272_vm0, %v6955_v41 }
 0x1c4   : > { %5798 = vmatmul.mubr.msk.bf16.gmra.mrb[64].mxu1 %vm1272_vm0, %v6953_v39 }
 0x1c5   : > { %5801 = vmatprep.mubr.msk.bf16.mxu1 %vm1272_vm0, %v6977_v1 }
 0x1cc   : > { %5802 = vmatmul.mubr.msk.bf16.gmra.mrb[68].mxu1 %vm1272_vm0, %v6975_v0 }
 0x1cd   : > { %5805 = vmatprep.mubr.msk.bf16.mxu1 %vm1272_vm0, %v6992_v25 }
 0x1d4   : > { %5806 = vmatmul.mubr.msk.bf16.gmra.mrb[72].mxu1 %vm1272_vm0, %v6990_v20 }
 0x1d5   : > { %5809 = vmatprep.mubr.msk.bf16.mxu1 %vm1272_vm0, %v7004_v43 }
 0x1dc   : > { %5810 = vmatmul.mubr.msk.bf16.gmra.mrb[76].mxu1 %vm1272_vm0, %v7002_v42 }
 0x1dd   : > { %5813 = vmatprep.mubr.msk.bf16.mxu1 %vm1272_vm0, %v7016_v63 }
 0x1df   : > { %v5699_v45 = vpop.f32.mrb[64].mxu0 }
 0x1e0   : > { %v1403_v59 = vpop.f32.mrb[65].mxu0  ;;  %v1412_v9 = vadd.f32 %v5699_v45, %v7125_v58 }
 0x1e1   : > { %v5700_v8 = vpop.f32.mrb[66].mxu0  ;;  %v1404_v36 = vadd.f32 %v7125_v58, %v1403_v59 }
 0x1e2   : > { %v1415_v22 = vadd.f32 %v5700_v8, %v7125_v58  ;;  %v1406_v23 = vpop.f32.mrb[67].mxu0 }
 0x1e3   : > { %v1407_v37 = vadd.f32 %v7125_v58, %v1406_v23 }
 0x1e4   : > { %v2053_v52 = vpack.c.bf16 %v1415_v22, %v1412_v9  ;;  %5814 = vmatmul.mubr.msk.bf16.gmra.mrb[80].mxu1 %vm1272_vm0, %v7014_v62 }
 0x1e5   : > { %v2052_v53 = vpack.c.bf16 %v1407_v37, %v1404_v36  ;;  %5817 = vmatprep.mubr.msk.bf16.mxu1 %vm1272_vm0, %v7033_v19 }
 0x1e7   : > { %v5703_v5 = vpop.f32.mrb[68].mxu0  ;;  %5837 = vmatprep.mubr.msk.bf16.mxu0 %vm2096_vm3, %v2052_v53 }
 0x1e8   : > { %v1419_v6 = vpop.f32.mrb[69].mxu0  ;;  %5838 = vmatmul.mubr.msk.bf16.vlgmr.msra.gmra.mrb[92].mxu0 %vm2096_vm3, %v2053_v52  ;;  %v1428_v24 = vadd.f32 %v5703_v5, %v7125_v58 }
 0x1e9   : > { %5902 = vmatpush3.bf16.msra.mxu0 %v7031_v18  ;;  %v5704_v21 = vpop.f32.mrb[70].mxu0  ;;  %v1420_v0 = vadd.f32 %v7125_v58, %v1419_v6 }
 0x1ea   : > { %v1431_v39 = vadd.f32 %v5704_v21, %v7125_v58  ;;  %v1422_v41 = vpop.f32.mrb[71].mxu0 }
 0x1eb   : > { %v1423_v1 = vadd.f32 %v7125_v58, %v1422_v41 }
 0x1ec   : > { %v2055_v20 = vpack.c.bf16 %v1431_v39, %v1428_v24  ;;  %5818 = vmatmul.mubr.msk.bf16.gmra.mrb[84].mxu1 %vm1272_vm0, %v7026_v17 }
 0x1ed   : > { %v2054_v25 = vpack.c.bf16 %v1423_v1, %v1420_v0  ;;  %5821 = vmatprep.mubr.msk.bf16.mxu1 %vm1272_vm0, %v7046_v47 }
 0x1ef   : > { %v5707_v42 = vpop.f32.mrb[72].mxu0  ;;  %5841 = vmatprep.mubr.msk.bf16.mxu0 %vm2096_vm3, %v2054_v25 }
 0x1f0   : > { %v1435_v43 = vpop.f32.mrb[73].mxu0  ;;  %5842 = vmatmul.mubr.msk.bf16.gmra.mrb[96].mxu0 %vm2096_vm3, %v2055_v20  ;;  %v1444_v63 = vadd.f32 %v5707_v42, %v7125_v58 }
 0x1f1   : > { %v5708_v62 = vpop.f32.mrb[74].mxu0  ;;  %v1436_v32 = vadd.f32 %v7125_v58, %v1435_v43 }
 0x1f2   : > { %v1447_v18 = vadd.f32 %v5708_v62, %v7125_v58  ;;  %v1438_v19 = vpop.f32.mrb[75].mxu0 }
 0x1f3   : > { %v1439_v17 = vadd.f32 %v7125_v58, %v1438_v19 }
 0x1f4   : > { %v2057_v33 = vpack.c.bf16 %v1447_v18, %v1444_v63  ;;  %5822 = vmatmul.mubr.msk.bf16.gmra.mrb[88].mxu1 %vm1272_vm0, %v7044_v46 }
 0x1f5   : > { %v2056_v34 = vpack.c.bf16 %v1439_v17, %v1436_v32  ;;  %5825 = vmatprep.mubr.msk.bf16.mxu1 %vm1272_vm0, %v7058_v4 }
 0x1f7   : > { %v5711_v35 = vpop.f32.mrb[76].mxu0  ;;  %5845 = vmatprep.mubr.msk.bf16.mxu0 %vm2096_vm3, %v2056_v34 }
 0x1f8   : > { %v1451_v38 = vpop.f32.mrb[77].mxu0  ;;  %5846 = vmatmul.mubr.msk.bf16.gmra.mrb[100].mxu0 %vm2096_vm3, %v2057_v33  ;;  %v1460_v47 = vadd.f32 %v5711_v35, %v7125_v58 }
 0x1f9   : > { %v5712_v40 = vpop.f32.mrb[78].mxu0  ;;  %v1452_v50 = vadd.f32 %v7125_v58, %v1451_v38 }
 0x1fa   : > { %v1463_v48 = vadd.f32 %v5712_v40, %v7125_v58  ;;  %v1454_v49 = vpop.f32.mrb[79].mxu0 }
 0x1fb   : > { %v1455_v46 = vadd.f32 %v7125_v58, %v1454_v49 }
 0x1fc   : > { %v2059_v51 = vpack.c.bf16 %v1463_v48, %v1460_v47  ;;  %5826 = vmatmul.mubr.msk.bf16.gmra.mrb[92].mxu1 %vm1272_vm0, %v7056_v3 }
 0x1fd   : > { %v2058_v54 = vpack.c.bf16 %v1455_v46, %v1452_v50  ;;  %5829 = vmatprep.mubr.msk.bf16.mxu1 %vm1272_vm0, %v7070_v31 }
 0x1ff   : > { %v5715_v55 = vpop.f32.mrb[80].mxu0  ;;  %5849 = vmatprep.mubr.msk.bf16.mxu0 %vm2096_vm3, %v2058_v54 }
 0x200   : > { %v1467_v56 = vpop.f32.mrb[81].mxu0  ;;  %5850 = vmatmul.mubr.msk.bf16.gmra.mrb[104].mxu0 %vm2096_vm3, %v2059_v51  ;;  %v1476_v60 = vadd.f32 %v5715_v55, %v7125_v58 }
 0x201   : > { %v5716_v57 = vpop.f32.mrb[82].mxu0  ;;  %v1468_v2 = vadd.f32 %v7125_v58, %v1467_v56 }
 0x202   : > { %v1479_v61 = vadd.f32 %v5716_v57, %v7125_v58  ;;  %v1470_v44 = vpop.f32.mrb[83].mxu0 }
 0x203   : > { %v1471_v3 = vadd.f32 %v7125_v58, %v1470_v44 }
 0x204   : > { %v2061_v4 = vpack.c.bf16 %v1479_v61, %v1476_v60  ;;  %5830 = vmatmul.mubr.msk.bf16.gmra.mrb[96].mxu1 %vm1272_vm0, %v7068_v30 }
 0x205   : > { %v2060_v7 = vpack.c.bf16 %v1471_v3, %v1468_v2 }
 0x207   : > { %v5719_v10 = vpop.f32.mrb[84].mxu0  ;;  %5853 = vmatprep.mubr.msk.bf16.mxu0 %vm2096_vm3, %v2060_v7 }
 0x208   : > { %v1483_v11 = vpop.f32.mrb[85].mxu0  ;;  %5854 = vmatmul.mubr.msk.bf16.gmra.mrb[108].mxu0 %vm2096_vm3, %v2061_v4  ;;  %v1492_v13 = vadd.f32 %v5719_v10, %v7125_v58 }
 0x209   : > { %v5720_v12 = vpop.f32.mrb[86].mxu0  ;;  %v1484_v16 = vadd.f32 %v7125_v58, %v1483_v11 }
 0x20a   : > { %v1495_v14 = vadd.f32 %v5720_v12, %v7125_v58  ;;  %v1486_v15 = vpop.f32.mrb[87].mxu0 }
 0x20b   : > { %v1487_v26 = vadd.f32 %v7125_v58, %v1486_v15 }
 0x20c   : > { %v2063_v27 = vpack.c.bf16 %v1495_v14, %v1492_v13 }
 0x20d   : > { %v2062_v28 = vpack.c.bf16 %v1487_v26, %v1484_v16 }
 0x20f   : > { %v5723_v29 = vpop.f32.mrb[88].mxu0  ;;  %5857 = vmatprep.mubr.msk.bf16.mxu0 %vm2096_vm3, %v2062_v28 }
 0x210   : > { %v1499_v30 = vpop.f32.mrb[89].mxu0  ;;  %5858 = vmatmul.mubr.msk.bf16.gmra.mrb[112].mxu0 %vm2096_vm3, %v2063_v27  ;;  %v1508_v45 = vadd.f32 %v5723_v29, %v7125_v58 }
 0x211   : > { %v5724_v31 = vpop.f32.mrb[90].mxu0  ;;  %v1500_v9 = vadd.f32 %v7125_v58, %v1499_v30 }
 0x212   : > { %v1511_v59 = vadd.f32 %v5724_v31, %v7125_v58  ;;  %v1502_v8 = vpop.f32.mrb[91].mxu0 }
 0x213   : > { %v1503_v22 = vadd.f32 %v7125_v58, %v1502_v8 }
 0x214   : > { %v2065_v23 = vpack.c.bf16 %v1511_v59, %v1508_v45 }
 0x215   : > { %v2064_v36 = vpack.c.bf16 %v1503_v22, %v1500_v9 }
 0x217   : > { %v5727_v37 = vpop.f32.mrb[0].mxu1  ;;  %5861 = vmatprep.mubr.msk.bf16.mxu0 %vm2096_vm3, %v2064_v36 }
 0x218   : > { %v1515_v52 = vpop.f32.mrb[1].mxu1  ;;  %5862 = vmatmul.mubr.msk.bf16.gmra.mrb[116].mxu0 %vm2096_vm3, %v2065_v23  ;;  %v1524_v5 = vadd.f32 %v5727_v37, %v7125_v58  ;;  %v6267_v37 = vld [vmem:[%s8321_s11] sm:$0xff]  }
 0x219   : > { %v5728_v53 = vpop.f32.mrb[2].mxu1  ;;  %v1516_v24 = vadd.f32 %v7125_v58, %v1515_v52  ;;  %5967 = vmatprep.subr.bf16.mxu1 %v6267_v37 }
 0x21a   : > { %v1527_v6 = vadd.f32 %v5728_v53, %v7125_v58  ;;  %v1518_v21 = vpop.f32.mrb[3].mxu1  ;;  %5968 = vmatpush3.bf16.msra.mxu1 %v6267_v37 }
 0x21b   : > { %v1519_v39 = vadd.f32 %v7125_v58, %v1518_v21 }
 0x21c   : > { %v2067_v41 = vpack.c.bf16 %v1527_v6, %v1524_v5 }
 0x21d   : > { %v2066_v0 = vpack.c.bf16 %v1519_v39, %v1516_v24 }
 0x21f   : > { %v5731_v1 = vpop.f32.mrb[4].mxu1  ;;  %5865 = vmatprep.mubr.msk.bf16.mxu0 %vm2096_vm3, %v2066_v0 }
 0x220   : > { %v1531_v20 = vpop.f32.mrb[5].mxu1  ;;  %5866 = vmatmul.mubr.msk.bf16.gmra.mrb[120].mxu0 %vm2096_vm3, %v2067_v41  ;;  %v1540_v42 = vadd.f32 %v5731_v1, %v7125_v58 }
 0x221   : > { %v5732_v25 = vpop.f32.mrb[6].mxu1  ;;  %v1532_v63 = vadd.f32 %v7125_v58, %v1531_v20 }
 0x222   : > { %v1543_v43 = vadd.f32 %v5732_v25, %v7125_v58  ;;  %v1534_v62 = vpop.f32.mrb[7].mxu1 }
 0x223   : > { %v1535_v18 = vadd.f32 %v7125_v58, %v1534_v62 }
 0x224   : > { %v2069_v19 = vpack.c.bf16 %v1543_v43, %v1540_v42 }
 0x225   : > { %v2068_v32 = vpack.c.bf16 %v1535_v18, %v1532_v63 }
 0x227   : > { %v5735_v17 = vpop.f32.mrb[8].mxu1  ;;  %5869 = vmatprep.mubr.msk.bf16.mxu0 %vm2096_vm3, %v2068_v32 }
 0x228   : > { %v1547_v33 = vpop.f32.mrb[9].mxu1  ;;  %5870 = vmatmul.mubr.msk.bf16.gmra.mrb[124].mxu0 %vm2096_vm3, %v2069_v19  ;;  %v1556_v35 = vadd.f32 %v5735_v17, %v7125_v58 }
 0x229   : > { %v5736_v34 = vpop.f32.mrb[10].mxu1  ;;  %v1548_v47 = vadd.f32 %v7125_v58, %v1547_v33 }
 0x22a   : > { %v1559_v38 = vadd.f32 %v5736_v34, %v7125_v58  ;;  %v1550_v40 = vpop.f32.mrb[11].mxu1 }
 0x22b   : > { %v1551_v48 = vadd.f32 %v7125_v58, %v1550_v40 }
 0x22c   : > { %v2071_v49 = vpack.c.bf16 %v1559_v38, %v1556_v35 }
 0x22d   : > { %v2070_v50 = vpack.c.bf16 %v1551_v48, %v1548_v47 }
 0x22f   : > { %v5739_v46 = vpop.f32.mrb[12].mxu1  ;;  %5873 = vmatprep.mubr.msk.bf16.mxu0 %vm2096_vm3, %v2070_v50 }
 0x230   : > { %v1563_v51 = vpop.f32.mrb[13].mxu1  ;;  %5874 = vmatmul.mubr.msk.bf16.gmra.mrb[128].mxu0 %vm2096_vm3, %v2071_v49  ;;  %v1572_v55 = vadd.f32 %v5739_v46, %v7125_v58  ;;  %v6243_v49 = vld [vmem:[%s6824_s28] sm:$0xff]  }
 0x231   : > { %v5740_v54 = vpop.f32.mrb[14].mxu1  ;;  %v1564_v60 = vadd.f32 %v7125_v58, %v1563_v51 }
 0x232   : > { %v1575_v56 = vadd.f32 %v5740_v54, %v7125_v58  ;;  %v1566_v57 = vpop.f32.mrb[15].mxu1  ;;  %v6277_v54 = vld [vmem:[%s8321_s11 + $0x10] sm:$0xff]  }
 0x233   : > { %v1567_v61 = vadd.f32 %v7125_v58, %v1566_v57  ;;  %v6245_v57 = vld [vmem:[%s6824_s28 + $0x10] sm:$0xff]  }
 0x234   : > { %v2073_v44 = vpack.c.bf16 %v1575_v56, %v1572_v55  ;;  %v6244_v56 = vld [vmem:[%s6824_s28 + $0x8] sm:$0xff]  }
 0x235   : > { %v2072_v2 = vpack.c.bf16 %v1567_v61, %v1564_v60  ;;  %v6278_v60 = vld [vmem:[%s8321_s11 + $0x18] sm:$0xff]  }
 0x237   : > { %v5743_v3 = vpop.f32.mrb[16].mxu1  ;;  %5877 = vmatprep.mubr.msk.bf16.mxu0 %vm2096_vm3, %v2072_v2 }
 0x238   : > { %v1579_v4 = vpop.f32.mrb[17].mxu1  ;;  %5878 = vmatmul.mubr.msk.bf16.gmra.mrb[132].mxu0 %vm2096_vm3, %v2073_v44  ;;  %v1588_v10 = vadd.f32 %v5743_v3, %v7125_v58 }
 0x239   : > { %v5744_v7 = vpop.f32.mrb[18].mxu1  ;;  %v1580_v13 = vadd.f32 %v7125_v58, %v1579_v4  ;;  %v6246_v4 = vld [vmem:[%s6824_s28 + $0x18] sm:$0xff]  }
 0x23a   : > { %v1591_v11 = vadd.f32 %v5744_v7, %v7125_v58  ;;  %v1582_v12 = vpop.f32.mrb[19].mxu1  ;;  %v6247_v7 = vld [vmem:[%s6824_s28 + $0x20] sm:$0xff]  }
 0x23b   : > { %v1583_v14 = vadd.f32 %v7125_v58, %v1582_v12 }
 0x23c   : > { %v2075_v15 = vpack.c.bf16 %v1591_v11, %v1588_v10 }
 0x23d   : > { %v2074_v16 = vpack.c.bf16 %v1583_v14, %v1580_v13  ;;  %v6248_v14 = vld [vmem:[%s6824_s28 + $0x28] sm:$0xff]  }
 0x23f   : > { %v5747_v26 = vpop.f32.mrb[20].mxu1  ;;  %5881 = vmatprep.mubr.msk.bf16.mxu0 %vm2096_vm3, %v2074_v16 }
 0x240   : > { %v1595_v27 = vpop.f32.mrb[21].mxu1  ;;  %5882 = vmatmul.mubr.msk.bf16.gmra.mrb[136].mxu0 %vm2096_vm3, %v2075_v15  ;;  %v1604_v29 = vadd.f32 %v5747_v26, %v7125_v58  ;;  %v6249_v15 = vld [vmem:[%s6824_s28 + $0x30] sm:$0xff]  }
 0x241   : > { %v5748_v28 = vpop.f32.mrb[22].mxu1  ;;  %v1596_v45 = vadd.f32 %v7125_v58, %v1595_v27 }
 0x242   : > { %v1607_v30 = vadd.f32 %v5748_v28, %v7125_v58  ;;  %v1598_v31 = vpop.f32.mrb[23].mxu1 }
 0x243   : > { %v1599_v59 = vadd.f32 %v7125_v58, %v1598_v31 }
 0x244   : > { %v2077_v8 = vpack.c.bf16 %v1607_v30, %v1604_v29  ;;  %v6250_v29 = vld [vmem:[%s6824_s28 + $0x38] sm:$0xff]   ;;  %v6251_v30 = vld [vmem:[%s6824_s28 + $0x40] sm:$0xff]  }
 0x245   : > { %v2076_v9 = vpack.c.bf16 %v1599_v59, %v1596_v45 }
 0x247   : > { %v5751_v22 = vpop.f32.mrb[24].mxu1  ;;  %5885 = vmatprep.mubr.msk.bf16.mxu0 %vm2096_vm3, %v2076_v9  ;;  %v6252_v9 = vld [vmem:[%s6824_s28 + $0x48] sm:$0xff]  }
 0x248   : > { %v1611_v23 = vpop.f32.mrb[25].mxu1  ;;  %5886 = vmatmul.mubr.msk.bf16.gmra.mrb[140].mxu0 %vm2096_vm3, %v2077_v8  ;;  %v1620_v52 = vadd.f32 %v5751_v22, %v7125_v58  ;;  %v6253_v22 = vld [vmem:[%s6824_s28 + $0x50] sm:$0xff]  }
 0x249   : > { %v5752_v36 = vpop.f32.mrb[26].mxu1  ;;  %v1612_v6 = vadd.f32 %v7125_v58, %v1611_v23 }
 0x24a   : > { %v1623_v53 = vadd.f32 %v5752_v36, %v7125_v58  ;;  %v1614_v5 = vpop.f32.mrb[27].mxu1 }
 0x24b   : > { %v1615_v21 = vadd.f32 %v7125_v58, %v1614_v5  ;;  %v6255_v5 = vld [vmem:[%s6824_s28 + $0x60] sm:$0xff]  }
 0x24c   : > { %v2079_v24 = vpack.c.bf16 %v1623_v53, %v1620_v52  ;;  %v6254_v53 = vld [vmem:[%s6824_s28 + $0x58] sm:$0xff]  }
 0x24d   : > { %v2078_v39 = vpack.c.bf16 %v1615_v21, %v1612_v6 }
 0x24f   : > { %v5755_v41 = vpop.f32.mrb[28].mxu1  ;;  %5889 = vmatprep.mubr.msk.bf16.mxu0 %vm2096_vm3, %v2078_v39 }
 0x250   : > { %v1627_v0 = vpop.f32.mrb[29].mxu1  ;;  %5890 = vmatmul.mubr.msk.bf16.gmra.mrb[144].mxu0 %vm2096_vm3, %v2079_v24  ;;  %v1636_v20 = vadd.f32 %v5755_v41, %v7125_v58  ;;  %v6256_v41 = vld [vmem:[%s6824_s28 + $0x68] sm:$0xff]  }
 0x251   : > { %v5756_v1 = vpop.f32.mrb[30].mxu1  ;;  %v1628_v43 = vadd.f32 %v7125_v58, %v1627_v0  ;;  %v6257_v0 = vld [vmem:[%s6824_s28 + $0x70] sm:$0xff]  }
 0x252   : > { %v1639_v25 = vadd.f32 %v5756_v1, %v7125_v58  ;;  %v1630_v42 = vpop.f32.mrb[31].mxu1 }
 0x253   : > { %v1631_v62 = vadd.f32 %v7125_v58, %v1630_v42 }
 0x254   : > { %v2081_v63 = vpack.c.bf16 %v1639_v25, %v1636_v20 }
 0x255   : > { %v2080_v18 = vpack.c.bf16 %v1631_v62, %v1628_v43  ;;  %v6258_v43 = vld [vmem:[%s6824_s28 + $0x78] sm:$0xff]   ;;  %v6259_v62 = vld [vmem:[%s6824_s28 + $0x80] sm:$0xff]  }
 0x257   : > { %v5759_v19 = vpop.f32.mrb[32].mxu1  ;;  %5893 = vmatprep.mubr.msk.bf16.mxu0 %vm2096_vm3, %v2080_v18 }
 0x258   : > { %v1643_v32 = vpop.f32.mrb[33].mxu1  ;;  %5894 = vmatmul.mubr.msk.bf16.gmra.mrb[148].mxu0 %vm2096_vm3, %v2081_v63  ;;  %v1652_v33 = vadd.f32 %v5759_v19, %v7125_v58 }
 0x259   : > { %v5760_v17 = vpop.f32.mrb[34].mxu1  ;;  %v1644_v38 = vadd.f32 %v7125_v58, %v1643_v32 }
 0x25a   : > { %v1655_v34 = vadd.f32 %v5760_v17, %v7125_v58  ;;  %v1646_v35 = vpop.f32.mrb[35].mxu1  ;;  %v6260_v17 = vld [vmem:[%s6824_s28 + $0x88] sm:$0xff]  }
 0x25b   : > { %v1647_v40 = vadd.f32 %v7125_v58, %v1646_v35  ;;  %v6276_v58 = vld [vmem:[%s8321_s11 + $0x8] sm:$0xff]  }
 0x25c   : > { %v2083_v47 = vpack.c.bf16 %v1655_v34, %v1652_v33  ;;  %5969 = vmatprep.subr.bf16.mxu1 %v6276_v58  ;;  %v6261_v33 = vld [vmem:[%s6824_s28 + $0x90] sm:$0xff]  }
 0x25d   : > { %v2082_v48 = vpack.c.bf16 %v1647_v40, %v1644_v38  ;;  %5970 = vmatpush3.bf16.msra.mxu1 %v6276_v58 }
 0x25e   : > { %5971 = vmatprep.subr.bf16.mxu1 %v6277_v54 }
 0x25f   : > { %v7244_v50 = vpop.f32.mrb[36].mxu1  ;;  %5897 = vmatprep.mubr.msk.bf16.mxu0 %vm2096_vm3, %v2082_v48  ;;  %v6263_v48 = vld [vmem:[%s6824_s28 + $0xa0] sm:$0xff]  }
 0x260   : > { %v7247_v46 = vpop.f32.mrb[37].mxu1  ;;  %5898 = vmatmul.mubr.msk.bf16.gmra.mrb[152].mxu0 %vm2096_vm3, %v2083_v47  ;;  %v6262_v47 = vld [vmem:[%s6824_s28 + $0x98] sm:$0xff]  }
 0x261   : > { %v7250_v51 = vpop.f32.mrb[38].mxu1  ;;  %5903 = vmatprep.mubr.msk.bf16.mxu0 %vm2655_vm4, %v6243_v49  ;;  %5972 = vmatpush3.bf16.msra.mxu1 %v6277_v54 }
 0x262   : > { %v7259_v55 = vpop.f32.mrb[39].mxu1  ;;  %5973 = vmatprep.subr.bf16.mxu1 %v6278_v60 }
 0x265   : > { %5974 = vmatpush3.bf16.msra.mxu1 %v6278_v60  ;;  %v6265_v60 = vld [vmem:[%s6824_s28 + $0xb0] sm:$0xff]  }
 0x267   : > { %v7266_v61 = vpop.f32.mrb[40].mxu1 }
 0x268   : > { %v7268_v44 = vpop.f32.mrb[41].mxu1  ;;  %5904 = vmatmul.mubr.msk.bf16.vlgmr.msra.gmra.mrb[92].mxu0 %vm2655_vm4, %v6244_v56 }
 0x269   : > { %v7271_v2 = vpop.f32.mrb[42].mxu1  ;;  %5907 = vmatprep.mubr.msk.bf16.mxu0 %vm2655_vm4, %v6245_v57  ;;  %v6264_v57 = vld [vmem:[%s6824_s28 + $0xa8] sm:$0xff]  }
 0x26a   : > { %v7274_v3 = vpop.f32.mrb[43].mxu1 }
 0x26f   : > { %v7278_v10 = vpop.f32.mrb[44].mxu1 }
 0x270   : > { %v7280_v11 = vpop.f32.mrb[45].mxu1  ;;  %5908 = vmatmul.mubr.msk.bf16.gmra.mrb[96].mxu0 %vm2655_vm4, %v6246_v4 }
 0x271   : > { %v7283_v12 = vpop.f32.mrb[46].mxu1  ;;  %5911 = vmatprep.mubr.msk.bf16.mxu0 %vm2655_vm4, %v6247_v7 }
 0x272   : > { %v7286_v13 = vpop.f32.mrb[47].mxu1 }
 0x277   : > { %v7290_v16 = vpop.f32.mrb[48].mxu1 }
 0x278   : > { %v7292_v26 = vpop.f32.mrb[49].mxu1  ;;  %5912 = vmatmul.mubr.msk.bf16.gmra.mrb[100].mxu0 %vm2655_vm4, %v6248_v14 }
 0x279   : > { %v7295_v27 = vpop.f32.mrb[50].mxu1  ;;  %5915 = vmatprep.mubr.msk.bf16.mxu0 %vm2655_vm4, %v6249_v15 }
 0x27a   : > { %v7298_v28 = vpop.f32.mrb[51].mxu1 }
 0x27f   : > { %v7302_v31 = vpop.f32.mrb[52].mxu1 }
 0x280   : > { %v7304_v45 = vpop.f32.mrb[53].mxu1  ;;  %5916 = vmatmul.mubr.msk.bf16.gmra.mrb[104].mxu0 %vm2655_vm4, %v6250_v29  ;;  %v6266_v29 = vld [vmem:[%s6824_s28 + $0xb8] sm:$0xff]  }
 0x281   : > { %v7307_v59 = vpop.f32.mrb[54].mxu1  ;;  %5919 = vmatprep.mubr.msk.bf16.mxu0 %vm2655_vm4, %v6251_v30  ;;  %v6268_v30 = vld [vmem:[%s6824_s28 + $0xc0] sm:$0xff]  }
 0x282   : > { %v7310_v8 = vpop.f32.mrb[55].mxu1 }
 0x287   : > { %v7314_v23 = vpop.f32.mrb[56].mxu1 }
 0x288   : > { %v7316_v36 = vpop.f32.mrb[57].mxu1  ;;  %5920 = vmatmul.mubr.msk.bf16.gmra.mrb[108].mxu0 %vm2655_vm4, %v6252_v9 }
 0x289   : > { %v7319_v37 = vpop.f32.mrb[58].mxu1  ;;  %5923 = vmatprep.mubr.msk.bf16.mxu0 %vm2655_vm4, %v6253_v22 }
 0x28a   : > { %v7322_v52 = vpop.f32.mrb[59].mxu1 }
 0x28f   : > { %v7326_v6 = vpop.f32.mrb[60].mxu1 }
 0x290   : > { %v7328_v21 = vpop.f32.mrb[61].mxu1  ;;  %5924 = vmatmul.mubr.msk.bf16.gmra.mrb[112].mxu0 %vm2655_vm4, %v6254_v53 }
 0x291   : > { %v7331_v24 = vpop.f32.mrb[62].mxu1  ;;  %5927 = vmatprep.mubr.msk.bf16.mxu0 %vm2655_vm4, %v6255_v5 }
 0x292   : > { %v7334_v39 = vpop.f32.mrb[63].mxu1 }
 0x297   : > { %v7338_v1 = vpop.f32.mrb[64].mxu1 }
 0x298   : > { %v7340_v20 = vpop.f32.mrb[65].mxu1  ;;  %5928 = vmatmul.mubr.msk.bf16.gmra.mrb[116].mxu0 %vm2655_vm4, %v6256_v41  ;;  %v6269_v41 = vld [vmem:[%s6824_s28 + $0xc8] sm:$0xff]  }
 0x299   : > { %v7343_v25 = vpop.f32.mrb[66].mxu1  ;;  %5931 = vmatprep.mubr.msk.bf16.mxu0 %vm2655_vm4, %v6257_v0  ;;  %v6270_v0 = vld [vmem:[%s6824_s28 + $0xd0] sm:$0xff]  }
 0x29a   : > { %v7346_v42 = vpop.f32.mrb[67].mxu1 }
 0x29f   : > { %v7350_v63 = vpop.f32.mrb[68].mxu1 }
 0x2a0   : > { %v7352_v18 = vpop.f32.mrb[69].mxu1  ;;  %5932 = vmatmul.mubr.msk.bf16.gmra.mrb[120].mxu0 %vm2655_vm4, %v6258_v43 }
 0x2a1   : > { %v7355_v19 = vpop.f32.mrb[70].mxu1  ;;  %5935 = vmatprep.mubr.msk.bf16.mxu0 %vm2655_vm4, %v6259_v62 }
 0x2a2   : > { %v7358_v32 = vpop.f32.mrb[71].mxu1 }
 0x2a7   : > { %v7362_v34 = vpop.f32.mrb[72].mxu1 }
 0x2a8   : > { %v7364_v35 = vpop.f32.mrb[73].mxu1  ;;  %5936 = vmatmul.mubr.msk.bf16.gmra.mrb[124].mxu0 %vm2655_vm4, %v6260_v17 }
 0x2a9   : > { %v7367_v38 = vpop.f32.mrb[74].mxu1  ;;  %5939 = vmatprep.mubr.msk.bf16.mxu0 %vm2655_vm4, %v6261_v33 }
 0x2aa   : > { %v7370_v40 = vpop.f32.mrb[75].mxu1 }
 0x2af   : > { %v7374_v49 = vpop.f32.mrb[76].mxu1 }
 0x2b0   : > { %v7376_v58 = vpop.f32.mrb[77].mxu1  ;;  %5940 = vmatmul.mubr.msk.bf16.gmra.mrb[128].mxu0 %vm2655_vm4, %v6262_v47  ;;  %v6271_v47 = vld [vmem:[%s6824_s28 + $0xd8] sm:$0xff]  }
 0x2b1   : > { %v7379_v54 = vpop.f32.mrb[78].mxu1  ;;  %5943 = vmatprep.mubr.msk.bf16.mxu0 %vm2655_vm4, %v6263_v48  ;;  %v6272_v48 = vld [vmem:[%s6824_s28 + $0xe0] sm:$0xff]  }
 0x2b2   : > { %v7382_v56 = vpop.f32.mrb[79].mxu1 }
 0x2b7   : > { %v7386_v4 = vpop.f32.mrb[80].mxu1 }
 0x2b8   : > { %8326 = vst [vmem:[#allocation2_spill] sm:$0xff] %v7386_v4  ;;  %v7388_v7 = vpop.f32.mrb[81].mxu1  ;;  %5944 = vmatmul.mubr.msk.bf16.gmra.mrb[132].mxu0 %vm2655_vm4, %v6264_v57 }
 0x2b9   : > { %8327 = vst [vmem:[#allocation3_spill] sm:$0xff] %v7388_v7  ;;  %v7391_v14 = vpop.f32.mrb[82].mxu1  ;;  %5947 = vmatprep.mubr.msk.bf16.mxu0 %vm2655_vm4, %v6265_v60 }
 0x2ba   : > { %8328 = vst [vmem:[#allocation4_spill] sm:$0xff] %v7391_v14  ;;  %v7394_v15 = vpop.f32.mrb[83].mxu1 }
 0x2bb   : > { %8329 = vst [vmem:[#allocation5_spill] sm:$0xff] %v7394_v15 }
 0x2bf   : > { %v7398_v9 = vpop.f32.mrb[84].mxu1 }
 0x2c0   : > { %8330 = vst [vmem:[#allocation6_spill] sm:$0xff] %v7398_v9  ;;  %v7400_v22 = vpop.f32.mrb[85].mxu1  ;;  %5948 = vmatmul.mubr.msk.bf16.gmra.mrb[136].mxu0 %vm2655_vm4, %v6266_v29 }
 0x2c1   : > { %8331 = vst [vmem:[#allocation7_spill] sm:$0xff] %v7400_v22  ;;  %v7403_v53 = vpop.f32.mrb[86].mxu1  ;;  %5951 = vmatprep.mubr.msk.bf16.mxu0 %vm2655_vm4, %v6268_v30 }
 0x2c2   : > { %8332 = vst [vmem:[#allocation8_spill] sm:$0xff] %v7403_v53  ;;  %v7406_v5 = vpop.f32.mrb[87].mxu1 }
 0x2c3   : > { %8333 = vst [vmem:[#allocation9_spill] sm:$0xff] %v7406_v5 }
 0x2c7   : > { %v7410_v43 = vpop.f32.mrb[88].mxu1 }
 0x2c8   : > { %8334 = vst [vmem:[#allocation10_spill] sm:$0xff] %v7410_v43  ;;  %v7412_v62 = vpop.f32.mrb[89].mxu1  ;;  %5952 = vmatmul.mubr.msk.bf16.gmra.mrb[140].mxu0 %vm2655_vm4, %v6269_v41  ;;  %v6273_v41 = vld [vmem:[%s6824_s28 + $0xe8] sm:$0xff]  }
 0x2c9   : > { %8335 = vst [vmem:[#allocation11_spill] sm:$0xff] %v7412_v62  ;;  %v7415_v17 = vpop.f32.mrb[90].mxu1  ;;  %5955 = vmatprep.mubr.msk.bf16.mxu0 %vm2655_vm4, %v6270_v0 }
 0x2ca   : > { %8336 = vst [vmem:[#allocation12_spill] sm:$0xff] %v7415_v17  ;;  %v7418_v33 = vpop.f32.mrb[91].mxu1  ;;  %v6274_v17 = vld [vmem:[%s6824_s28 + $0xf0] sm:$0xff]  }
 0x2cb   : > { %8337 = vst [vmem:[#allocation13_spill] sm:$0xff] %v7418_v33 }
 0x2cf   : > { %v7422_v57 = vpop.f32.mrb[92].mxu1 }
 0x2d0   : > { %8338 = vst [vmem:[#allocation14_spill] sm:$0xff] %v7422_v57  ;;  %v7424_v60 = vpop.f32.mrb[93].mxu1  ;;  %5956 = vmatmul.mubr.msk.bf16.gmra.mrb[144].mxu0 %vm2655_vm4, %v6271_v47  ;;  %v6275_v47 = vld [vmem:[%s6824_s28 + $0xf8] sm:$0xff]  }
 0x2d1   : > { %8339 = vst [vmem:[#allocation15_spill] sm:$0xff] %v7424_v60  ;;  %v7427_v29 = vpop.f32.mrb[94].mxu1  ;;  %5959 = vmatprep.mubr.msk.bf16.mxu0 %vm2655_vm4, %v6272_v48  ;;  %v6279_v48 = vld [vmem:[%s8323_s13] sm:$0xff]  }
 0x2d2   : > { %8340 = vst [vmem:[#allocation16_spill] sm:$0xff] %v7427_v29  ;;  %v7430_v30 = vpop.f32.mrb[95].mxu1  ;;  %6039 = vmatprep.subr.bf16.mxu1 %v6279_v48 }
 0x2d3   : > { %8341 = vst [vmem:[#allocation17_spill] sm:$0xff] %v7430_v30 }
 0x2d7   : > { %v7434_v0 = vpop.f32.mrb[96].mxu1 }
 0x2d8   : > { %8342 = vst [vmem:[#allocation18_spill] sm:$0xff] %v7434_v0  ;;  %v7436_v33 = vpop.f32.mrb[97].mxu1  ;;  %5960 = vmatmul.mubr.msk.bf16.gmra.mrb[148].mxu0 %vm2655_vm4, %v6273_v41 }
 0x2d9   : > { %8343 = vst [vmem:[#allocation19_spill] sm:$0xff] %v7436_v33  ;;  %v7439_v62 = vpop.f32.mrb[98].mxu1  ;;  %5963 = vmatprep.mubr.msk.bf16.mxu0 %vm2655_vm4, %v6274_v17  ;;  %v7452_v33 = vld [vmem:[%s8320_s10] ss:$0 sm:$0xff] }
 0x2da   : > { %8344 = vst [vmem:[#allocation20_spill] sm:$0xff] %v7439_v62  ;;  %v7442_v60 = vpop.f32.mrb[99].mxu1 }
 0x2db   : > { %8345 = vst [vmem:[#allocation21_spill] sm:$0xff] %v7442_v60 }
 0x2e0   : > { %5964 = vmatmul.mubr.msk.bf16.gmra.mrb[152].mxu0 %vm2655_vm4, %v6275_v47 }
 0x33b   : > { %v5905_v41 = vpop.f32.mrb[92].mxu0 }
 0x33c   : > { %v3050_v62 = vadd.f32 %v5905_v41, %v7452_v33  ;;  %v2786_v0 = vpop.f32.mrb[93].mxu0 }
 0x33d   : > { %v3048_v17 = vadd.f32 %v7452_v33, %v2786_v0  ;;  %v5906_v60 = vpop.f32.mrb[94].mxu0  ;;  %v6280_v0 = vld [vmem:[%s8323_s13 + $0x8] sm:$0xff]  }
 0x33e   : > { %v3051_v30 = vadd.f32 %v5906_v60, %v7452_v33  ;;  %v2789_v47 = vpop.f32.mrb[95].mxu0  ;;  %v3114_v57 = vmax.f32 %v3050_v62, 0.0 }
 0x33f   : > { %v3049_v29 = vadd.f32 %v7452_v33, %v2789_v47  ;;  %v3112_v5 = vmax.f32 %v3048_v17, 0.0 }
 0x340   : > { %v3115_v43 = vmax.f32 %v3051_v30, 0.0 }
 0x341   : > { %v3113_v53 = vmax.f32 %v3049_v29, 0.0 }
 0x342   : > { %v3177_v22 = vpack.c.bf16 %v3115_v43, %v3114_v57  ;;  %v6281_v43 = vld [vmem:[%s8323_s13 + $0x10] sm:$0xff]  }
 0x343   : > { %v3176_v9 = vpack.c.bf16 %v3113_v53, %v3112_v5  ;;  %v5909_v15 = vpop.f32.mrb[96].mxu0 }
 0x344   : > { %v3054_v14 = vadd.f32 %v5909_v15, %v7452_v33  ;;  %v2802_v7 = vpop.f32.mrb[97].mxu0 }
 0x345   : > { %v3052_v41 = vadd.f32 %v7452_v33, %v2802_v7  ;;  %v5910_v60 = vpop.f32.mrb[98].mxu0  ;;  %5975 = vmatprep.mubr.msk.bf16.mxu1 %vm1272_vm0, %v3176_v9 }
 0x346   : > { %v3055_v62 = vadd.f32 %v5910_v60, %v7452_v33  ;;  %v2805_v30 = vpop.f32.mrb[99].mxu0  ;;  %5976 = vmatmul.mubr.msk.bf16.vlgmr.msra.gmra.mrb[100].mxu1 %vm1272_vm0, %v3177_v22  ;;  %v3118_v5 = vmax.f32 %v3054_v14, 0.0  ;;  %v6282_v14 = vld [vmem:[%s8323_s13 + $0x18] sm:$0xff]  }
 0x347   : > { %v3053_v53 = vadd.f32 %v7452_v33, %v2805_v30  ;;  %6040 = vmatpush3.bf16.msra.mxu1 %v6279_v48  ;;  %v3116_v57 = vmax.f32 %v3052_v41, 0.0 }
 0x348   : > { %v3119_v15 = vmax.f32 %v3055_v62, 0.0  ;;  %6041 = vmatprep.subr.bf16.mxu1 %v6280_v0 }
 0x349   : > { %v3117_v7 = vmax.f32 %v3053_v53, 0.0 }
 0x34a   : > { %v3179_v29 = vpack.c.bf16 %v3119_v15, %v3118_v5 }
 0x34b   : > { %v3178_v17 = vpack.c.bf16 %v3117_v7, %v3116_v57  ;;  %v5913_v9 = vpop.f32.mrb[100].mxu0  ;;  %6042 = vmatpush3.bf16.msra.mxu1 %v6280_v0 }
 0x34c   : > { %v3058_v47 = vadd.f32 %v5913_v9, %v7452_v33  ;;  %v2818_v60 = vpop.f32.mrb[101].mxu0  ;;  %6043 = vmatprep.subr.bf16.mxu1 %v6281_v43 }
 0x34d   : > { %v3056_v22 = vadd.f32 %v7452_v33, %v2818_v60  ;;  %v5914_v48 = vpop.f32.mrb[102].mxu0  ;;  %5979 = vmatprep.mubr.msk.bf16.mxu1 %vm1272_vm0, %v3178_v17 }
 0x34e   : > { %v3059_v41 = vadd.f32 %v5914_v48, %v7452_v33  ;;  %v2821_v62 = vpop.f32.mrb[103].mxu0  ;;  %5980 = vmatmul.mubr.msk.bf16.gmra.mrb[104].mxu1 %vm1272_vm0, %v3179_v29  ;;  %v3122_v30 = vmax.f32 %v3058_v47, 0.0 }
 0x34f   : > { %v3057_v0 = vadd.f32 %v7452_v33, %v2821_v62  ;;  %6044 = vmatpush3.bf16.msra.mxu1 %v6281_v43  ;;  %v3120_v5 = vmax.f32 %v3056_v22, 0.0 }
 0x350   : > { %v3123_v53 = vmax.f32 %v3059_v41, 0.0  ;;  %6045 = vmatprep.subr.bf16.mxu1 %v6282_v14 }
 0x351   : > { %v3121_v15 = vmax.f32 %v3057_v0, 0.0 }
 0x352   : > { %v3181_v57 = vpack.c.bf16 %v3123_v53, %v3122_v30 }
 0x353   : > { %v3180_v7 = vpack.c.bf16 %v3121_v15, %v3120_v5  ;;  %v5917_v9 = vpop.f32.mrb[104].mxu0  ;;  %6046 = vmatpush3.bf16.msra.mxu1 %v6282_v14 }
 0x354   : > { %v3062_v60 = vadd.f32 %v5917_v9, %v7452_v33  ;;  %v2834_v17 = vpop.f32.mrb[105].mxu0 }
 0x355   : > { %v3060_v48 = vadd.f32 %v7452_v33, %v2834_v17  ;;  %v5918_v4 = vpop.f32.mrb[106].mxu0  ;;  %5983 = vmatprep.mubr.msk.bf16.mxu1 %vm1272_vm0, %v3180_v7 }
 0x356   : > { %v3063_v29 = vadd.f32 %v5918_v4, %v7452_v33  ;;  %v2837_v43 = vpop.f32.mrb[107].mxu0  ;;  %5984 = vmatmul.mubr.msk.bf16.gmra.mrb[108].mxu1 %vm1272_vm0, %v3181_v57  ;;  %v3126_v22 = vmax.f32 %v3062_v60, 0.0 }
 0x357   : > { %v3061_v47 = vadd.f32 %v7452_v33, %v2837_v43  ;;  %v3124_v62 = vmax.f32 %v3060_v48, 0.0 }
 0x358   : > { %v3127_v41 = vmax.f32 %v3063_v29, 0.0 }
 0x359   : > { %v3125_v0 = vmax.f32 %v3061_v47, 0.0 }
 0x35a   : > { %v3183_v14 = vpack.c.bf16 %v3127_v41, %v3126_v22 }
 0x35b   : > { %v3182_v30 = vpack.c.bf16 %v3125_v0, %v3124_v62  ;;  %v5921_v53 = vpop.f32.mrb[108].mxu0 }
 0x35c   : > { %v3066_v5 = vadd.f32 %v5921_v53, %v7452_v33  ;;  %v2850_v15 = vpop.f32.mrb[109].mxu0 }
 0x35d   : > { %v3064_v9 = vadd.f32 %v7452_v33, %v2850_v15  ;;  %v5922_v7 = vpop.f32.mrb[110].mxu0  ;;  %5987 = vmatprep.mubr.msk.bf16.mxu1 %vm1272_vm0, %v3182_v30 }
 0x35e   : > { %v3067_v4 = vadd.f32 %v5922_v7, %v7452_v33  ;;  %v2853_v57 = vpop.f32.mrb[111].mxu0  ;;  %5988 = vmatmul.mubr.msk.bf16.gmra.mrb[112].mxu1 %vm1272_vm0, %v3183_v14  ;;  %v3130_v17 = vmax.f32 %v3066_v5, 0.0 }
 0x35f   : > { %v3065_v60 = vadd.f32 %v7452_v33, %v2853_v57  ;;  %v3128_v29 = vmax.f32 %v3064_v9, 0.0 }
 0x360   : > { %v3131_v48 = vmax.f32 %v3067_v4, 0.0 }
 0x361   : > { %v3129_v43 = vmax.f32 %v3065_v60, 0.0 }
 0x362   : > { %v3185_v47 = vpack.c.bf16 %v3131_v48, %v3130_v17 }
 0x363   : > { %v3184_v22 = vpack.c.bf16 %v3129_v43, %v3128_v29  ;;  %v5925_v41 = vpop.f32.mrb[112].mxu0 }
 0x364   : > { %v3070_v62 = vadd.f32 %v5925_v41, %v7452_v33  ;;  %v2866_v0 = vpop.f32.mrb[113].mxu0 }
 0x365   : > { %v3068_v53 = vadd.f32 %v7452_v33, %v2866_v0  ;;  %v5926_v30 = vpop.f32.mrb[114].mxu0  ;;  %5991 = vmatprep.mubr.msk.bf16.mxu1 %vm1272_vm0, %v3184_v22 }
 0x366   : > { %v3071_v15 = vadd.f32 %v5926_v30, %v7452_v33  ;;  %v2869_v14 = vpop.f32.mrb[115].mxu0  ;;  %5992 = vmatmul.mubr.msk.bf16.gmra.mrb[116].mxu1 %vm1272_vm0, %v3185_v47  ;;  %v3134_v9 = vmax.f32 %v3070_v62, 0.0 }
 0x367   : > { %v3069_v5 = vadd.f32 %v7452_v33, %v2869_v14  ;;  %v3132_v4 = vmax.f32 %v3068_v53, 0.0 }
 0x368   : > { %v3135_v7 = vmax.f32 %v3071_v15, 0.0 }
 0x369   : > { %v3133_v57 = vmax.f32 %v3069_v5, 0.0 }
 0x36a   : > { %v3187_v60 = vpack.c.bf16 %v3135_v7, %v3134_v9 }
 0x36b   : > { %v3186_v17 = vpack.c.bf16 %v3133_v57, %v3132_v4  ;;  %v5929_v48 = vpop.f32.mrb[116].mxu0 }
 0x36c   : > { %v3074_v29 = vadd.f32 %v5929_v48, %v7452_v33  ;;  %v2882_v43 = vpop.f32.mrb[117].mxu0 }
 0x36d   : > { %v3072_v41 = vadd.f32 %v7452_v33, %v2882_v43  ;;  %v5930_v22 = vpop.f32.mrb[118].mxu0  ;;  %5995 = vmatprep.mubr.msk.bf16.mxu1 %vm1272_vm0, %v3186_v17 }
 0x36e   : > { %v3075_v0 = vadd.f32 %v5930_v22, %v7452_v33  ;;  %v2885_v47 = vpop.f32.mrb[119].mxu0  ;;  %5996 = vmatmul.mubr.msk.bf16.gmra.mrb[120].mxu1 %vm1272_vm0, %v3187_v60  ;;  %v3138_v53 = vmax.f32 %v3074_v29, 0.0 }
 0x36f   : > { %v3073_v62 = vadd.f32 %v7452_v33, %v2885_v47  ;;  %v3136_v15 = vmax.f32 %v3072_v41, 0.0 }
 0x370   : > { %v3139_v30 = vmax.f32 %v3075_v0, 0.0 }
 0x371   : > { %v3137_v14 = vmax.f32 %v3073_v62, 0.0 }
 0x372   : > { %v3189_v5 = vpack.c.bf16 %v3139_v30, %v3138_v53 }
 0x373   : > { %v3188_v9 = vpack.c.bf16 %v3137_v14, %v3136_v15  ;;  %v5933_v7 = vpop.f32.mrb[120].mxu0 }
 0x374   : > { %v3078_v4 = vadd.f32 %v5933_v7, %v7452_v33  ;;  %v2898_v57 = vpop.f32.mrb[121].mxu0 }
 0x375   : > { %v3076_v48 = vadd.f32 %v7452_v33, %v2898_v57  ;;  %v5934_v17 = vpop.f32.mrb[122].mxu0  ;;  %5999 = vmatprep.mubr.msk.bf16.mxu1 %vm1272_vm0, %v3188_v9 }
 0x376   : > { %v3079_v43 = vadd.f32 %v5934_v17, %v7452_v33  ;;  %v2901_v60 = vpop.f32.mrb[123].mxu0  ;;  %6000 = vmatmul.mubr.msk.bf16.gmra.mrb[124].mxu1 %vm1272_vm0, %v3189_v5  ;;  %v3142_v41 = vmax.f32 %v3078_v4, 0.0 }
 0x377   : > { %v3077_v29 = vadd.f32 %v7452_v33, %v2901_v60  ;;  %v3140_v0 = vmax.f32 %v3076_v48, 0.0 }
 0x378   : > { %v3143_v22 = vmax.f32 %v3079_v43, 0.0 }
 0x379   : > { %v3141_v47 = vmax.f32 %v3077_v29, 0.0 }
 0x37a   : > { %v3191_v62 = vpack.c.bf16 %v3143_v22, %v3142_v41 }
 0x37b   : > { %v3190_v53 = vpack.c.bf16 %v3141_v47, %v3140_v0  ;;  %v5937_v30 = vpop.f32.mrb[124].mxu0 }
 0x37c   : > { %v3082_v15 = vadd.f32 %v5937_v30, %v7452_v33  ;;  %v2914_v14 = vpop.f32.mrb[125].mxu0 }
 0x37d   : > { %v3080_v7 = vadd.f32 %v7452_v33, %v2914_v14  ;;  %v5938_v9 = vpop.f32.mrb[126].mxu0  ;;  %6003 = vmatprep.mubr.msk.bf16.mxu1 %vm1272_vm0, %v3190_v53 }
 0x37e   : > { %v3083_v57 = vadd.f32 %v5938_v9, %v7452_v33  ;;  %v2917_v5 = vpop.f32.mrb[127].mxu0  ;;  %6004 = vmatmul.mubr.msk.bf16.gmra.mrb[128].mxu1 %vm1272_vm0, %v3191_v62  ;;  %v3146_v48 = vmax.f32 %v3082_v15, 0.0 }
 0x37f   : > { %v3081_v4 = vadd.f32 %v7452_v33, %v2917_v5  ;;  %v3144_v43 = vmax.f32 %v3080_v7, 0.0 }
 0x380   : > { %v3147_v17 = vmax.f32 %v3083_v57, 0.0 }
 0x381   : > { %v3145_v60 = vmax.f32 %v3081_v4, 0.0 }
 0x382   : > { %v3193_v29 = vpack.c.bf16 %v3147_v17, %v3146_v48 }
 0x383   : > { %v3192_v41 = vpack.c.bf16 %v3145_v60, %v3144_v43  ;;  %v5941_v22 = vpop.f32.mrb[128].mxu0 }
 0x384   : > { %v3086_v0 = vadd.f32 %v5941_v22, %v7452_v33  ;;  %v2930_v47 = vpop.f32.mrb[129].mxu0 }
 0x385   : > { %v3084_v30 = vadd.f32 %v7452_v33, %v2930_v47  ;;  %v5942_v53 = vpop.f32.mrb[130].mxu0  ;;  %6007 = vmatprep.mubr.msk.bf16.mxu1 %vm1272_vm0, %v3192_v41 }
 0x386   : > { %v3087_v14 = vadd.f32 %v5942_v53, %v7452_v33  ;;  %v2933_v62 = vpop.f32.mrb[131].mxu0  ;;  %6008 = vmatmul.mubr.msk.bf16.gmra.mrb[132].mxu1 %vm1272_vm0, %v3193_v29  ;;  %v3150_v7 = vmax.f32 %v3086_v0, 0.0 }
 0x387   : > { %v3085_v15 = vadd.f32 %v7452_v33, %v2933_v62  ;;  %v3148_v57 = vmax.f32 %v3084_v30, 0.0 }
 0x388   : > { %v3151_v9 = vmax.f32 %v3087_v14, 0.0 }
 0x389   : > { %v3149_v5 = vmax.f32 %v3085_v15, 0.0 }
 0x38a   : > { %v3195_v4 = vpack.c.bf16 %v3151_v9, %v3150_v7 }
 0x38b   : > { %v3194_v48 = vpack.c.bf16 %v3149_v5, %v3148_v57  ;;  %v5945_v17 = vpop.f32.mrb[132].mxu0 }
 0x38c   : > { %v3090_v43 = vadd.f32 %v5945_v17, %v7452_v33  ;;  %v2946_v60 = vpop.f32.mrb[133].mxu0 }
 0x38d   : > { %v3088_v22 = vadd.f32 %v7452_v33, %v2946_v60  ;;  %v5946_v41 = vpop.f32.mrb[134].mxu0  ;;  %6011 = vmatprep.mubr.msk.bf16.mxu1 %vm1272_vm0, %v3194_v48 }
 0x38e   : > { %v3091_v47 = vadd.f32 %v5946_v41, %v7452_v33  ;;  %v2949_v29 = vpop.f32.mrb[135].mxu0  ;;  %6012 = vmatmul.mubr.msk.bf16.gmra.mrb[136].mxu1 %vm1272_vm0, %v3195_v4  ;;  %v3154_v30 = vmax.f32 %v3090_v43, 0.0 }
 0x38f   : > { %v3089_v0 = vadd.f32 %v7452_v33, %v2949_v29  ;;  %v3152_v14 = vmax.f32 %v3088_v22, 0.0 }
 0x390   : > { %v3155_v53 = vmax.f32 %v3091_v47, 0.0 }
 0x391   : > { %v3153_v62 = vmax.f32 %v3089_v0, 0.0 }
 0x392   : > { %v3197_v15 = vpack.c.bf16 %v3155_v53, %v3154_v30 }
 0x393   : > { %v3196_v7 = vpack.c.bf16 %v3153_v62, %v3152_v14  ;;  %v5949_v9 = vpop.f32.mrb[136].mxu0 }
 0x394   : > { %v3094_v57 = vadd.f32 %v5949_v9, %v7452_v33  ;;  %v2962_v5 = vpop.f32.mrb[137].mxu0 }
 0x395   : > { %v3092_v17 = vadd.f32 %v7452_v33, %v2962_v5  ;;  %v5950_v48 = vpop.f32.mrb[138].mxu0  ;;  %6015 = vmatprep.mubr.msk.bf16.mxu1 %vm1272_vm0, %v3196_v7 }
 0x396   : > { %v3095_v60 = vadd.f32 %v5950_v48, %v7452_v33  ;;  %v2965_v4 = vpop.f32.mrb[139].mxu0  ;;  %6016 = vmatmul.mubr.msk.bf16.gmra.mrb[140].mxu1 %vm1272_vm0, %v3197_v15  ;;  %v3158_v22 = vmax.f32 %v3094_v57, 0.0 }
 0x397   : > { %v3093_v43 = vadd.f32 %v7452_v33, %v2965_v4  ;;  %v3156_v47 = vmax.f32 %v3092_v17, 0.0 }
 0x398   : > { %v3159_v41 = vmax.f32 %v3095_v60, 0.0 }
 0x399   : > { %v3157_v29 = vmax.f32 %v3093_v43, 0.0 }
 0x39a   : > { %v3199_v0 = vpack.c.bf16 %v3159_v41, %v3158_v22 }
 0x39b   : > { %v3198_v30 = vpack.c.bf16 %v3157_v29, %v3156_v47  ;;  %v5953_v53 = vpop.f32.mrb[140].mxu0 }
 0x39c   : > { %v3098_v14 = vadd.f32 %v5953_v53, %v7452_v33  ;;  %v2978_v62 = vpop.f32.mrb[141].mxu0 }
 0x39d   : > { %v3096_v9 = vadd.f32 %v7452_v33, %v2978_v62  ;;  %v5954_v7 = vpop.f32.mrb[142].mxu0  ;;  %6019 = vmatprep.mubr.msk.bf16.mxu1 %vm1272_vm0, %v3198_v30 }
 0x39e   : > { %v3099_v5 = vadd.f32 %v5954_v7, %v7452_v33  ;;  %v2981_v15 = vpop.f32.mrb[143].mxu0  ;;  %6020 = vmatmul.mubr.msk.bf16.gmra.mrb[144].mxu1 %vm1272_vm0, %v3199_v0  ;;  %v3162_v17 = vmax.f32 %v3098_v14, 0.0 }
 0x39f   : > { %v3097_v57 = vadd.f32 %v7452_v33, %v2981_v15  ;;  %v3160_v60 = vmax.f32 %v3096_v9, 0.0 }
 0x3a0   : > { %v3163_v48 = vmax.f32 %v3099_v5, 0.0 }
 0x3a1   : > { %v3161_v4 = vmax.f32 %v3097_v57, 0.0 }
 0x3a2   : > { %v3201_v43 = vpack.c.bf16 %v3163_v48, %v3162_v17 }
 0x3a3   : > { %v3200_v22 = vpack.c.bf16 %v3161_v4, %v3160_v60  ;;  %v5957_v41 = vpop.f32.mrb[144].mxu0 }
 0x3a4   : > { %v3102_v47 = vadd.f32 %v5957_v41, %v7452_v33  ;;  %v2994_v29 = vpop.f32.mrb[145].mxu0 }
 0x3a5   : > { %v3100_v53 = vadd.f32 %v7452_v33, %v2994_v29  ;;  %v5958_v30 = vpop.f32.mrb[146].mxu0  ;;  %6023 = vmatprep.mubr.msk.bf16.mxu1 %vm1272_vm0, %v3200_v22 }
 0x3a6   : > { %v3103_v62 = vadd.f32 %v5958_v30, %v7452_v33  ;;  %v2997_v0 = vpop.f32.mrb[147].mxu0  ;;  %6024 = vmatmul.mubr.msk.bf16.gmra.mrb[148].mxu1 %vm1272_vm0, %v3201_v43  ;;  %v3166_v9 = vmax.f32 %v3102_v47, 0.0 }
 0x3a7   : > { %v3101_v14 = vadd.f32 %v7452_v33, %v2997_v0  ;;  %v3164_v5 = vmax.f32 %v3100_v53, 0.0 }
 0x3a8   : > { %v3167_v7 = vmax.f32 %v3103_v62, 0.0 }
 0x3a9   : > { %v3165_v15 = vmax.f32 %v3101_v14, 0.0 }
 0x3aa   : > { %v3203_v57 = vpack.c.bf16 %v3167_v7, %v3166_v9 }
 0x3ab   : > { %v3202_v17 = vpack.c.bf16 %v3165_v15, %v3164_v5  ;;  %v5961_v48 = vpop.f32.mrb[148].mxu0 }
 0x3ac   : > { %v3106_v60 = vadd.f32 %v5961_v48, %v7452_v33  ;;  %v3010_v4 = vpop.f32.mrb[149].mxu0 }
 0x3ad   : > { %v3104_v41 = vadd.f32 %v7452_v33, %v3010_v4  ;;  %v5962_v22 = vpop.f32.mrb[150].mxu0  ;;  %6027 = vmatprep.mubr.msk.bf16.mxu1 %vm1272_vm0, %v3202_v17 }
 0x3ae   : > { %v3107_v29 = vadd.f32 %v5962_v22, %v7452_v33  ;;  %v3013_v43 = vpop.f32.mrb[151].mxu0  ;;  %6028 = vmatmul.mubr.msk.bf16.gmra.mrb[152].mxu1 %vm1272_vm0, %v3203_v57  ;;  %v3170_v53 = vmax.f32 %v3106_v60, 0.0 }
 0x3af   : > { %v3105_v47 = vadd.f32 %v7452_v33, %v3013_v43  ;;  %v3168_v62 = vmax.f32 %v3104_v41, 0.0 }
 0x3b0   : > { %v3171_v30 = vmax.f32 %v3107_v29, 0.0 }
 0x3b1   : > { %v3169_v0 = vmax.f32 %v3105_v47, 0.0 }
 0x3b2   : > { %v3205_v14 = vpack.c.bf16 %v3171_v30, %v3170_v53  ;;  %v7562_v30 = vld [vmem:[%s8322_s12] ss:$0 sm:$0xff] }
 0x3b3   : > { %v3204_v9 = vpack.c.bf16 %v3169_v0, %v3168_v62  ;;  %v5965_v7 = vpop.f32.mrb[152].mxu0 }
 0x3b4   : > { %v3110_v5 = vadd.f32 %v5965_v7, %v7452_v33  ;;  %v3026_v15 = vpop.f32.mrb[153].mxu0 }
 0x3b5   : > { %v3108_v48 = vadd.f32 %v7452_v33, %v3026_v15  ;;  %v5966_v17 = vpop.f32.mrb[154].mxu0  ;;  %6031 = vmatprep.mubr.msk.bf16.mxu1 %vm1272_vm0, %v3204_v9 }
 0x3b6   : > { %v3111_v4 = vadd.f32 %v5966_v17, %v7452_v33  ;;  %v3029_v57 = vpop.f32.mrb[155].mxu0  ;;  %6032 = vmatmul.mubr.msk.bf16.gmra.mrb[156].mxu1 %vm1272_vm0, %v3205_v14  ;;  %v3174_v41 = vmax.f32 %v3110_v5, 0.0 }
 0x3b7   : > { %v3109_v60 = vadd.f32 %v7452_v33, %v3029_v57  ;;  %v3172_v29 = vmax.f32 %v3108_v48, 0.0 }
 0x3b8   : > { %v3175_v22 = vmax.f32 %v3111_v4, 0.0 }
 0x3b9   : > { %v3173_v43 = vmax.f32 %v3109_v60, 0.0 }
 0x3ba   : > { %v3207_v47 = vpack.c.bf16 %v3175_v22, %v3174_v41 }
 0x3bb   : > { %v3206_v53 = vpack.c.bf16 %v3173_v43, %v3172_v29 }
 0x3bd   : > { %6035 = vmatprep.mubr.msk.bf16.mxu1 %vm1272_vm0, %v3206_v53 }
 0x3be   : > { %6036 = vmatmul.mubr.msk.bf16.gmra.mrb[160].mxu1 %vm1272_vm0, %v3207_v47 }
 0x419   : > { %v5977_v62 = vpop.f32.mrb[100].mxu1 }
 0x41a   : > { %v3386_v0 = vadd.f32 %v5977_v62, %v7562_v30  ;;  %v3377_v14 = vpop.f32.mrb[101].mxu1 }
 0x41b   : > { %v3378_v33 = vadd.f32 %v7562_v30, %v3377_v14  ;;  %v5978_v9 = vpop.f32.mrb[102].mxu1 }
 0x41c   : > { %v3389_v7 = vadd.f32 %v5978_v9, %v7562_v30  ;;  %v3380_v5 = vpop.f32.mrb[103].mxu1  ;;  %v3634_v48 = vmax.f32 %v3386_v0, 0.0 }
 0x41d   : > { %v3381_v15 = vadd.f32 %v7562_v30, %v3380_v5  ;;  %v3632_v4 = vmax.f32 %v3378_v33, 0.0 }
 0x41e   : > { %v3635_v17 = vmax.f32 %v3389_v7, 0.0 }
 0x41f   : > { %v3633_v57 = vmax.f32 %v3381_v15, 0.0 }
 0x420   : > { %v3697_v60 = vpack.c.bf16 %v3635_v17, %v3634_v48 }
 0x421   : > { %v3696_v41 = vpack.c.bf16 %v3633_v57, %v3632_v4  ;;  %v5981_v22 = vpop.f32.mrb[104].mxu1 }
 0x422   : > { %v3402_v29 = vadd.f32 %v5981_v22, %v7562_v30  ;;  %v3393_v43 = vpop.f32.mrb[105].mxu1 }
 0x423   : > { %v3394_v47 = vadd.f32 %v7562_v30, %v3393_v43  ;;  %v5982_v53 = vpop.f32.mrb[106].mxu1  ;;  %6047 = vmatprep.mubr.msk.bf16.mxu1 %vm1272_vm0, %v3696_v41 }
 0x424   : > { %v3405_v62 = vadd.f32 %v5982_v53, %v7562_v30  ;;  %v3396_v14 = vpop.f32.mrb[107].mxu1  ;;  %6048 = vmatmul.mubr.msk.bf16.vlgmr.msra.gmra.mrb[164].mxu1 %vm1272_vm0, %v3697_v60  ;;  %v3638_v33 = vmax.f32 %v3402_v29, 0.0 }
 0x425   : > { %v3397_v0 = vadd.f32 %v7562_v30, %v3396_v14  ;;  %v3636_v7 = vmax.f32 %v3394_v47, 0.0 }
 0x426   : > { %v3639_v9 = vmax.f32 %v3405_v62, 0.0 }
 0x427   : > { %v3637_v5 = vmax.f32 %v3397_v0, 0.0 }
 0x428   : > { %v3699_v15 = vpack.c.bf16 %v3639_v9, %v3638_v33 }
 0x429   : > { %v3698_v48 = vpack.c.bf16 %v3637_v5, %v3636_v7  ;;  %v5985_v17 = vpop.f32.mrb[108].mxu1 }
 0x42a   : > { %v3418_v4 = vadd.f32 %v5985_v17, %v7562_v30  ;;  %v3409_v57 = vpop.f32.mrb[109].mxu1 }
 0x42b   : > { %v3410_v22 = vadd.f32 %v7562_v30, %v3409_v57  ;;  %v5986_v41 = vpop.f32.mrb[110].mxu1  ;;  %6051 = vmatprep.mubr.msk.bf16.mxu1 %vm1272_vm0, %v3698_v48 }
 0x42c   : > { %v3421_v43 = vadd.f32 %v5986_v41, %v7562_v30  ;;  %v3412_v60 = vpop.f32.mrb[111].mxu1  ;;  %6052 = vmatmul.mubr.msk.bf16.gmra.mrb[168].mxu1 %vm1272_vm0, %v3699_v15  ;;  %v3642_v47 = vmax.f32 %v3418_v4, 0.0 }
 0x42d   : > { %v3413_v29 = vadd.f32 %v7562_v30, %v3412_v60  ;;  %v3640_v62 = vmax.f32 %v3410_v22, 0.0 }
 0x42e   : > { %v3643_v53 = vmax.f32 %v3421_v43, 0.0 }
 0x42f   : > { %v3641_v14 = vmax.f32 %v3413_v29, 0.0 }
 0x430   : > { %v3701_v0 = vpack.c.bf16 %v3643_v53, %v3642_v47 }
 0x431   : > { %v3700_v33 = vpack.c.bf16 %v3641_v14, %v3640_v62  ;;  %v5989_v9 = vpop.f32.mrb[112].mxu1 }
 0x432   : > { %v3434_v7 = vadd.f32 %v5989_v9, %v7562_v30  ;;  %v3425_v5 = vpop.f32.mrb[113].mxu1 }
 0x433   : > { %v3426_v17 = vadd.f32 %v7562_v30, %v3425_v5  ;;  %v5990_v48 = vpop.f32.mrb[114].mxu1  ;;  %6055 = vmatprep.mubr.msk.bf16.mxu1 %vm1272_vm0, %v3700_v33 }
 0x434   : > { %v3437_v57 = vadd.f32 %v5990_v48, %v7562_v30  ;;  %v3428_v15 = vpop.f32.mrb[115].mxu1  ;;  %6056 = vmatmul.mubr.msk.bf16.gmra.mrb[172].mxu1 %vm1272_vm0, %v3701_v0  ;;  %v3646_v22 = vmax.f32 %v3434_v7, 0.0 }
 0x435   : > { %v3429_v4 = vadd.f32 %v7562_v30, %v3428_v15  ;;  %v3644_v43 = vmax.f32 %v3426_v17, 0.0 }
 0x436   : > { %v3647_v41 = vmax.f32 %v3437_v57, 0.0 }
 0x437   : > { %v3645_v60 = vmax.f32 %v3429_v4, 0.0 }
 0x438   : > { %v3703_v29 = vpack.c.bf16 %v3647_v41, %v3646_v22 }
 0x439   : > { %v3702_v47 = vpack.c.bf16 %v3645_v60, %v3644_v43  ;;  %v5993_v53 = vpop.f32.mrb[116].mxu1 }
 0x43a   : > { %v3450_v62 = vadd.f32 %v5993_v53, %v7562_v30  ;;  %v3441_v14 = vpop.f32.mrb[117].mxu1 }
 0x43b   : > { %v3442_v9 = vadd.f32 %v7562_v30, %v3441_v14  ;;  %v5994_v33 = vpop.f32.mrb[118].mxu1  ;;  %6059 = vmatprep.mubr.msk.bf16.mxu1 %vm1272_vm0, %v3702_v47 }
 0x43c   : > { %v3453_v5 = vadd.f32 %v5994_v33, %v7562_v30  ;;  %v3444_v0 = vpop.f32.mrb[119].mxu1  ;;  %6060 = vmatmul.mubr.msk.bf16.gmra.mrb[176].mxu1 %vm1272_vm0, %v3703_v29  ;;  %v3650_v17 = vmax.f32 %v3450_v62, 0.0 }
 0x43d   : > { %v3445_v7 = vadd.f32 %v7562_v30, %v3444_v0  ;;  %v3648_v57 = vmax.f32 %v3442_v9, 0.0 }
 0x43e   : > { %v3651_v48 = vmax.f32 %v3453_v5, 0.0 }
 0x43f   : > { %v3649_v15 = vmax.f32 %v3445_v7, 0.0 }
 0x440   : > { %v3705_v4 = vpack.c.bf16 %v3651_v48, %v3650_v17 }
 0x441   : > { %v3704_v22 = vpack.c.bf16 %v3649_v15, %v3648_v57  ;;  %v5997_v41 = vpop.f32.mrb[120].mxu1 }
 0x442   : > { %v3466_v43 = vadd.f32 %v5997_v41, %v7562_v30  ;;  %v3457_v60 = vpop.f32.mrb[121].mxu1 }
 0x443   : > { %v3458_v53 = vadd.f32 %v7562_v30, %v3457_v60  ;;  %v5998_v47 = vpop.f32.mrb[122].mxu1  ;;  %6063 = vmatprep.mubr.msk.bf16.mxu1 %vm1272_vm0, %v3704_v22 }
 0x444   : > { %v3469_v14 = vadd.f32 %v5998_v47, %v7562_v30  ;;  %v3460_v29 = vpop.f32.mrb[123].mxu1  ;;  %6064 = vmatmul.mubr.msk.bf16.gmra.mrb[180].mxu1 %vm1272_vm0, %v3705_v4  ;;  %v3654_v9 = vmax.f32 %v3466_v43, 0.0 }
 0x445   : > { %v3461_v62 = vadd.f32 %v7562_v30, %v3460_v29  ;;  %v3652_v5 = vmax.f32 %v3458_v53, 0.0 }
 0x446   : > { %v3655_v33 = vmax.f32 %v3469_v14, 0.0 }
 0x447   : > { %v3653_v0 = vmax.f32 %v3461_v62, 0.0 }
 0x448   : > { %v3707_v7 = vpack.c.bf16 %v3655_v33, %v3654_v9 }
 0x449   : > { %v3706_v17 = vpack.c.bf16 %v3653_v0, %v3652_v5  ;;  %v6001_v48 = vpop.f32.mrb[124].mxu1 }
 0x44a   : > { %v3482_v57 = vadd.f32 %v6001_v48, %v7562_v30  ;;  %v3473_v15 = vpop.f32.mrb[125].mxu1 }
 0x44b   : > { %v3474_v41 = vadd.f32 %v7562_v30, %v3473_v15  ;;  %v6002_v22 = vpop.f32.mrb[126].mxu1  ;;  %6067 = vmatprep.mubr.msk.bf16.mxu1 %vm1272_vm0, %v3706_v17 }
 0x44c   : > { %v3485_v60 = vadd.f32 %v6002_v22, %v7562_v30  ;;  %v3476_v4 = vpop.f32.mrb[127].mxu1  ;;  %6068 = vmatmul.mubr.msk.bf16.gmra.mrb[184].mxu1 %vm1272_vm0, %v3707_v7  ;;  %v3658_v53 = vmax.f32 %v3482_v57, 0.0 }
 0x44d   : > { %v3477_v43 = vadd.f32 %v7562_v30, %v3476_v4  ;;  %v3656_v14 = vmax.f32 %v3474_v41, 0.0 }
 0x44e   : > { %v3659_v47 = vmax.f32 %v3485_v60, 0.0 }
 0x44f   : > { %v3657_v29 = vmax.f32 %v3477_v43, 0.0 }
 0x450   : > { %v3709_v62 = vpack.c.bf16 %v3659_v47, %v3658_v53 }
 0x451   : > { %v3708_v9 = vpack.c.bf16 %v3657_v29, %v3656_v14  ;;  %v6005_v33 = vpop.f32.mrb[128].mxu1 }
 0x452   : > { %v3498_v5 = vadd.f32 %v6005_v33, %v7562_v30  ;;  %v3489_v0 = vpop.f32.mrb[129].mxu1 }
 0x453   : > { %v3490_v48 = vadd.f32 %v7562_v30, %v3489_v0  ;;  %v6006_v17 = vpop.f32.mrb[130].mxu1  ;;  %6071 = vmatprep.mubr.msk.bf16.mxu1 %vm1272_vm0, %v3708_v9 }
 0x454   : > { %v3501_v15 = vadd.f32 %v6006_v17, %v7562_v30  ;;  %v3492_v7 = vpop.f32.mrb[131].mxu1  ;;  %6072 = vmatmul.mubr.msk.bf16.gmra.mrb[188].mxu1 %vm1272_vm0, %v3709_v62  ;;  %v3662_v41 = vmax.f32 %v3498_v5, 0.0 }
 0x455   : > { %v3493_v57 = vadd.f32 %v7562_v30, %v3492_v7  ;;  %v3660_v60 = vmax.f32 %v3490_v48, 0.0 }
 0x456   : > { %v3663_v22 = vmax.f32 %v3501_v15, 0.0 }
 0x457   : > { %v3661_v4 = vmax.f32 %v3493_v57, 0.0 }
 0x458   : > { %v3711_v43 = vpack.c.bf16 %v3663_v22, %v3662_v41 }
 0x459   : > { %v3710_v53 = vpack.c.bf16 %v3661_v4, %v3660_v60  ;;  %v6009_v47 = vpop.f32.mrb[132].mxu1 }
 0x45a   : > { %v3514_v14 = vadd.f32 %v6009_v47, %v7562_v30  ;;  %v3505_v29 = vpop.f32.mrb[133].mxu1 }
 0x45b   : > { %v3506_v33 = vadd.f32 %v7562_v30, %v3505_v29  ;;  %v6010_v9 = vpop.f32.mrb[134].mxu1  ;;  %6075 = vmatprep.mubr.msk.bf16.mxu1 %vm1272_vm0, %v3710_v53 }
 0x45c   : > { %v3517_v0 = vadd.f32 %v6010_v9, %v7562_v30  ;;  %v3508_v62 = vpop.f32.mrb[135].mxu1  ;;  %6076 = vmatmul.mubr.msk.bf16.gmra.mrb[192].mxu1 %vm1272_vm0, %v3711_v43  ;;  %v3666_v48 = vmax.f32 %v3514_v14, 0.0 }
 0x45d   : > { %v3509_v5 = vadd.f32 %v7562_v30, %v3508_v62  ;;  %v3664_v15 = vmax.f32 %v3506_v33, 0.0 }
 0x45e   : > { %v3667_v17 = vmax.f32 %v3517_v0, 0.0 }
 0x45f   : > { %v3665_v7 = vmax.f32 %v3509_v5, 0.0 }
 0x460   : > { %v3713_v57 = vpack.c.bf16 %v3667_v17, %v3666_v48 }
 0x461   : > { %v3712_v41 = vpack.c.bf16 %v3665_v7, %v3664_v15  ;;  %v6013_v22 = vpop.f32.mrb[136].mxu1 }
 0x462   : > { %v3530_v60 = vadd.f32 %v6013_v22, %v7562_v30  ;;  %v3521_v4 = vpop.f32.mrb[137].mxu1 }
 0x463   : > { %v3522_v47 = vadd.f32 %v7562_v30, %v3521_v4  ;;  %v6014_v53 = vpop.f32.mrb[138].mxu1  ;;  %6079 = vmatprep.mubr.msk.bf16.mxu1 %vm1272_vm0, %v3712_v41 }
 0x464   : > { %v3533_v29 = vadd.f32 %v6014_v53, %v7562_v30  ;;  %v3524_v43 = vpop.f32.mrb[139].mxu1  ;;  %6080 = vmatmul.mubr.msk.bf16.gmra.mrb[196].mxu1 %vm1272_vm0, %v3713_v57  ;;  %v3670_v33 = vmax.f32 %v3530_v60, 0.0 }
 0x465   : > { %v3525_v14 = vadd.f32 %v7562_v30, %v3524_v43  ;;  %v3668_v0 = vmax.f32 %v3522_v47, 0.0 }
 0x466   : > { %v3671_v9 = vmax.f32 %v3533_v29, 0.0 }
 0x467   : > { %v3669_v62 = vmax.f32 %v3525_v14, 0.0 }
 0x468   : > { %v3715_v5 = vpack.c.bf16 %v3671_v9, %v3670_v33 }
 0x469   : > { %v3714_v48 = vpack.c.bf16 %v3669_v62, %v3668_v0  ;;  %v6017_v17 = vpop.f32.mrb[140].mxu1 }
 0x46a   : > { %v3546_v15 = vadd.f32 %v6017_v17, %v7562_v30  ;;  %v3537_v7 = vpop.f32.mrb[141].mxu1 }
 0x46b   : > { %v3538_v22 = vadd.f32 %v7562_v30, %v3537_v7  ;;  %v6018_v41 = vpop.f32.mrb[142].mxu1  ;;  %6083 = vmatprep.mubr.msk.bf16.mxu1 %vm1272_vm0, %v3714_v48 }
 0x46c   : > { %v3549_v4 = vadd.f32 %v6018_v41, %v7562_v30  ;;  %v3540_v57 = vpop.f32.mrb[143].mxu1  ;;  %6084 = vmatmul.mubr.msk.bf16.gmra.mrb[200].mxu1 %vm1272_vm0, %v3715_v5  ;;  %v3674_v47 = vmax.f32 %v3546_v15, 0.0 }
 0x46d   : > { %v3541_v60 = vadd.f32 %v7562_v30, %v3540_v57  ;;  %v3672_v29 = vmax.f32 %v3538_v22, 0.0 }
 0x46e   : > { %v3675_v53 = vmax.f32 %v3549_v4, 0.0 }
 0x46f   : > { %v3673_v43 = vmax.f32 %v3541_v60, 0.0 }
 0x470   : > { %v3717_v14 = vpack.c.bf16 %v3675_v53, %v3674_v47 }
 0x471   : > { %v3716_v33 = vpack.c.bf16 %v3673_v43, %v3672_v29  ;;  %v6021_v9 = vpop.f32.mrb[144].mxu1 }
 0x472   : > { %v3562_v0 = vadd.f32 %v6021_v9, %v7562_v30  ;;  %v3553_v62 = vpop.f32.mrb[145].mxu1 }
 0x473   : > { %v3554_v17 = vadd.f32 %v7562_v30, %v3553_v62  ;;  %v6022_v48 = vpop.f32.mrb[146].mxu1  ;;  %6087 = vmatprep.mubr.msk.bf16.mxu1 %vm1272_vm0, %v3716_v33 }
 0x474   : > { %v3565_v7 = vadd.f32 %v6022_v48, %v7562_v30  ;;  %v3556_v5 = vpop.f32.mrb[147].mxu1  ;;  %6088 = vmatmul.mubr.msk.bf16.gmra.mrb[204].mxu1 %vm1272_vm0, %v3717_v14  ;;  %v3678_v22 = vmax.f32 %v3562_v0, 0.0 }
 0x475   : > { %v3557_v15 = vadd.f32 %v7562_v30, %v3556_v5  ;;  %v3676_v4 = vmax.f32 %v3554_v17, 0.0 }
 0x476   : > { %v3679_v41 = vmax.f32 %v3565_v7, 0.0 }
 0x477   : > { %v3677_v57 = vmax.f32 %v3557_v15, 0.0 }
 0x478   : > { %v3719_v60 = vpack.c.bf16 %v3679_v41, %v3678_v22 }
 0x479   : > { %v3718_v47 = vpack.c.bf16 %v3677_v57, %v3676_v4  ;;  %v6025_v53 = vpop.f32.mrb[148].mxu1 }
 0x47a   : > { %v3578_v29 = vadd.f32 %v6025_v53, %v7562_v30  ;;  %v3569_v43 = vpop.f32.mrb[149].mxu1 }
 0x47b   : > { %v3570_v9 = vadd.f32 %v7562_v30, %v3569_v43  ;;  %v6026_v33 = vpop.f32.mrb[150].mxu1  ;;  %6091 = vmatprep.mubr.msk.bf16.mxu1 %vm1272_vm0, %v3718_v47 }
 0x47c   : > { %v3581_v62 = vadd.f32 %v6026_v33, %v7562_v30  ;;  %v3572_v14 = vpop.f32.mrb[151].mxu1  ;;  %6092 = vmatmul.mubr.msk.bf16.gmra.mrb[208].mxu1 %vm1272_vm0, %v3719_v60  ;;  %v3682_v17 = vmax.f32 %v3578_v29, 0.0 }
 0x47d   : > { %v3573_v0 = vadd.f32 %v7562_v30, %v3572_v14  ;;  %v3680_v7 = vmax.f32 %v3570_v9, 0.0 }
 0x47e   : > { %v3683_v48 = vmax.f32 %v3581_v62, 0.0 }
 0x47f   : > { %v3681_v5 = vmax.f32 %v3573_v0, 0.0 }
 0x480   : > { %v3721_v15 = vpack.c.bf16 %v3683_v48, %v3682_v17 }
 0x481   : > { %v3720_v22 = vpack.c.bf16 %v3681_v5, %v3680_v7  ;;  %v6029_v41 = vpop.f32.mrb[152].mxu1 }
 0x482   : > { %v3594_v4 = vadd.f32 %v6029_v41, %v7562_v30  ;;  %v3585_v57 = vpop.f32.mrb[153].mxu1 }
 0x483   : > { %v3586_v53 = vadd.f32 %v7562_v30, %v3585_v57  ;;  %v6030_v47 = vpop.f32.mrb[154].mxu1  ;;  %6095 = vmatprep.mubr.msk.bf16.mxu1 %vm1272_vm0, %v3720_v22 }
 0x484   : > { %v3597_v43 = vadd.f32 %v6030_v47, %v7562_v30  ;;  %v3588_v60 = vpop.f32.mrb[155].mxu1  ;;  %6096 = vmatmul.mubr.msk.bf16.gmra.mrb[212].mxu1 %vm1272_vm0, %v3721_v15  ;;  %v3686_v9 = vmax.f32 %v3594_v4, 0.0 }
 0x485   : > { %v3589_v29 = vadd.f32 %v7562_v30, %v3588_v60  ;;  %v3684_v62 = vmax.f32 %v3586_v53, 0.0 }
 0x486   : > { %v3687_v33 = vmax.f32 %v3597_v43, 0.0 }
 0x487   : > { %v3685_v14 = vmax.f32 %v3589_v29, 0.0 }
 0x488   : > { %v3723_v0 = vpack.c.bf16 %v3687_v33, %v3686_v9 }
 0x489   : > { %v3722_v17 = vpack.c.bf16 %v3685_v14, %v3684_v62  ;;  %v6033_v48 = vpop.f32.mrb[156].mxu1 }
 0x48a   : > { %v3610_v7 = vadd.f32 %v6033_v48, %v7562_v30  ;;  %v3601_v5 = vpop.f32.mrb[157].mxu1 }
 0x48b   : > { %v3602_v41 = vadd.f32 %v7562_v30, %v3601_v5  ;;  %v6034_v22 = vpop.f32.mrb[158].mxu1  ;;  %6099 = vmatprep.mubr.msk.bf16.mxu1 %vm1272_vm0, %v3722_v17 }
 0x48c   : > { %v3613_v57 = vadd.f32 %v6034_v22, %v7562_v30  ;;  %v3604_v15 = vpop.f32.mrb[159].mxu1  ;;  %6100 = vmatmul.mubr.msk.bf16.gmra.mrb[216].mxu1 %vm1272_vm0, %v3723_v0  ;;  %v3690_v53 = vmax.f32 %v3610_v7, 0.0 }
 0x48d   : > { %v3605_v4 = vadd.f32 %v7562_v30, %v3604_v15  ;;  %v3688_v43 = vmax.f32 %v3602_v41, 0.0 }
 0x48e   : > { %v3691_v47 = vmax.f32 %v3613_v57, 0.0 }
 0x48f   : > { %v3689_v60 = vmax.f32 %v3605_v4, 0.0 }
 0x490   : > { %v3725_v29 = vpack.c.bf16 %v3691_v47, %v3690_v53  ;;  %v7663_v47 = vld [vmem:[%s8317_s7] ss:$0 sm:$0xff] }
 0x491   : > { %v3724_v9 = vpack.c.bf16 %v3689_v60, %v3688_v43  ;;  %v6037_v33 = vpop.f32.mrb[160].mxu1  ;;  %v1740_v43 = vadd.f32 %v7244_v50, %v7663_v47  ;;  %v1743_v60 = vadd.f32 %v7250_v51, %v7663_v47  ;;  %v1759_v50 = vadd.f32 %v7271_v2, %v7663_v47 }
 0x492   : > { %v3626_v62 = vadd.f32 %v6037_v33, %v7562_v30  ;;  %v3617_v14 = vpop.f32.mrb[161].mxu1  ;;  %v1756_v33 = vadd.f32 %v7266_v61, %v7663_v47  ;;  %v1764_v61 = vadd.f32 %v7663_v47, %v7280_v11  ;;  %v1780_v11 = vadd.f32 %v7663_v47, %v7292_v26 }
 0x493   : > { %v3618_v48 = vadd.f32 %v7562_v30, %v3617_v14  ;;  %v6038_v17 = vpop.f32.mrb[162].mxu1  ;;  %6103 = vmatprep.mubr.msk.bf16.mxu1 %vm1272_vm0, %v3724_v9  ;;  %v5230_v9 = vadd.f32 -1.0, %v1740_v43  ;;  %v1748_v14 = vadd.f32 %v7663_v47, %v7268_v44  ;;  %v5235_v44 = vadd.f32 -1.0, %v1759_v50 }
 0x494   : > { %v3629_v5 = vadd.f32 %v6038_v17, %v7562_v30  ;;  %v3620_v0 = vpop.f32.mrb[163].mxu1  ;;  %6104 = vmatmul.mubr.msk.bf16.gmra.mrb[220].mxu1 %vm1272_vm0, %v3725_v29  ;;  %v3694_v41 = vmax.f32 %v3626_v62, 0.0  ;;  %v1735_v29 = vadd.f32 %v7663_v47, %v7259_v55  ;;  %v1772_v55 = vadd.f32 %v7278_v10, %v7663_v47 }
 0x495   : > { %v3621_v7 = vadd.f32 %v7562_v30, %v3620_v0  ;;  %v3692_v57 = vmax.f32 %v3618_v48, 0.0  ;;  %v1732_v30 = vadd.f32 %v7663_v47, %v7247_v46  ;;  %v5231_v48 = vadd.f32 -1.0, %v1743_v60 }
 0x496   : > { %v3695_v22 = vmax.f32 %v3629_v5, 0.0  ;;  %v5229_v17 = vadd.f32 -1.0, %v1735_v29  ;;  %v1751_v46 = vadd.f32 %v7663_v47, %v7274_v3  ;;  %v4223_v51 = vmul.f32 1.442695, %v5230_v9 }
 0x497   : > { %v3693_v15 = vmax.f32 %v3621_v7, 0.0  ;;  %v5228_v62 = vadd.f32 -1.0, %v1732_v30  ;;  %v5234_v5 = vadd.f32 -1.0, %v1756_v33  ;;  %v5232_v7 = vadd.f32 -1.0, %v1748_v14 }
 0x498   : > { %v3727_v4 = vpack.c.bf16 %v3695_v22, %v3694_v41  ;;  %v4225_v41 = vmul.f32 1.442695, %v5231_v48  ;;  %v1775_v22 = vadd.f32 %v7283_v12, %v7663_v47  ;;  %v4221_v2 = vmul.f32 1.442695, %v5229_v17 }
 0x499   : > { %v3726_v53 = vpack.c.bf16 %v3693_v15, %v3692_v57  ;;  %v4219_v0 = vmul.f32 1.442695, %v5228_v62  ;;  %v5233_v57 = vadd.f32 -1.0, %v1751_v46  ;;  %v1767_v3 = vadd.f32 %v7663_v47, %v7286_v13 }
 0x49a   : > { %6283 = vpow2.f32 %v4223_v51  ;;  %v4231_v15 = vmul.f32 1.442695, %v5234_v5  ;;  %v1788_v10 = vadd.f32 %v7290_v16, %v7663_v47  ;;  %v5236_v43 = vadd.f32 -1.0, %v1764_v61 }
 0x49b   : > { %6107 = vmatprep.mubr.msk.bf16.mxu1 %vm1272_vm0, %v3726_v53  ;;  %6285 = vpow2.f32 %v4219_v0  ;;  %v4227_v53 = vmul.f32 1.442695, %v5232_v7  ;;  %v4233_v30 = vmul.f32 1.442695, %v5235_v44  ;;  %v5239_v12 = vadd.f32 -1.0, %v1775_v22 }
 0x49c   : > { %6108 = vmatmul.mubr.msk.bf16.gmra.mrb[224].mxu1 %vm1272_vm0, %v3727_v4  ;;  %v5238_v4 = vadd.f32 -1.0, %v1772_v55  ;;  %6287 = vpow2.f32 %v4225_v41  ;;  %v1791_v60 = vadd.f32 %v7295_v27, %v7663_v47  ;;  %v4229_v13 = vmul.f32 1.442695, %v5233_v57 }
 0x49d   : > { %6289 = vpow2.f32 %v4221_v2  ;;  %v5237_v29 = vadd.f32 -1.0, %v1767_v3  ;;  %v1783_v9 = vadd.f32 %v7663_v47, %v7298_v28  ;;  %v5242_v33 = vadd.f32 -1.0, %v1788_v10 }
 0x49e   : > { %6291 = vpow2.f32 %v4231_v15  ;;  %v4239_v16 = vmul.f32 1.442695, %v5238_v4  ;;  %v1804_v62 = vadd.f32 %v7302_v31, %v7663_v47  ;;  %v4235_v26 = vmul.f32 1.442695, %v5236_v43 }
 0x49f   : > { %6293 = vpow2.f32 %v4227_v53  ;;  %v5240_v14 = vadd.f32 -1.0, %v1780_v11  ;;  %v1796_v48 = vadd.f32 %v7663_v47, %v7304_v45  ;;  %v4241_v27 = vmul.f32 1.442695, %v5239_v12 }
 0x4a0   : > { %6295 = vpow2.f32 %v4233_v30  ;;  %v5243_v50 = vadd.f32 -1.0, %v1791_v60  ;;  %v1807_v17 = vadd.f32 %v7307_v59, %v7663_v47  ;;  %v4237_v28 = vmul.f32 1.442695, %v5237_v29 }
 0x4a1   : > { %6297 = vpow2.f32 %v4229_v13  ;;  %v5241_v46 = vadd.f32 -1.0, %v1783_v9  ;;  %v1799_v51 = vadd.f32 %v7663_v47, %v7310_v8  ;;  %v4247_v31 = vmul.f32 1.442695, %v5242_v33 }
 0x4a2   : > { %6299 = vpow2.f32 %v4239_v16  ;;  %v5246_v5 = vadd.f32 -1.0, %v1804_v62  ;;  %v1820_v55 = vadd.f32 %v7314_v23, %v7663_v47  ;;  %v4243_v45 = vmul.f32 1.442695, %v5240_v14 }
 0x4a3   : > { %6301 = vpow2.f32 %v4235_v26  ;;  %v5244_v0 = vadd.f32 -1.0, %v1796_v48  ;;  %v1812_v7 = vadd.f32 %v7663_v47, %v7316_v36  ;;  %v4249_v59 = vmul.f32 1.442695, %v5243_v50 }
 0x4a4   : > { %v7709_v61 = vpop.eup %6283  ;;  %6303 = vpow2.f32 %v4241_v27  ;;  %v5247_v41 = vadd.f32 -1.0, %v1807_v17  ;;  %v1823_v8 = vadd.f32 %v7319_v37, %v7663_v47  ;;  %v4245_v22 = vmul.f32 1.442695, %v5241_v46 }
 0x4a5   : > { %v7713_v44 = vpop.eup %6285  ;;  %6305 = vpow2.f32 %v4237_v28  ;;  %v5245_v2 = vadd.f32 -1.0, %v1799_v51  ;;  %v1815_v23 = vadd.f32 %v7663_v47, %v7322_v52  ;;  %v4255_v36 = vmul.f32 1.442695, %v5246_v5 }
 0x4a6   : > { %v7717_v57 = vpop.eup %6287  ;;  %6307 = vpow2.f32 %v4247_v31  ;;  %v5250_v3 = vadd.f32 -1.0, %v1820_v55  ;;  %v1836_v15 = vadd.f32 %v7326_v6, %v7663_v47  ;;  %v4251_v37 = vmul.f32 1.442695, %v5244_v0 }
 0x4a7   : > { %v7721_v4 = vpop.eup %6289  ;;  %6309 = vpow2.f32 %v4243_v45  ;;  %v5248_v10 = vadd.f32 -1.0, %v1812_v7  ;;  %v1828_v53 = vadd.f32 %v7663_v47, %v7328_v21  ;;  %v4257_v52 = vmul.f32 1.442695, %v5247_v41 }
 0x4a8   : > { %v7725_v43 = vpop.eup %6291  ;;  %6311 = vpow2.f32 %v4249_v59  ;;  %v5251_v11 = vadd.f32 -1.0, %v1823_v8  ;;  %v1839_v30 = vadd.f32 %v7331_v24, %v7663_v47  ;;  %v4253_v6 = vmul.f32 1.442695, %v5245_v2 }
 0x4a9   : > { %v7729_v12 = vpop.eup %6293  ;;  %6313 = vpow2.f32 %v4245_v22  ;;  %v5249_v60 = vadd.f32 -1.0, %v1815_v23  ;;  %v1831_v13 = vadd.f32 %v7663_v47, %v7334_v39  ;;  %v4263_v21 = vmul.f32 1.442695, %v5250_v3 }
 0x4aa   : > { %v7733_v29 = vpop.eup %6295  ;;  %6315 = vpow2.f32 %v4255_v36  ;;  %v5254_v9 = vadd.f32 -1.0, %v1836_v15  ;;  %v1852_v16 = vadd.f32 %v7338_v1, %v7663_v47  ;;  %v4259_v24 = vmul.f32 1.442695, %v5248_v10 }
 0x4ab   : > { %v7737_v33 = vpop.eup %6297  ;;  %6317 = vpow2.f32 %v4251_v37  ;;  %v5252_v62 = vadd.f32 -1.0, %v1828_v53  ;;  %v1844_v26 = vadd.f32 %v7663_v47, %v7340_v20  ;;  %v4265_v39 = vmul.f32 1.442695, %v5251_v11 }
 0x4ac   : > { %v7741_v14 = vpop.eup %6299  ;;  %6319 = vpow2.f32 %v4257_v52  ;;  %v5255_v48 = vadd.f32 -1.0, %v1839_v30  ;;  %v1855_v27 = vadd.f32 %v7343_v25, %v7663_v47  ;;  %v4261_v1 = vmul.f32 1.442695, %v5249_v60 }
 0x4ad   : > { %v7745_v50 = vpop.eup %6301  ;;  %6321 = vpow2.f32 %v4253_v6  ;;  %v5253_v17 = vadd.f32 -1.0, %v1831_v13  ;;  %v1847_v28 = vadd.f32 %v7663_v47, %v7346_v42  ;;  %v4271_v20 = vmul.f32 1.442695, %v5254_v9 }
 0x4ae   : > { %v7749_v46 = vpop.eup %6303  ;;  %6323 = vpow2.f32 %v4263_v21  ;;  %v5258_v51 = vadd.f32 -1.0, %v1852_v16  ;;  %v1868_v31 = vadd.f32 %v7350_v63, %v7663_v47  ;;  %v4267_v25 = vmul.f32 1.442695, %v5252_v62 }
 0x4af   : > { %v7753_v5 = vpop.eup %6305  ;;  %6325 = vpow2.f32 %v4259_v24  ;;  %v5256_v55 = vadd.f32 -1.0, %v1844_v26  ;;  %v1860_v45 = vadd.f32 %v7663_v47, %v7352_v18  ;;  %v4273_v42 = vmul.f32 1.442695, %v5255_v48 }
 0x4b0   : > { %v7757_v0 = vpop.eup %6307  ;;  %6327 = vpow2.f32 %v4265_v39  ;;  %v5259_v7 = vadd.f32 -1.0, %v1855_v27  ;;  %v1871_v59 = vadd.f32 %v7355_v19, %v7663_v47  ;;  %v4269_v63 = vmul.f32 1.442695, %v5253_v17 }
 0x4b1   : > { %v7761_v41 = vpop.eup %6309  ;;  %6329 = vpow2.f32 %v4261_v1  ;;  %v5257_v8 = vadd.f32 -1.0, %v1847_v28  ;;  %v1863_v22 = vadd.f32 %v7663_v47, %v7358_v32  ;;  %v4279_v18 = vmul.f32 1.442695, %v5258_v51 }
 0x4b2   : > { %v7765_v2 = vpop.eup %6311  ;;  %6331 = vpow2.f32 %v4271_v20  ;;  %v5262_v23 = vadd.f32 -1.0, %v1868_v31  ;;  %v1884_v36 = vadd.f32 %v7362_v34, %v7663_v47  ;;  %v4275_v19 = vmul.f32 1.442695, %v5256_v55  ;;  %v8346_v20 = vld [vmem:[#allocation2_spill] sm:$0xff]  ;;  %v8347_v55 = vld [vmem:[#allocation3_spill] sm:$0xff] }
 0x4b3   : > { %v7769_v3 = vpop.eup %6313  ;;  %6333 = vpow2.f32 %v4267_v25  ;;  %v5260_v15 = vadd.f32 -1.0, %v1860_v45  ;;  %v1876_v37 = vadd.f32 %v7663_v47, %v7364_v35  ;;  %v4281_v32 = vmul.f32 1.442695, %v5259_v7 }
 0x4b4   : > { %v7773_v10 = vpop.eup %6315  ;;  %6335 = vpow2.f32 %v4273_v42  ;;  %v5263_v53 = vadd.f32 -1.0, %v1871_v59  ;;  %v1887_v52 = vadd.f32 %v7367_v38, %v7663_v47  ;;  %v4277_v34 = vmul.f32 1.442695, %v5257_v8  ;;  %v8348_v59 = vld [vmem:[#allocation4_spill] sm:$0xff] }
 0x4b5   : > { %v7777_v11 = vpop.eup %6317  ;;  %6337 = vpow2.f32 %v4269_v63  ;;  %v5261_v30 = vadd.f32 -1.0, %v1863_v22  ;;  %v1879_v6 = vadd.f32 %v7663_v47, %v7370_v40  ;;  %v4287_v35 = vmul.f32 1.442695, %v5262_v23  ;;  %v8349_v23 = vld [vmem:[#allocation5_spill] sm:$0xff] }
 0x4b6   : > { %v7781_v60 = vpop.eup %6319  ;;  %6339 = vpow2.f32 %v4279_v18  ;;  %v5266_v13 = vadd.f32 -1.0, %v1884_v36  ;;  %v1900_v21 = vadd.f32 %v7374_v49, %v7663_v47  ;;  %v4283_v38 = vmul.f32 1.442695, %v5260_v15 }
 0x4b7   : > { %v7785_v9 = vpop.eup %6321  ;;  %6341 = vpow2.f32 %v4275_v19  ;;  %v5264_v16 = vadd.f32 -1.0, %v1876_v37  ;;  %v1892_v24 = vadd.f32 %v7663_v47, %v7376_v58  ;;  %v4289_v40 = vmul.f32 1.442695, %v5263_v53 }
 0x4b8   : > { %v7789_v62 = vpop.eup %6323  ;;  %6343 = vpow2.f32 %v4281_v32  ;;  %v5267_v26 = vadd.f32 -1.0, %v1887_v52  ;;  %v1903_v39 = vadd.f32 %v7379_v54, %v7663_v47  ;;  %v4285_v49 = vmul.f32 1.442695, %v5261_v30  ;;  %v8350_v32 = vld [vmem:[#allocation6_spill] sm:$0xff] }
 0x4b9   : > { %v7793_v48 = vpop.eup %6325  ;;  %6345 = vpow2.f32 %v4277_v34  ;;  %v5265_v27 = vadd.f32 -1.0, %v1879_v6  ;;  %v1895_v1 = vadd.f32 %v7663_v47, %v7382_v56  ;;  %v4295_v58 = vmul.f32 1.442695, %v5266_v13  ;;  %v8351_v6 = vld [vmem:[#allocation7_spill] sm:$0xff] }
 0x4ba   : > { %v7797_v17 = vpop.eup %6327  ;;  %6347 = vpow2.f32 %v4287_v35  ;;  %v5270_v28 = vadd.f32 -1.0, %v1900_v21  ;;  %v1916_v51 = vadd.f32 %v8346_v20, %v7663_v47  ;;  %v4291_v54 = vmul.f32 1.442695, %v5264_v16  ;;  %v8352_v16 = vld [vmem:[#allocation8_spill] sm:$0xff] }
 0x4bb   : > { %v7801_v31 = vpop.eup %6329  ;;  %6349 = vpow2.f32 %v4283_v38  ;;  %v5268_v25 = vadd.f32 -1.0, %v1892_v24  ;;  %v1908_v45 = vadd.f32 %v7663_v47, %v8347_v55  ;;  %v4297_v56 = vmul.f32 1.442695, %v5267_v26 }
 0x4bc   : > { %v7805_v42 = vpop.eup %6331  ;;  %6351 = vpow2.f32 %v4289_v40  ;;  %v5271_v7 = vadd.f32 -1.0, %v1903_v39  ;;  %v1919_v63 = vadd.f32 %v8348_v59, %v7663_v47  ;;  %v4293_v22 = vmul.f32 1.442695, %v5265_v27 }
 0x4bd   : > { %v7809_v8 = vpop.eup %6333  ;;  %6353 = vpow2.f32 %v4285_v49  ;;  %v5269_v18 = vadd.f32 -1.0, %v1895_v1  ;;  %v1911_v36 = vadd.f32 %v7663_v47, %v8349_v23  ;;  %v4303_v15 = vmul.f32 1.442695, %v5270_v28  ;;  %v7844_v23 = vld [vmem:[%s8324_s14] ss:$0 sm:$0xff] }
 0x4be   : > { %v7813_v19 = vpop.eup %6335  ;;  %6355 = vpow2.f32 %v4295_v58  ;;  %v5274_v37 = vadd.f32 -1.0, %v1916_v51  ;;  %v1932_v53 = vadd.f32 %v8350_v32, %v7663_v47  ;;  %v4299_v34 = vmul.f32 1.442695, %v5268_v25 }
 0x4bf   : > { %v7817_v52 = vpop.eup %6337  ;;  %6357 = vpow2.f32 %v4291_v54  ;;  %v5272_v30 = vadd.f32 -1.0, %v1908_v45  ;;  %v1924_v35 = vadd.f32 %v7663_v47, %v8351_v6  ;;  %v4305_v21 = vmul.f32 1.442695, %v5271_v7 }
 0x4c0   : > { %v7821_v13 = vpop.eup %6339  ;;  %6359 = vpow2.f32 %v4297_v56  ;;  %v5275_v38 = vadd.f32 -1.0, %v1919_v63  ;;  %v1935_v24 = vadd.f32 %v8352_v16, %v7663_v47  ;;  %v4301_v26 = vmul.f32 1.442695, %v5269_v18  ;;  %v8353_v56 = vld [vmem:[#allocation9_spill] sm:$0xff] }
 0x4c1   : > { %v7825_v40 = vpop.eup %6341  ;;  %6361 = vpow2.f32 %v4293_v22  ;;  %v5273_v39 = vadd.f32 -1.0, %v1911_v36  ;;  %v4311_v27 = vmul.f32 1.442695, %v5274_v37  ;;  %v5278_v1 = vadd.f32 -1.0, %v1932_v53  ;;  %v8354_v22 = vld [vmem:[#allocation10_spill] sm:$0xff]  ;;  %v8355_v37 = vld [vmem:[#allocation11_spill] sm:$0xff] }
 0x4c2   : > { %v7827_v49 = vpop.eup %6343  ;;  %6363 = vpow2.f32 %v4303_v15  ;;  %v4307_v28 = vmul.f32 1.442695, %v5272_v30  ;;  %v5276_v20 = vadd.f32 -1.0, %v1924_v35  ;;  %v4313_v54 = vmul.f32 1.442695, %v5275_v38  ;;  %v8356_v30 = vld [vmem:[#allocation12_spill] sm:$0xff] }
 0x4c3   : > { %v7829_v58 = vpop.eup %6345  ;;  %6365 = vpow2.f32 %v4299_v34  ;;  %v5279_v25 = vadd.f32 -1.0, %v1935_v24  ;;  %v4309_v45 = vmul.f32 1.442695, %v5273_v39  ;;  %v1927_v7 = vadd.f32 %v7663_v47, %v8353_v56 }
 0x4c4   : > { %v7831_v51 = vpop.eup %6347  ;;  %6367 = vpow2.f32 %v4305_v21  ;;  %v4319_v63 = vmul.f32 1.442695, %v5278_v1  ;;  %v1948_v18 = vadd.f32 %v8354_v22, %v7663_v47  ;;  %v4315_v15 = vmul.f32 1.442695, %v5276_v20 }
 0x4c5   : > { %v7833_v55 = vpop.eup %6349  ;;  %6369 = vpow2.f32 %v4301_v26  ;;  %v1940_v32 = vadd.f32 %v7663_v47, %v8355_v37  ;;  %v4321_v34 = vmul.f32 1.442695, %v5279_v25  ;;  %v1951_v6 = vadd.f32 %v8356_v30, %v7663_v47  ;;  %v8357_v30 = vld [vmem:[#allocation13_spill] sm:$0xff] }
 0x4c6   : > { %v7837_v59 = vpop.eup %6351  ;;  %6371 = vpow2.f32 %v4311_v27  ;;  %v5277_v38 = vadd.f32 -1.0, %v1927_v7  ;;  %v5282_v39 = vadd.f32 -1.0, %v1948_v18 }
 0x4c7   : > { %v7846_v36 = vpop.eup %6353  ;;  %6373 = vpow2.f32 %v4307_v28  ;;  %v5280_v20 = vadd.f32 -1.0, %v1940_v32  ;;  %v5283_v7 = vadd.f32 -1.0, %v1951_v6 }
 0x4c8   : > { %v7850_v53 = vpop.eup %6355  ;;  %6375 = vpow2.f32 %v4313_v54  ;;  %v4317_v18 = vmul.f32 1.442695, %v5277_v38 }
 0x4c9   : > { %v7854_v21 = vpop.eup %6357  ;;  %6377 = vpow2.f32 %v4309_v45 }
 0x4ca   : > { %v7857_v26 = vpop.eup %6359  ;;  %6379 = vpow2.f32 %v4319_v63 }
 0x4cb   : > { %v7860_v28 = vpop.eup %6361  ;;  %6381 = vpow2.f32 %v4315_v15 }
 0x4cc   : > { %v7863_v45 = vpop.eup %6363  ;;  %6383 = vpow2.f32 %v4321_v34  ;;  %v4323_v34 = vmul.f32 1.442695, %v5280_v20 }
 0x4cd   : > { %v7866_v63 = vpop.eup %6365 }
 0x4ce   : > { %v7870_v32 = vpop.eup %6367 }
 0x4cf   : > { %8358 = vst [vmem:[#allocation2_spill] sm:$0xff] %v7870_v32 }
 0x4f7   : > { %v6049_v35 = vpop.f32.mrb[164].mxu1 }
 0x4f8   : > { %v3906_v16 = vadd.f32 %v6049_v35, %v7844_v23  ;;  %v3897_v24 = vpop.f32.mrb[165].mxu1  ;;  %v1943_v35 = vadd.f32 %v7663_v47, %v8357_v30 }
 0x4f9   : > { %v3898_v27 = vadd.f32 %v7844_v23, %v3897_v24  ;;  %v6050_v1 = vpop.f32.mrb[166].mxu1 }
 0x4fa   : > { %v5294_v54 = vmul.f32 -1.442695, %v3906_v16  ;;  %v3909_v25 = vadd.f32 %v6050_v1, %v7844_v23  ;;  %v3900_v56 = vpop.f32.mrb[167].mxu1  ;;  %v4327_v16 = vmul.f32 1.442695, %v5282_v39  ;;  %v7872_v1 = vpop.eup %6369  ;;  %v5281_v30 = vadd.f32 -1.0, %v1943_v35 }
 0x4fb   : > { %v5292_v22 = vmul.f32 -1.442695, %v3898_v27  ;;  %v3901_v37 = vadd.f32 %v7844_v23, %v3900_v56  ;;  %v7874_v6 = vpop.eup %6371  ;;  %v4329_v27 = vmul.f32 1.442695, %v5283_v7 }
 0x4fc   : > { %6385 = vpow2.f32 %v5294_v54  ;;  %v5295_v15 = vmul.f32 -1.442695, %v3909_v25  ;;  %8359 = vst [vmem:[#allocation3_spill] sm:$0xff] %v7874_v6  ;;  %v7876_v38 = vpop.eup %6373 }
 0x4fd   : > { %6387 = vpow2.f32 %v5292_v22  ;;  %v5293_v24 = vmul.f32 -1.442695, %v3901_v37  ;;  %8360 = vst [vmem:[#allocation4_spill] sm:$0xff] %v7876_v38  ;;  %v7879_v32 = vpop.eup %6375 }
 0x4fe   : > { %6389 = vpow2.f32 %v5295_v15  ;;  %8361 = vst [vmem:[#allocation5_spill] sm:$0xff] %v7879_v32  ;;  %v7882_v20 = vpop.eup %6377  ;;  %v4325_v32 = vmul.f32 1.442695, %v5281_v30 }
 0x4ff   : > { %6391 = vpow2.f32 %v5293_v24  ;;  %v6053_v56 = vpop.f32.mrb[168].mxu1  ;;  %8362 = vst [vmem:[#allocation6_spill] sm:$0xff] %v7882_v20  ;;  %v7885_v24 = vpop.eup %6379 }
 0x500   : > { %6393 = vpow2.f32 %v4317_v18  ;;  %v3922_v54 = vadd.f32 %v6053_v56, %v7844_v23  ;;  %v3913_v25 = vpop.f32.mrb[169].mxu1  ;;  %8363 = vst [vmem:[#allocation7_spill] sm:$0xff] %v7885_v24  ;;  %v7888_v56 = vpop.eup %6381 }
 0x501   : > { %6395 = vpow2.f32 %v4327_v16  ;;  %v3914_v39 = vadd.f32 %v7844_v23, %v3913_v25  ;;  %v6054_v22 = vpop.f32.mrb[170].mxu1  ;;  %8364 = vst [vmem:[#allocation8_spill] sm:$0xff] %v7888_v56  ;;  %v7890_v25 = vpop.eup %6383 }
 0x502   : > { %6397 = vpow2.f32 %v4323_v34  ;;  %v5298_v37 = vmul.f32 -1.442695, %v3922_v54  ;;  %v3925_v7 = vadd.f32 %v6054_v22, %v7844_v23  ;;  %v3916_v15 = vpop.f32.mrb[171].mxu1  ;;  %8365 = vst [vmem:[#allocation9_spill] sm:$0xff] %v7890_v25 }
 0x503   : > { %6399 = vpow2.f32 %v4329_v27  ;;  %v5296_v18 = vmul.f32 -1.442695, %v3914_v39  ;;  %v3917_v35 = vadd.f32 %v7844_v23, %v3916_v15  ;;  %v4152_v27 = vlaneseq }
 0x504   : > { %6401 = vpow2.f32 %v5298_v37  ;;  %v5299_v16 = vmul.f32 -1.442695, %v3925_v7 }
 0x505   : > { %6403 = vpow2.f32 %v5296_v18  ;;  %v5297_v20 = vmul.f32 -1.442695, %v3917_v35  ;;  %v7904_v6 = vand.u32 127, %v4152_v27 }
 0x506   : > { %v6386_v34 = vpop.eup %6385  ;;  %6405 = vpow2.f32 %v5299_v16 }
 0x507   : > { %v6388_v54 = vpop.eup %6387  ;;  %v4541_v22 = vadd.f32 1.0, %v6386_v34  ;;  %6407 = vpow2.f32 %v5297_v20  ;;  %v6057_v38 = vpop.f32.mrb[172].mxu1  ;;  %vm4154_vm5 = vcmp.eq.s32.totalorder %v7904_v6, 3 }
 0x508   : > { %v6390_v24 = vpop.eup %6389  ;;  %6409 = vpow2.f32 %v4325_v32  ;;  %v4539_v39 = vadd.f32 1.0, %v6388_v54  ;;  %v3938_v15 = vadd.f32 %v6057_v38, %v7844_v23  ;;  %v3929_v56 = vpop.f32.mrb[173].mxu1  ;;  %v8368_v38 = vld [vmem:[#allocation14_spill] sm:$0xff] }
 0x509   : > { %v6392_v30 = vpop.eup %6391  ;;  %6411 = vrcp.f32 %v4541_v22  ;;  %v4542_v37 = vadd.f32 1.0, %v6390_v24  ;;  %v3930_v7 = vadd.f32 %v7844_v23, %v3929_v56  ;;  %v6058_v18 = vpop.f32.mrb[174].mxu1  ;;  %v1964_v54 = vadd.f32 %v8368_v38, %v7663_v47 }
 0x50a   : > { %v7894_v35 = vpop.eup %6393  ;;  %6413 = vrcp.f32 %v4539_v39  ;;  %v4540_v16 = vadd.f32 1.0, %v6392_v30  ;;  %v5302_v34 = vmul.f32 -1.442695, %v3938_v15  ;;  %v3941_v20 = vadd.f32 %v6058_v18, %v7844_v23  ;;  %v3932_v25 = vpop.f32.mrb[175].mxu1 }
 0x50b   : > { %8366 = vst [vmem:[#allocation10_spill] sm:$0xff] %v7894_v35  ;;  %v7897_v32 = vpop.eup %6395  ;;  %6415 = vrcp.f32 %v4542_v37  ;;  %v5300_v22 = vmul.f32 -1.442695, %v3930_v7  ;;  %v3933_v24 = vadd.f32 %v7844_v23, %v3932_v25  ;;  %v5286_v35 = vadd.f32 -1.0, %v1964_v54 }
 0x50c   : > { %8367 = vst [vmem:[#allocation11_spill] sm:$0xff] %v7897_v32  ;;  %v7902_v56 = vpop.eup %6397  ;;  %6417 = vrcp.f32 %v4540_v16  ;;  %v5303_v39 = vmul.f32 -1.442695, %v3941_v20 }
 0x50d   : > { %v7906_v15 = vpop.eup %6399  ;;  %6419 = vpow2.f32 %v5302_v34  ;;  %v5301_v30 = vmul.f32 -1.442695, %v3933_v24 }
 0x50e   : > { %8369 = vst [vmem:[#allocation12_spill] sm:$0xff] %v7906_v15  ;;  %v6402_v18 = vpop.eup %6401  ;;  %6421 = vpow2.f32 %v5300_v22 }
 0x50f   : > { %v6404_v32 = vpop.eup %6403  ;;  %v4545_v38 = vadd.f32 1.0, %v6402_v18  ;;  %6423 = vpow2.f32 %v5303_v39  ;;  %v6061_v37 = vpop.f32.mrb[176].mxu1 }
 0x510   : > { %v6406_v7 = vpop.eup %6405  ;;  %v4543_v25 = vadd.f32 1.0, %v6404_v32  ;;  %6425 = vpow2.f32 %v5301_v30  ;;  %v3954_v27 = vadd.f32 %v6061_v37, %v7844_v23  ;;  %v3945_v16 = vpop.f32.mrb[177].mxu1 }
 0x511   : > { %v6408_v20 = vpop.eup %6407  ;;  %6427 = vrcp.f32 %v4545_v38  ;;  %v4546_v34 = vadd.f32 1.0, %v6406_v7  ;;  %v3946_v22 = vadd.f32 %v7844_v23, %v3945_v16  ;;  %v6062_v24 = vpop.f32.mrb[178].mxu1 }
 0x512   : > { %v7912_v15 = vpop.eup %6409  ;;  %6429 = vrcp.f32 %v4543_v25  ;;  %v4544_v32 = vadd.f32 1.0, %v6408_v20  ;;  %v5306_v54 = vmul.f32 -1.442695, %v3954_v27  ;;  %v3957_v39 = vadd.f32 %v6062_v24, %v7844_v23  ;;  %v3948_v30 = vpop.f32.mrb[179].mxu1 }
 0x513   : > { %8370 = vst [vmem:[#allocation13_spill] sm:$0xff] %v7912_v15  ;;  %v6412_v18 = vpop.eup %6411  ;;  %6431 = vrcp.f32 %v4546_v34  ;;  %v5304_v38 = vmul.f32 -1.442695, %v3946_v22  ;;  %v3949_v37 = vadd.f32 %v7844_v23, %v3948_v30  ;;  %v4335_v27 = vmul.f32 1.442695, %v5286_v35 }
 0x514   : > { %v6414_v7 = vpop.eup %6413  ;;  %v4733_v16 = vsel %vm4154_vm5, %v7709_v61, %v6412_v18  ;;  %6433 = vrcp.f32 %v4544_v32  ;;  %v5307_v15 = vmul.f32 -1.442695, %v3957_v39 }
 0x515   : > { %v6416_v25 = vpop.eup %6415  ;;  %4798 = vst.msk [vmem:[%s7917_s20 + $0x10] sm:$0xff] %vm4795_vm6, %v4733_v16  ;;  %v4731_v20 = vsel %vm4154_vm5, %v7713_v44, %v6414_v7  ;;  %6435 = vpow2.f32 %v5306_v54  ;;  %v5305_v34 = vmul.f32 -1.442695, %v3949_v37 }
 0x516   : > { %v6418_v22 = vpop.eup %6417  ;;  %4796 = vst.msk [vmem:[%s7917_s20] sm:$0xff] %vm4795_vm6, %v4731_v20  ;;  %v4734_v61 = vsel %vm4154_vm5, %v7717_v57, %v6416_v25  ;;  %6437 = vpow2.f32 %v5304_v38 }
 0x517   : > { %v6420_v24 = vpop.eup %6419  ;;  %4799 = vst.msk [vmem:[%s7917_s20 + $0x18] sm:$0xff] %vm4795_vm6, %v4734_v61  ;;  %v4732_v35 = vsel %vm4154_vm5, %v7721_v4, %v6418_v22  ;;  %6439 = vpow2.f32 %v5307_v15  ;;  %v6065_v32 = vpop.f32.mrb[180].mxu1 }
 0x518   : > { %v6422_v44 = vpop.eup %6421  ;;  %4797 = vst.msk [vmem:[%s7917_s20 + $0x8] sm:$0xff] %vm4795_vm6, %v4732_v35  ;;  %v4549_v54 = vadd.f32 1.0, %v6420_v24  ;;  %6441 = vpow2.f32 %v5305_v34  ;;  %v3970_v39 = vadd.f32 %v6065_v32, %v7844_v23  ;;  %v3961_v30 = vpop.f32.mrb[181].mxu1 }
 0x519   : > { %v6424_v18 = vpop.eup %6423  ;;  %6443 = vpow2.f32 %v4335_v27  ;;  %v4547_v57 = vadd.f32 1.0, %v6422_v44  ;;  %v3962_v38 = vadd.f32 %v7844_v23, %v3961_v30  ;;  %v6066_v37 = vpop.f32.mrb[182].mxu1  ;;  %v8371_v44 = vld [vmem:[#allocation15_spill] sm:$0xff] }
 0x51a   : > { %v6426_v7 = vpop.eup %6425  ;;  %6445 = vrcp.f32 %v4549_v54  ;;  %v4550_v4 = vadd.f32 1.0, %v6424_v18  ;;  %v5310_v15 = vmul.f32 -1.442695, %v3970_v39  ;;  %v3973_v16 = vadd.f32 %v6066_v37, %v7844_v23  ;;  %v3964_v25 = vpop.f32.mrb[183].mxu1 }
 0x51b   : > { %v6428_v20 = vpop.eup %6427  ;;  %6447 = vrcp.f32 %v4547_v57  ;;  %v4548_v34 = vadd.f32 1.0, %v6426_v7  ;;  %v5308_v22 = vmul.f32 -1.442695, %v3962_v38  ;;  %v3965_v61 = vadd.f32 %v7844_v23, %v3964_v25 }
 0x51c   : > { %v6430_v27 = vpop.eup %6429  ;;  %v4737_v24 = vsel %vm4154_vm5, %v7725_v43, %v6428_v20  ;;  %6449 = vrcp.f32 %v4550_v4  ;;  %v5311_v35 = vmul.f32 -1.442695, %v3973_v16  ;;  %v1956_v54 = vadd.f32 %v7663_v47, %v8371_v44 }
 0x51d   : > { %v6432_v32 = vpop.eup %6431  ;;  %4802 = vst.msk [vmem:[%s7917_s20 + $0x30] sm:$0xff] %vm4795_vm6, %v4737_v24  ;;  %v4735_v39 = vsel %vm4154_vm5, %v7729_v12, %v6430_v27  ;;  %6451 = vrcp.f32 %v4548_v34  ;;  %v5309_v30 = vmul.f32 -1.442695, %v3965_v61 }
 0x51e   : > { %v6434_v18 = vpop.eup %6433  ;;  %4800 = vst.msk [vmem:[%s7917_s20 + $0x20] sm:$0xff] %vm4795_vm6, %v4735_v39  ;;  %v4738_v43 = vsel %vm4154_vm5, %v7733_v29, %v6432_v32  ;;  %6453 = vpow2.f32 %v5310_v15  ;;  %v5284_v29 = vadd.f32 -1.0, %v1956_v54 }
 0x51f   : > { %v6436_v57 = vpop.eup %6435  ;;  %4803 = vst.msk [vmem:[%s7917_s20 + $0x38] sm:$0xff] %vm4795_vm6, %v4738_v43  ;;  %v4736_v38 = vsel %vm4154_vm5, %v7737_v33, %v6434_v18  ;;  %6455 = vpow2.f32 %v5308_v22  ;;  %v6069_v37 = vpop.f32.mrb[184].mxu1 }
 0x520   : > { %v6438_v12 = vpop.eup %6437  ;;  %4801 = vst.msk [vmem:[%s7917_s20 + $0x28] sm:$0xff] %vm4795_vm6, %v4736_v38  ;;  %v4553_v7 = vadd.f32 1.0, %v6436_v57  ;;  %6457 = vpow2.f32 %v5311_v35  ;;  %v3986_v4 = vadd.f32 %v6069_v37, %v7844_v23  ;;  %v3977_v16 = vpop.f32.mrb[185].mxu1  ;;  %v4331_v37 = vmul.f32 1.442695, %v5284_v29 }
 0x521   : > { %v6440_v25 = vpop.eup %6439  ;;  %v4551_v15 = vadd.f32 1.0, %v6438_v12  ;;  %6459 = vpow2.f32 %v5309_v30  ;;  %v3978_v20 = vadd.f32 %v7844_v23, %v3977_v16  ;;  %v6070_v34 = vpop.f32.mrb[186].mxu1 }
 0x522   : > { %v6442_v61 = vpop.eup %6441  ;;  %6461 = vrcp.f32 %v4553_v7  ;;  %v4554_v33 = vadd.f32 1.0, %v6440_v25  ;;  %v5314_v22 = vmul.f32 -1.442695, %v3986_v4  ;;  %v3989_v27 = vadd.f32 %v6070_v34, %v7844_v23  ;;  %v3980_v24 = vpop.f32.mrb[187].mxu1 }
 0x523   : > { %v7970_v32 = vpop.eup %6443  ;;  %6463 = vrcp.f32 %v4551_v15  ;;  %v4552_v35 = vadd.f32 1.0, %v6442_v61  ;;  %v5312_v44 = vmul.f32 -1.442695, %v3978_v20  ;;  %v3981_v54 = vadd.f32 %v7844_v23, %v3980_v24 }
 0x524   : > { %v6446_v39 = vpop.eup %6445  ;;  %6465 = vrcp.f32 %v4554_v33  ;;  %v5315_v30 = vmul.f32 -1.442695, %v3989_v27 }
 0x525   : > { %v6448_v18 = vpop.eup %6447  ;;  %v4741_v43 = vsel %vm4154_vm5, %v7741_v14, %v6446_v39  ;;  %6467 = vrcp.f32 %v4552_v35  ;;  %v5313_v57 = vmul.f32 -1.442695, %v3981_v54 }
 0x526   : > { %v6450_v38 = vpop.eup %6449  ;;  %4806 = vst.msk [vmem:[%s7917_s20 + $0x50] sm:$0xff] %vm4795_vm6, %v4741_v43  ;;  %v4739_v12 = vsel %vm4154_vm5, %v7745_v50, %v6448_v18  ;;  %6469 = vpow2.f32 %v5314_v22 }
 0x527   : > { %v6452_v7 = vpop.eup %6451  ;;  %4804 = vst.msk [vmem:[%s7917_s20 + $0x40] sm:$0xff] %vm4795_vm6, %v4739_v12  ;;  %v4742_v4 = vsel %vm4154_vm5, %v7749_v46, %v6450_v38  ;;  %6471 = vpow2.f32 %v5312_v44  ;;  %v6073_v14 = vpop.f32.mrb[188].mxu1 }
 0x528   : > { %v6454_v16 = vpop.eup %6453  ;;  %4807 = vst.msk [vmem:[%s7917_s20 + $0x58] sm:$0xff] %vm4795_vm6, %v4742_v4  ;;  %v4740_v25 = vsel %vm4154_vm5, %v7753_v5, %v6452_v7  ;;  %6473 = vpow2.f32 %v5315_v30  ;;  %v4002_v50 = vadd.f32 %v6073_v14, %v7844_v23  ;;  %v3993_v29 = vpop.f32.mrb[189].mxu1 }
 0x529   : > { %v6456_v15 = vpop.eup %6455  ;;  %4805 = vst.msk [vmem:[%s7917_s20 + $0x48] sm:$0xff] %vm4795_vm6, %v4740_v25  ;;  %v4557_v20 = vadd.f32 1.0, %v6454_v16  ;;  %6475 = vpow2.f32 %v5313_v57  ;;  %v3994_v46 = vadd.f32 %v7844_v23, %v3993_v29  ;;  %v6074_v34 = vpop.f32.mrb[190].mxu1 }
 0x52a   : > { %v6458_v61 = vpop.eup %6457  ;;  %6477 = vpow2.f32 %v4331_v37  ;;  %v4555_v33 = vadd.f32 1.0, %v6456_v15  ;;  %v4005_v22 = vadd.f32 %v6074_v34, %v7844_v23  ;;  %v3996_v27 = vpop.f32.mrb[191].mxu1  ;;  %v5318_v35 = vmul.f32 -1.442695, %v4002_v50  ;;  %v8372_v37 = vld [vmem:[#allocation16_spill] sm:$0xff] }
 0x52b   : > { %v6460_v5 = vpop.eup %6459  ;;  %6479 = vrcp.f32 %v4557_v20  ;;  %v4558_v24 = vadd.f32 1.0, %v6458_v61  ;;  %v3997_v44 = vadd.f32 %v7844_v23, %v3996_v27  ;;  %v5316_v30 = vmul.f32 -1.442695, %v3994_v46 }
 0x52c   : > { %v6462_v54 = vpop.eup %6461  ;;  %6481 = vrcp.f32 %v4555_v33  ;;  %v4556_v39 = vadd.f32 1.0, %v6460_v5  ;;  %v5319_v57 = vmul.f32 -1.442695, %v4005_v22  ;;  %v1967_v12 = vadd.f32 %v8372_v37, %v7663_v47 }
 0x52d   : > { %v6464_v18 = vpop.eup %6463  ;;  %v4745_v43 = vsel %vm4154_vm5, %v7757_v0, %v6462_v54  ;;  %6483 = vrcp.f32 %v4558_v24  ;;  %v5317_v4 = vmul.f32 -1.442695, %v3997_v44 }
 0x52e   : > { %v6466_v38 = vpop.eup %6465  ;;  %4810 = vst.msk [vmem:[%s7917_s20 + $0x70] sm:$0xff] %vm4795_vm6, %v4745_v43  ;;  %v4743_v7 = vsel %vm4154_vm5, %v7761_v41, %v6464_v18  ;;  %6485 = vrcp.f32 %v4556_v39  ;;  %v5287_v34 = vadd.f32 -1.0, %v1967_v12 }
 0x52f   : > { %v6468_v14 = vpop.eup %6467  ;;  %4808 = vst.msk [vmem:[%s7917_s20 + $0x60] sm:$0xff] %vm4795_vm6, %v4743_v7  ;;  %v4746_v0 = vsel %vm4154_vm5, %v7765_v2, %v6466_v38  ;;  %6487 = vpow2.f32 %v5318_v35  ;;  %v6077_v16 = vpop.f32.mrb[192].mxu1 }
 0x530   : > { %v6470_v25 = vpop.eup %6469  ;;  %4811 = vst.msk [vmem:[%s7917_s20 + $0x78] sm:$0xff] %vm4795_vm6, %v4746_v0  ;;  %v4744_v47 = vsel %vm4154_vm5, %v7769_v3, %v6468_v14  ;;  %6489 = vpow2.f32 %v5316_v30  ;;  %v4018_v41 = vadd.f32 %v6077_v16, %v7844_v23  ;;  %v4009_v50 = vpop.f32.mrb[193].mxu1  ;;  %v4337_v37 = vmul.f32 1.442695, %v5287_v34 }
 0x531   : > { %v6472_v29 = vpop.eup %6471  ;;  %4809 = vst.msk [vmem:[%s7917_s20 + $0x68] sm:$0xff] %vm4795_vm6, %v4744_v47  ;;  %v4561_v15 = vadd.f32 1.0, %v6470_v25  ;;  %6491 = vpow2.f32 %v5319_v57  ;;  %v4010_v2 = vadd.f32 %v7844_v23, %v4009_v50  ;;  %v6078_v20 = vpop.f32.mrb[194].mxu1 }
 0x532   : > { %v6474_v46 = vpop.eup %6473  ;;  %v4559_v61 = vadd.f32 1.0, %v6472_v29  ;;  %6493 = vpow2.f32 %v5317_v4  ;;  %v4021_v33 = vadd.f32 %v6078_v20, %v7844_v23  ;;  %v4012_v22 = vpop.f32.mrb[195].mxu1  ;;  %v5322_v5 = vmul.f32 -1.442695, %v4018_v41 }
 0x533   : > { %v6476_v3 = vpop.eup %6475  ;;  %6495 = vrcp.f32 %v4561_v15  ;;  %v4562_v27 = vadd.f32 1.0, %v6474_v46  ;;  %v4013_v24 = vadd.f32 %v7844_v23, %v4012_v22  ;;  %v5320_v54 = vmul.f32 -1.442695, %v4010_v2 }
 0x534   : > { %v8023_v35 = vpop.eup %6477  ;;  %6497 = vrcp.f32 %v4559_v61  ;;  %v4560_v44 = vadd.f32 1.0, %v6476_v3  ;;  %v5323_v30 = vmul.f32 -1.442695, %v4021_v33 }
 0x535   : > { %v6480_v39 = vpop.eup %6479  ;;  %6499 = vrcp.f32 %v4562_v27  ;;  %v5321_v57 = vmul.f32 -1.442695, %v4013_v24 }
 0x536   : > { %v6482_v18 = vpop.eup %6481  ;;  %v4749_v43 = vsel %vm4154_vm5, %v7773_v10, %v6480_v39  ;;  %6501 = vrcp.f32 %v4560_v44 }
 0x537   : > { %v6484_v38 = vpop.eup %6483  ;;  %4814 = vst.msk [vmem:[%s7917_s20 + $0x90] sm:$0xff] %vm4795_vm6, %v4749_v43  ;;  %v4747_v12 = vsel %vm4154_vm5, %v7777_v11, %v6482_v18  ;;  %6503 = vpow2.f32 %v5322_v5  ;;  %v6081_v7 = vpop.f32.mrb[196].mxu1 }
 0x538   : > { %v6486_v4 = vpop.eup %6485  ;;  %4812 = vst.msk [vmem:[%s7917_s20 + $0x80] sm:$0xff] %vm4795_vm6, %v4747_v12  ;;  %v4750_v10 = vsel %vm4154_vm5, %v7781_v60, %v6484_v38  ;;  %6505 = vpow2.f32 %v5320_v54  ;;  %v4034_v14 = vadd.f32 %v6081_v7, %v7844_v23  ;;  %v4025_v0 = vpop.f32.mrb[197].mxu1 }
 0x539   : > { %v6488_v16 = vpop.eup %6487  ;;  %4815 = vst.msk [vmem:[%s7917_s20 + $0x98] sm:$0xff] %vm4795_vm6, %v4750_v10  ;;  %v4748_v11 = vsel %vm4154_vm5, %v7785_v9, %v6486_v4  ;;  %6507 = vpow2.f32 %v5323_v30  ;;  %v4026_v25 = vadd.f32 %v7844_v23, %v4025_v0  ;;  %v6082_v47 = vpop.f32.mrb[198].mxu1 }
 0x53a   : > { %v6490_v41 = vpop.eup %6489  ;;  %4813 = vst.msk [vmem:[%s7917_s20 + $0x88] sm:$0xff] %vm4795_vm6, %v4748_v11  ;;  %v4565_v50 = vadd.f32 1.0, %v6488_v16  ;;  %6509 = vpow2.f32 %v5321_v57  ;;  %v4037_v60 = vadd.f32 %v6082_v47, %v7844_v23  ;;  %v4028_v29 = vpop.f32.mrb[199].mxu1  ;;  %v5326_v34 = vmul.f32 -1.442695, %v4034_v14 }
 0x53b   : > { %v6492_v15 = vpop.eup %6491  ;;  %6511 = vpow2.f32 %v4337_v37  ;;  %v4563_v2 = vadd.f32 1.0, %v6490_v41  ;;  %v4029_v20 = vadd.f32 %v7844_v23, %v4028_v29  ;;  %v5324_v22 = vmul.f32 -1.442695, %v4026_v25 }
 0x53c   : > { %v6494_v46 = vpop.eup %6493  ;;  %6513 = vrcp.f32 %v4565_v50  ;;  %v4566_v9 = vadd.f32 1.0, %v6492_v15  ;;  %v5327_v5 = vmul.f32 -1.442695, %v4037_v60 }
 0x53d   : > { %v6496_v61 = vpop.eup %6495  ;;  %6515 = vrcp.f32 %v4563_v2  ;;  %v4564_v33 = vadd.f32 1.0, %v6494_v46  ;;  %v5325_v54 = vmul.f32 -1.442695, %v4029_v20 }
 0x53e   : > { %v6498_v3 = vpop.eup %6497  ;;  %v4753_v27 = vsel %vm4154_vm5, %v7789_v62, %v6496_v61  ;;  %6517 = vrcp.f32 %v4566_v9 }
 0x53f   : > { %v6500_v24 = vpop.eup %6499  ;;  %4818 = vst.msk [vmem:[%s7917_s20 + $0xb0] sm:$0xff] %vm4795_vm6, %v4753_v27  ;;  %v4751_v44 = vsel %vm4154_vm5, %v7793_v48, %v6498_v3  ;;  %6519 = vrcp.f32 %v4564_v33  ;;  %v6085_v39 = vpop.f32.mrb[200].mxu1 }
 0x540   : > { %v6502_v30 = vpop.eup %6501  ;;  %4816 = vst.msk [vmem:[%s7917_s20 + $0xa0] sm:$0xff] %vm4795_vm6, %v4751_v44  ;;  %v4754_v62 = vsel %vm4154_vm5, %v7797_v17, %v6500_v24  ;;  %6521 = vpow2.f32 %v5326_v34  ;;  %v4050_v18 = vadd.f32 %v6085_v39, %v7844_v23  ;;  %v4041_v43 = vpop.f32.mrb[201].mxu1 }
 0x541   : > { %v6504_v57 = vpop.eup %6503  ;;  %4819 = vst.msk [vmem:[%s7917_s20 + $0xb8] sm:$0xff] %vm4795_vm6, %v4754_v62  ;;  %v4752_v48 = vsel %vm4154_vm5, %v7801_v31, %v6502_v30  ;;  %6523 = vpow2.f32 %v5324_v22  ;;  %v4042_v38 = vadd.f32 %v7844_v23, %v4041_v43  ;;  %v6086_v37 = vpop.f32.mrb[202].mxu1 }
 0x542   : > { %v6506_v12 = vpop.eup %6505  ;;  %4817 = vst.msk [vmem:[%s7917_s20 + $0xa8] sm:$0xff] %vm4795_vm6, %v4752_v48  ;;  %v4569_v7 = vadd.f32 1.0, %v6504_v57  ;;  %6525 = vpow2.f32 %v5327_v5  ;;  %v4053_v17 = vadd.f32 %v6086_v37, %v7844_v23  ;;  %v4044_v4 = vpop.f32.mrb[203].mxu1  ;;  %v5330_v11 = vmul.f32 -1.442695, %v4050_v18 }
 0x543   : > { %v6508_v10 = vpop.eup %6507  ;;  %v4567_v14 = vadd.f32 1.0, %v6506_v12  ;;  %6527 = vpow2.f32 %v5325_v54  ;;  %v4045_v0 = vadd.f32 %v7844_v23, %v4044_v4  ;;  %v5328_v41 = vmul.f32 -1.442695, %v4042_v38 }
 0x544   : > { %v6510_v16 = vpop.eup %6509  ;;  %6529 = vrcp.f32 %v4569_v7  ;;  %v4570_v31 = vadd.f32 1.0, %v6508_v10  ;;  %v5331_v60 = vmul.f32 -1.442695, %v4053_v17 }
 0x545   : > { %v8073_v25 = vpop.eup %6511  ;;  %6531 = vrcp.f32 %v4567_v14  ;;  %v4568_v47 = vadd.f32 1.0, %v6510_v16  ;;  %v5329_v2 = vmul.f32 -1.442695, %v4045_v0 }
 0x546   : > { %v6514_v50 = vpop.eup %6513  ;;  %6533 = vrcp.f32 %v4570_v31 }
 0x547   : > { %v6516_v29 = vpop.eup %6515  ;;  %v4757_v15 = vsel %vm4154_vm5, %v7805_v42, %v6514_v50  ;;  %6535 = vrcp.f32 %v4568_v47  ;;  %v6089_v20 = vpop.f32.mrb[204].mxu1 }
 0x548   : > { %v6518_v46 = vpop.eup %6517  ;;  %4822 = vst.msk [vmem:[%s7917_s20 + $0xd0] sm:$0xff] %vm4795_vm6, %v4757_v15  ;;  %v4755_v9 = vsel %vm4154_vm5, %v7809_v8, %v6516_v29  ;;  %6537 = vpow2.f32 %v5330_v11  ;;  %v4066_v34 = vadd.f32 %v6089_v20, %v7844_v23  ;;  %v4057_v61 = vpop.f32.mrb[205].mxu1 }
 0x549   : > { %v6520_v33 = vpop.eup %6519  ;;  %4820 = vst.msk [vmem:[%s7917_s20 + $0xc0] sm:$0xff] %vm4795_vm6, %v4755_v9  ;;  %v4758_v42 = vsel %vm4154_vm5, %v7813_v19, %v6518_v46  ;;  %6539 = vpow2.f32 %v5328_v41  ;;  %v4058_v22 = vadd.f32 %v7844_v23, %v4057_v61  ;;  %v6090_v3 = vpop.f32.mrb[206].mxu1 }
 0x54a   : > { %v6522_v27 = vpop.eup %6521  ;;  %4823 = vst.msk [vmem:[%s7917_s20 + $0xd8] sm:$0xff] %vm4795_vm6, %v4758_v42  ;;  %v4756_v8 = vsel %vm4154_vm5, %v7817_v52, %v6520_v33  ;;  %6541 = vpow2.f32 %v5331_v60  ;;  %v5334_v5 = vmul.f32 -1.442695, %v4066_v34  ;;  %v4069_v24 = vadd.f32 %v6090_v3, %v7844_v23  ;;  %v4060_v44 = vpop.f32.mrb[207].mxu1 }
 0x54b   : > { %v6524_v54 = vpop.eup %6523  ;;  %4821 = vst.msk [vmem:[%s7917_s20 + $0xc8] sm:$0xff] %vm4795_vm6, %v4756_v8  ;;  %v4573_v19 = vadd.f32 1.0, %v6522_v27  ;;  %6543 = vpow2.f32 %v5329_v2  ;;  %v4061_v39 = vadd.f32 %v7844_v23, %v4060_v44  ;;  %v5332_v52 = vmul.f32 -1.442695, %v4058_v22 }
 0x54c   : > { %v6526_v30 = vpop.eup %6525  ;;  %v4571_v62 = vadd.f32 1.0, %v6524_v54  ;;  %6545 = vpow2.f32 %v5334_v5  ;;  %v5335_v38 = vmul.f32 -1.442695, %v4069_v24 }
 0x54d   : > { %v6528_v18 = vpop.eup %6527  ;;  %6547 = vrcp.f32 %v4573_v19  ;;  %v4574_v43 = vadd.f32 1.0, %v6526_v30  ;;  %v5333_v7 = vmul.f32 -1.442695, %v4061_v39 }
 0x54e   : > { %v6530_v57 = vpop.eup %6529  ;;  %6549 = vrcp.f32 %v4571_v62  ;;  %v4572_v48 = vadd.f32 1.0, %v6528_v18 }
 0x54f   : > { %v6532_v37 = vpop.eup %6531  ;;  %v4761_v12 = vsel %vm4154_vm5, %v7821_v13, %v6530_v57  ;;  %6551 = vrcp.f32 %v4574_v43  ;;  %v6093_v17 = vpop.f32.mrb[208].mxu1 }
 0x550   : > { %v6534_v4 = vpop.eup %6533  ;;  %4826 = vst.msk [vmem:[%s7917_s20 + $0xf0] sm:$0xff] %vm4795_vm6, %v4761_v12  ;;  %v4759_v10 = vsel %vm4154_vm5, %v7825_v40, %v6532_v37  ;;  %6553 = vrcp.f32 %v4572_v48  ;;  %v4082_v14 = vadd.f32 %v6093_v17, %v7844_v23  ;;  %v4073_v0 = vpop.f32.mrb[209].mxu1 }
 0x551   : > { %v6536_v16 = vpop.eup %6535  ;;  %4824 = vst.msk [vmem:[%s7917_s20 + $0xe0] sm:$0xff] %vm4795_vm6, %v4759_v10  ;;  %v4762_v13 = vsel %vm4154_vm5, %v7827_v49, %v6534_v4  ;;  %6555 = vpow2.f32 %v5332_v52  ;;  %v6094_v31 = vpop.f32.mrb[210].mxu1  ;;  %v4074_v41 = vadd.f32 %v7844_v23, %v4073_v0 }
 0x552   : > { %v6538_v11 = vpop.eup %6537  ;;  %4827 = vst.msk [vmem:[%s7917_s20 + $0xf8] sm:$0xff] %vm4795_vm6, %v4762_v13  ;;  %v4760_v40 = vsel %vm4154_vm5, %v7829_v58, %v6536_v16  ;;  %6557 = vpow2.f32 %v5335_v38  ;;  %v5338_v47 = vmul.f32 -1.442695, %v4082_v14  ;;  %v4076_v50 = vpop.f32.mrb[211].mxu1  ;;  %v4085_v49 = vadd.f32 %v6094_v31, %v7844_v23  ;;  %v8153_v31 = vld [vmem:[%s8324_s14] ss:$0 sm:$0xff] }
 0x553   : > { %v6540_v60 = vpop.eup %6539  ;;  %4825 = vst.msk [vmem:[%s7917_s20 + $0xe8] sm:$0xff] %vm4795_vm6, %v4760_v40  ;;  %v4577_v29 = vadd.f32 1.0, %v6538_v11  ;;  %6559 = vpow2.f32 %v5333_v7  ;;  %v4077_v20 = vadd.f32 %v7844_v23, %v4076_v50  ;;  %v5336_v61 = vmul.f32 -1.442695, %v4074_v41 }
 0x554   : > { %v6542_v15 = vpop.eup %6541  ;;  %v4575_v2 = vadd.f32 1.0, %v6540_v60  ;;  %6561 = vpow2.f32 %v5338_v47  ;;  %v5339_v22 = vmul.f32 -1.442695, %v4085_v49 }
 0x555   : > { %v6544_v46 = vpop.eup %6543  ;;  %6563 = vrcp.f32 %v4577_v29  ;;  %v4578_v58 = vadd.f32 1.0, %v6542_v15  ;;  %v5337_v5 = vmul.f32 -1.442695, %v4077_v20 }
 0x556   : > { %v6546_v9 = vpop.eup %6545  ;;  %6565 = vrcp.f32 %v4575_v2  ;;  %v4576_v34 = vadd.f32 1.0, %v6544_v46 }
 0x557   : > { %v6548_v33 = vpop.eup %6547  ;;  %6567 = vrcp.f32 %v4578_v58  ;;  %v4581_v42 = vadd.f32 1.0, %v6546_v9  ;;  %v6097_v3 = vpop.f32.mrb[212].mxu1 }
 0x558   : > { %v6550_v27 = vpop.eup %6549  ;;  %v4765_v8 = vsel %vm4154_vm5, %v7831_v51, %v6548_v33  ;;  %6569 = vrcp.f32 %v4576_v34  ;;  %v4098_v24 = vadd.f32 %v6097_v3, %v7844_v23  ;;  %v4089_v44 = vpop.f32.mrb[213].mxu1 }
 0x559   : > { %v6552_v54 = vpop.eup %6551  ;;  %4830 = vst.msk [vmem:[%s7917_s20 + $0x110] sm:$0xff] %vm4795_vm6, %v4765_v8  ;;  %v4763_v19 = vsel %vm4154_vm5, %v7833_v55, %v6550_v27  ;;  %6571 = vrcp.f32 %v4581_v42  ;;  %v6098_v39 = vpop.f32.mrb[214].mxu1  ;;  %v4090_v18 = vadd.f32 %v7844_v23, %v4089_v44 }
 0x55a   : > { %v6554_v30 = vpop.eup %6553  ;;  %4828 = vst.msk [vmem:[%s7917_s20 + $0x100] sm:$0xff] %vm4795_vm6, %v4763_v19  ;;  %v4766_v51 = vsel %vm4154_vm5, %v7837_v59, %v6552_v54  ;;  %6573 = vpow2.f32 %v5336_v61  ;;  %v5342_v62 = vmul.f32 -1.442695, %v4098_v24  ;;  %v4092_v43 = vpop.f32.mrb[215].mxu1  ;;  %v4101_v57 = vadd.f32 %v6098_v39, %v7844_v23 }
 0x55b   : > { %v6556_v52 = vpop.eup %6555  ;;  %4831 = vst.msk [vmem:[%s7917_s20 + $0x118] sm:$0xff] %vm4795_vm6, %v4766_v51  ;;  %v4764_v55 = vsel %vm4154_vm5, %v7846_v36, %v6554_v30  ;;  %6575 = vpow2.f32 %v5339_v22  ;;  %v4093_v59 = vadd.f32 %v7844_v23, %v4092_v43  ;;  %v5340_v4 = vmul.f32 -1.442695, %v4090_v18 }
 0x55c   : > { %v6558_v48 = vpop.eup %6557  ;;  %4829 = vst.msk [vmem:[%s7917_s20 + $0x108] sm:$0xff] %vm4795_vm6, %v4764_v55  ;;  %v4579_v38 = vadd.f32 1.0, %v6556_v52  ;;  %6577 = vpow2.f32 %v5337_v5  ;;  %v5343_v14 = vmul.f32 -1.442695, %v4101_v57 }
 0x55d   : > { %v6560_v37 = vpop.eup %6559  ;;  %v4582_v12 = vadd.f32 1.0, %v6558_v48  ;;  %6579 = vpow2.f32 %v5342_v62  ;;  %v5341_v23 = vmul.f32 -1.442695, %v4093_v59  ;;  %v8373_v62 = vld [vmem:[#allocation2_spill] sm:$0xff] }
 0x55e   : > { %v6562_v7 = vpop.eup %6561  ;;  %6581 = vrcp.f32 %v4579_v38  ;;  %v4580_v17 = vadd.f32 1.0, %v6560_v37  ;;  %v8374_v38 = vld [vmem:[#allocation3_spill] sm:$0xff] }
 0x55f   : > { %v6564_v10 = vpop.eup %6563  ;;  %6583 = vrcp.f32 %v4582_v12  ;;  %v4585_v36 = vadd.f32 1.0, %v6562_v7  ;;  %v6101_v0 = vpop.f32.mrb[216].mxu1 }
 0x560   : > { %v6566_v16 = vpop.eup %6565  ;;  %v4769_v13 = vsel %vm4154_vm5, %v7850_v53, %v6564_v10  ;;  %6585 = vrcp.f32 %v4580_v17  ;;  %v4114_v11 = vadd.f32 %v8153_v31, %v6101_v0  ;;  %v4105_v40 = vpop.f32.mrb[217].mxu1 }
 0x561   : > { %v6568_v47 = vpop.eup %6567  ;;  %4834 = vst.msk [vmem:[%s7917_s20 + $0x130] sm:$0xff] %vm4795_vm6, %v4769_v13  ;;  %v4767_v41 = vsel %vm4154_vm5, %v7854_v21, %v6566_v16  ;;  %6587 = vrcp.f32 %v4585_v36  ;;  %v4106_v53 = vadd.f32 %v8153_v31, %v4105_v40  ;;  %v6102_v50 = vpop.f32.mrb[218].mxu1 }
 0x562   : > { %v6570_v60 = vpop.eup %6569  ;;  %4832 = vst.msk [vmem:[%s7917_s20 + $0x120] sm:$0xff] %vm4795_vm6, %v4767_v41  ;;  %v4770_v29 = vsel %vm4154_vm5, %v7857_v26, %v6568_v47  ;;  %6589 = vpow2.f32 %v5340_v4  ;;  %v5346_v49 = vmul.f32 -1.442695, %v4114_v11  ;;  %v4108_v15 = vpop.f32.mrb[219].mxu1  ;;  %v4117_v46 = vadd.f32 %v8153_v31, %v6102_v50 }
 0x563   : > { %v6572_v2 = vpop.eup %6571  ;;  %4835 = vst.msk [vmem:[%s7917_s20 + $0x138] sm:$0xff] %vm4795_vm6, %v4770_v29  ;;  %v4768_v21 = vsel %vm4154_vm5, %v7860_v28, %v6570_v60  ;;  %6591 = vpow2.f32 %v5343_v14  ;;  %v5344_v20 = vmul.f32 -1.442695, %v4106_v53  ;;  %v4109_v9 = vadd.f32 %v8153_v31, %v4108_v15  ;;  %v6668_v29 = vld [vmem:[%s8317_s7] ss:$0 sm:$0xff] }
 0x564   : > { %v6574_v58 = vpop.eup %6573  ;;  %4833 = vst.msk [vmem:[%s7917_s20 + $0x128] sm:$0xff] %vm4795_vm6, %v4768_v21  ;;  %v4773_v26 = vsel %vm4154_vm5, %v7863_v45, %v6572_v2  ;;  %6593 = vpow2.f32 %v5341_v23  ;;  %v5347_v3 = vmul.f32 -1.442695, %v4117_v46  ;;  %v8376_v2 = vld [vmem:[#allocation4_spill] sm:$0xff] }
 0x565   : > { %v6576_v34 = vpop.eup %6575  ;;  %4838 = vst.msk [vmem:[%s7917_s20 + $0x150] sm:$0xff] %vm4795_vm6, %v4773_v26  ;;  %v4583_v61 = vadd.f32 1.0, %v6574_v58  ;;  %6595 = vpow2.f32 %v5346_v49  ;;  %v5345_v5 = vmul.f32 -1.442695, %v4109_v9  ;;  %v8375_v49 = vld [vmem:[#allocation17_spill] sm:$0xff]  ;;  %v8377_v26 = vld [vmem:[#allocation18_spill] sm:$0xff] }
 0x566   : > { %v6578_v28 = vpop.eup %6577  ;;  %v4586_v33 = vadd.f32 1.0, %v6576_v34  ;;  %6597 = vpow2.f32 %v5344_v20  ;;  %v1959_v15 = vadd.f32 %v6668_v29, %v8375_v49  ;;  %v1980_v9 = vadd.f32 %v6668_v29, %v8377_v26  ;;  %v8378_v34 = vld [vmem:[#allocation5_spill] sm:$0xff] }
 0x567   : > { %v6580_v42 = vpop.eup %6579  ;;  %6599 = vrcp.f32 %v4583_v61  ;;  %v4584_v22 = vadd.f32 1.0, %v6578_v28  ;;  %v6105_v27 = vpop.f32.mrb[220].mxu1 }
 0x568   : > { %v6582_v8 = vpop.eup %6581  ;;  %6601 = vrcp.f32 %v4586_v33  ;;  %v4589_v45 = vadd.f32 1.0, %v6580_v42  ;;  %v4130_v24 = vadd.f32 %v8153_v31, %v6105_v27  ;;  %v4121_v44 = vpop.f32.mrb[221].mxu1  ;;  %v8379_v42 = vld [vmem:[#allocation19_spill] sm:$0xff] }
 0x569   : > { %v6584_v54 = vpop.eup %6583  ;;  %v4771_v19 = vsel %vm4154_vm5, %v7866_v63, %v6582_v8  ;;  %6603 = vrcp.f32 %v4584_v22  ;;  %v4122_v39 = vadd.f32 %v8153_v31, %v4121_v44  ;;  %v6106_v30 = vpop.f32.mrb[222].mxu1  ;;  %v1972_v22 = vadd.f32 %v6668_v29, %v8379_v42 }
 0x56a   : > { %v6586_v51 = vpop.eup %6585  ;;  %4836 = vst.msk [vmem:[%s7917_s20 + $0x140] sm:$0xff] %vm4795_vm6, %v4771_v19  ;;  %v4774_v18 = vsel %vm4154_vm5, %v8373_v62, %v6584_v54  ;;  %6605 = vrcp.f32 %v4589_v45  ;;  %v5350_v43 = vmul.f32 -1.442695, %v4130_v24  ;;  %v4124_v52 = vpop.f32.mrb[223].mxu1  ;;  %v4133_v37 = vadd.f32 %v8153_v31, %v6106_v30 }
 0x56b   : > { %v6588_v55 = vpop.eup %6587  ;;  %4839 = vst.msk [vmem:[%s7917_s20 + $0x158] sm:$0xff] %vm4795_vm6, %v4774_v18  ;;  %v4772_v63 = vsel %vm4154_vm5, %v7872_v1, %v6586_v51  ;;  %6607 = vpow2.f32 %v5347_v3  ;;  %v5348_v57 = vmul.f32 -1.442695, %v4122_v39  ;;  %v4125_v17 = vadd.f32 %v8153_v31, %v4124_v52  ;;  %v8380_v3 = vld [vmem:[#allocation6_spill] sm:$0xff] }
 0x56c   : > { %v6590_v48 = vpop.eup %6589  ;;  %4837 = vst.msk [vmem:[%s7917_s20 + $0x148] sm:$0xff] %vm4795_vm6, %v4772_v63  ;;  %v4777_v59 = vsel %vm4154_vm5, %v8374_v38, %v6588_v55  ;;  %6609 = vpow2.f32 %v5345_v5  ;;  %v5351_v13 = vmul.f32 -1.442695, %v4133_v37  ;;  %v8381_v5 = vld [vmem:[#allocation7_spill] sm:$0xff]  ;;  %v5285_v19 = vadd.f32 -1.0, %v1959_v15 }
 0x56d   : > { %v6592_v12 = vpop.eup %6591  ;;  %4842 = vst.msk [vmem:[%s7917_s20 + $0x170] sm:$0xff] %vm4795_vm6, %v4777_v59  ;;  %v4587_v7 = vadd.f32 1.0, %v6590_v48  ;;  %6611 = vpow2.f32 %v5350_v43  ;;  %v5349_v41 = vmul.f32 -1.442695, %v4125_v17  ;;  %v5290_v51 = vadd.f32 -1.0, %v1980_v9  ;;  %v8382_v59 = vld [vmem:[#allocation8_spill] sm:$0xff] }
 0x56e   : > { %v6594_v1 = vpop.eup %6593  ;;  %v4590_v4 = vadd.f32 1.0, %v6592_v12  ;;  %6613 = vpow2.f32 %v5348_v57  ;;  %v5288_v43 = vadd.f32 -1.0, %v1972_v22  ;;  %v4333_v38 = vmul.f32 1.442695, %v5285_v19  ;;  %v8383_v17 = vld [vmem:[#allocation20_spill] sm:$0xff] }
 0x56f   : > { %v6596_v10 = vpop.eup %6595  ;;  %6615 = vrcp.f32 %v4587_v7  ;;  %v4588_v36 = vadd.f32 1.0, %v6594_v1  ;;  %v6109_v14 = vpop.f32.mrb[224].mxu1  ;;  %v4343_v7 = vmul.f32 1.442695, %v5290_v51  ;;  %v1983_v1 = vadd.f32 %v6668_v29, %v8383_v17  ;;  %v8388_v9 = vld [vmem:[#allocation12_spill] sm:$0xff] }
 0x570   : > { %v6598_v0 = vpop.eup %6597  ;;  %6617 = vrcp.f32 %v4590_v4  ;;  %v4593_v16 = vadd.f32 1.0, %v6596_v10  ;;  %v4146_v23 = vadd.f32 %v8153_v31, %v6109_v14  ;;  %v4137_v11 = vpop.f32.mrb[225].mxu1  ;;  %v8384_v4 = vld [vmem:[#allocation9_spill] sm:$0xff]  ;;  %v4339_v14 = vmul.f32 1.442695, %v5288_v43 }
 0x571   : > { %v6600_v40 = vpop.eup %6599  ;;  %6619 = vrcp.f32 %v4588_v36  ;;  %v4591_v47 = vadd.f32 1.0, %v6598_v0  ;;  %v4138_v53 = vadd.f32 %v8153_v31, %v4137_v11  ;;  %v6110_v50 = vpop.f32.mrb[226].mxu1  ;;  %v8385_v0 = vld [vmem:[#allocation21_spill] sm:$0xff] }
 0x572   : > { %v6602_v60 = vpop.eup %6601  ;;  %v4775_v21 = vsel %vm4154_vm5, %v8376_v2, %v6600_v40  ;;  %6621 = vrcp.f32 %v4593_v16  ;;  %v5354_v20 = vmul.f32 -1.442695, %v4146_v23  ;;  %v4140_v46 = vpop.f32.mrb[227].mxu1  ;;  %v4149_v8 = vadd.f32 %v8153_v31, %v6110_v50  ;;  %v8387_v40 = vld [vmem:[#allocation11_spill] sm:$0xff] }
 0x573   : > { %v6604_v58 = vpop.eup %6603  ;;  %4840 = vst.msk [vmem:[%s7917_s20 + $0x160] sm:$0xff] %vm4795_vm6, %v4775_v21  ;;  %v4778_v61 = vsel %vm4154_vm5, %v8378_v34, %v6602_v60  ;;  %6623 = vrcp.f32 %v4591_v47  ;;  %v5352_v28 = vmul.f32 -1.442695, %v4138_v53  ;;  %v4141_v44 = vadd.f32 %v8153_v31, %v4140_v46 }
 0x574   : > { %v6606_v33 = vpop.eup %6605  ;;  %4843 = vst.msk [vmem:[%s7917_s20 + $0x178] sm:$0xff] %vm4795_vm6, %v4778_v61  ;;  %v4776_v27 = vsel %vm4154_vm5, %v8380_v3, %v6604_v58  ;;  %6625 = vpow2.f32 %v5351_v13  ;;  %v5355_v55 = vmul.f32 -1.442695, %v4149_v8  ;;  %v1975_v16 = vadd.f32 %v6668_v29, %v8385_v0  ;;  %v8386_v13 = vld [vmem:[#allocation10_spill] sm:$0xff] }
 0x575   : > { %v6608_v45 = vpop.eup %6607  ;;  %4841 = vst.msk [vmem:[%s7917_s20 + $0x168] sm:$0xff] %vm4795_vm6, %v4776_v27  ;;  %v4781_v24 = vsel %vm4154_vm5, %v8381_v5, %v6606_v33  ;;  %6627 = vpow2.f32 %v5349_v41  ;;  %v5353_v57 = vmul.f32 -1.442695, %v4141_v44  ;;  %v5291_v60 = vadd.f32 -1.0, %v1983_v1  ;;  %v8389_v33 = vld [vmem:[#allocation13_spill] sm:$0xff] }
 0x576   : > { %v6610_v54 = vpop.eup %6609  ;;  %4846 = vst.msk [vmem:[%s7917_s20 + $0x190] sm:$0xff] %vm4795_vm6, %v4781_v24  ;;  %v4594_v39 = vadd.f32 1.0, %v6608_v45  ;;  %6629 = vpow2.f32 %v5354_v20  ;;  %v5289_v15 = vadd.f32 -1.0, %v1975_v16 }
 0x577   : > { %v6612_v30 = vpop.eup %6611  ;;  %v4592_v62 = vadd.f32 1.0, %v6610_v54  ;;  %6631 = vpow2.f32 %v5352_v28  ;;  %v4345_v26 = vmul.f32 1.442695, %v5291_v60 }
 0x578   : > { %v6614_v18 = vpop.eup %6613  ;;  %6633 = vrcp.f32 %v4594_v39  ;;  %v4597_v52 = vadd.f32 1.0, %v6612_v30  ;;  %v4341_v28 = vmul.f32 1.442695, %v5289_v15 }
 0x579   : > { %v6616_v63 = vpop.eup %6615  ;;  %6635 = vrcp.f32 %v4592_v62  ;;  %v4595_v31 = vadd.f32 1.0, %v6614_v18 }
 0x57a   : > { %v6618_v48 = vpop.eup %6617  ;;  %v4779_v37 = vsel %vm4154_vm5, %v8382_v59, %v6616_v63  ;;  %6637 = vrcp.f32 %v4597_v52 }
 0x57b   : > { %v6620_v12 = vpop.eup %6619  ;;  %4844 = vst.msk [vmem:[%s7917_s20 + $0x180] sm:$0xff] %vm4795_vm6, %v4779_v37  ;;  %v4782_v10 = vsel %vm4154_vm5, %v8384_v4, %v6618_v48  ;;  %6639 = vrcp.f32 %v4595_v31 }
 0x57c   : > { %v6622_v36 = vpop.eup %6621  ;;  %4847 = vst.msk [vmem:[%s7917_s20 + $0x198] sm:$0xff] %vm4795_vm6, %v4782_v10  ;;  %v4780_v23 = vsel %vm4154_vm5, %v8386_v13, %v6620_v12  ;;  %6641 = vpow2.f32 %v5355_v55 }
 0x57d   : > { %v6624_v11 = vpop.eup %6623  ;;  %4845 = vst.msk [vmem:[%s7917_s20 + $0x188] sm:$0xff] %vm4795_vm6, %v4780_v23  ;;  %v4785_v47 = vsel %vm4154_vm5, %v8387_v40, %v6622_v36  ;;  %6643 = vpow2.f32 %v5353_v57 }
 0x57e   : > { %v6626_v41 = vpop.eup %6625  ;;  %6645 = vpow2.f32 %v4333_v38  ;;  %4850 = vst.msk [vmem:[%s7917_s20 + $0x1b0] sm:$0xff] %vm4795_vm6, %v4785_v47  ;;  %v4783_v53 = vsel %vm4154_vm5, %v7902_v56, %v6624_v11 }
 0x57f   : > { %v6628_v50 = vpop.eup %6627  ;;  %6647 = vpow2.f32 %v4343_v7  ;;  %4848 = vst.msk [vmem:[%s7917_s20 + $0x1a0] sm:$0xff] %vm4795_vm6, %v4783_v53  ;;  %v4598_v29 = vadd.f32 1.0, %v6626_v41 }
 0x580   : > { %v6630_v49 = vpop.eup %6629  ;;  %6649 = vpow2.f32 %v4339_v14  ;;  %v4596_v2 = vadd.f32 1.0, %v6628_v50 }
 0x581   : > { %v6632_v21 = vpop.eup %6631  ;;  %6651 = vrcp.f32 %v4598_v29  ;;  %v4601_v20 = vadd.f32 1.0, %v6630_v49 }
 0x582   : > { %v6634_v46 = vpop.eup %6633  ;;  %6653 = vrcp.f32 %v4596_v2  ;;  %v4599_v58 = vadd.f32 1.0, %v6632_v21 }
 0x583   : > { %v6636_v56 = vpop.eup %6635  ;;  %v4786_v34 = vsel %vm4154_vm5, %v8388_v9, %v6634_v46  ;;  %6655 = vrcp.f32 %v4601_v20 }
 0x584   : > { %v6638_v61 = vpop.eup %6637  ;;  %4851 = vst.msk [vmem:[%s7917_s20 + $0x1b8] sm:$0xff] %vm4795_vm6, %v4786_v34  ;;  %v4784_v42 = vsel %vm4154_vm5, %v8389_v33, %v6636_v56  ;;  %6657 = vrcp.f32 %v4599_v58 }
 0x585   : > { %v6640_v22 = vpop.eup %6639  ;;  %4849 = vst.msk [vmem:[%s7917_s20 + $0x1a8] sm:$0xff] %vm4795_vm6, %v4784_v42  ;;  %v4789_v3 = vsel %vm4154_vm5, %v7970_v32, %v6638_v61  ;;  %6659 = vpow2.f32 %v4345_v26 }
 0x586   : > { %v6642_v27 = vpop.eup %6641  ;;  %4854 = vst.msk [vmem:[%s7917_s20 + $0x1d0] sm:$0xff] %vm4795_vm6, %v4789_v3  ;;  %v4787_v8 = vsel %vm4154_vm5, %v8023_v35, %v6640_v22  ;;  %6661 = vpow2.f32 %v4341_v28 }
 0x587   : > { %v6644_v45 = vpop.eup %6643  ;;  %4852 = vst.msk [vmem:[%s7917_s20 + $0x1c0] sm:$0xff] %vm4795_vm6, %v4787_v8  ;;  %v4602_v5 = vadd.f32 1.0, %v6642_v27 }
 0x588   : > { %v6646_v24 = vpop.eup %6645  ;;  %v4600_v44 = vadd.f32 1.0, %v6644_v45 }
 0x589   : > { %v6648_v32 = vpop.eup %6647  ;;  %6663 = vrcp.f32 %v4602_v5 }
 0x58a   : > { %v6650_v54 = vpop.eup %6649  ;;  %6665 = vrcp.f32 %v4600_v44 }
 0x58b   : > { %v6652_v19 = vpop.eup %6651 }
 0x58c   : > { %v6654_v39 = vpop.eup %6653  ;;  %v4790_v35 = vsel %vm4154_vm5, %v8073_v25, %v6652_v19 }
 0x58d   : > { %v6656_v30 = vpop.eup %6655  ;;  %4855 = vst.msk [vmem:[%s7917_s20 + $0x1d8] sm:$0xff] %vm4795_vm6, %v4790_v35  ;;  %v4788_v51 = vsel %vm4154_vm5, %v6646_v24, %v6654_v39 }
 0x58e   : > { %v6658_v62 = vpop.eup %6657  ;;  %4853 = vst.msk [vmem:[%s7917_s20 + $0x1c8] sm:$0xff] %vm4795_vm6, %v4788_v51  ;;  %v4793_v18 = vsel %vm4154_vm5, %v6648_v32, %v6656_v30 }
 0x58f   : > { %4858 = vst.msk [vmem:[%s7917_s20 + $0x1f0] sm:$0xff] %vm4795_vm6, %v4793_v18  ;;  %v4791_v43 = vsel %vm4154_vm5, %v6650_v54, %v6658_v62  ;;  %v6660_v25 = vpop.eup %6659 }
 0x590   : > { %4856 = vst.msk [vmem:[%s7917_s20 + $0x1e0] sm:$0xff] %vm4795_vm6, %v4791_v43  ;;  %v6662_v52 = vpop.eup %6661 }
 0x593   : > { %v6664_v55 = vpop.eup %6663 }
 0x594   : > { %v6666_v63 = vpop.eup %6665  ;;  %v4794_v31 = vsel %vm4154_vm5, %v6660_v25, %v6664_v55 }
 0x595   : > { %4859 = vst.msk [vmem:[%s7917_s20 + $0x1f8] sm:$0xff] %vm4795_vm6, %v4794_v31  ;;  %v4792_v57 = vsel %vm4154_vm5, %v6662_v52, %v6666_v63 }
 0x596   : > { %4857 = vst.msk [vmem:[%s7917_s20 + $0x1e8] sm:$0xff] %vm4795_vm6, %v4792_v57 }
 0x597 PF: > { %s25_s18 = sadd.s32 1, %s6675_s18  }
 0x598   : > { %p22_p4 = scmp.ge.s32.totalorder %s25_s18, 6  }
 0x59a   :  { %24 = sbr.rel (!%p22_p4) target bundleno = 1 (0x1), region = 113 }

</bundles_post_ra>
